<compile_context>
chip_gen: v5e
topology: v5e:2x2
jax: 0.10.0
libtpu: 0.0.40
codegen_flags: <defaults>
</compile_context>

<pallas_src>
import functools

import jax
import jax.numpy as jnp
import numpy as np
from jax.experimental import pallas as pl
from jax.experimental.pallas import tpu as pltpu


# ----------------------------------------------------------------------------
# In-kernel building blocks
# ----------------------------------------------------------------------------
def _conv3x3_relu_pool(act, a_ref, t_ref, b_ref, W, Cout):
    """3x3 'same' conv + bias + ReLU + 2x2/2 max-pool on a lane-dense slab.

    act   : (M, W*Cin) f32; rows = (image, h) b-major, lanes = (w, cin).
    a_ref : (3, M, M) bf16   per-kh row shift (zero halo) fused with a row
            permutation grouping even/odd output rows into slab halves.
    t_ref : (3, W*Cin, W*Cout) bf16 block-Toeplitz kw/channel matrices with
            columns permuted so even/odd w outputs land in the two lane halves.
    b_ref : (1, W*Cout) f32 bias tiled over w.
    Returns (M//2, (W//2)*Cout) f32 slab in the same (rows, lanes) convention.
    """
    M = act.shape[0]
    x_bf = act.astype(jnp.bfloat16)
    y = None
    for kh in range(3):
        shifted = jnp.dot(a_ref[kh], x_bf,
                          preferred_element_type=jnp.float32).astype(jnp.bfloat16)
        part = jnp.dot(shifted, t_ref[kh], preferred_element_type=jnp.float32)
        y = part if y is None else y + part
    y = jnp.maximum(y + b_ref[...], 0.0)                  # (M, W*Cout) f32
    half = (W // 2) * Cout                                # multiple of 128
    y = jnp.maximum(y[:, :half], y[:, half:])             # w-pair max (aligned lanes)
    y = jnp.maximum(y[:M // 2, :], y[M // 2:, :])         # h-pair max (aligned rows)
    return y                                              # (M//2, (W//2)*Cout)


def fused_cnn_kernel(x_ref, a1_ref, t1_ref, b1_ref, a2_ref, t2_ref, b2_ref,
                     a3_ref, t3_ref, b3_ref, pm_ref, f1_ref, fb1_ref,
                     f2_ref, fb2_ref, o_ref, *, B, H, W):
    # (B, H, W*3) -> (B*H, W*3) slab; rows = (image, h), lanes = (w, cin).
    act = x_ref[...].reshape(B * H, W * 3)

    act = _conv3x3_relu_pool(act, a1_ref, t1_ref, b1_ref, W, 32)
    act = _conv3x3_relu_pool(act, a2_ref, t2_ref, b2_ref, W // 2, 64)
    act = _conv3x3_relu_pool(act, a3_ref, t3_ref, b3_ref, W // 4, 128)
    # act: (B*(H//8), (W//8)*128)

    # AdaptiveAvgPool2d((1,1)): w-sum via aligned 128-lane block adds, h-sum
    # via a tiny summing matmul; the 1/(Hf*Wf) scale is folded into fc1.
    Wf = W // 8
    feat = act[:, :128]
    for i in range(1, Wf):
        feat = feat + act[:, i * 128:(i + 1) * 128]       # (B*Hf, 128)
    pooled = jnp.dot(pm_ref[...], feat.astype(jnp.bfloat16),
                     preferred_element_type=jnp.float32)  # (B, 128)

    h1 = jnp.dot(pooled.astype(jnp.bfloat16), f1_ref[...],
                 preferred_element_type=jnp.float32) + fb1_ref[...]
    h1 = jnp.maximum(h1, 0.0)
    # TODO(synk): Dropout(p=0.4) is identity at inference; training-mode RNG
    # mask not implemented.
    logits = jnp.dot(h1.astype(jnp.bfloat16), f2_ref[...],
                     preferred_element_type=jnp.float32) + fb2_ref[...]
    o_ref[0] = logits.astype(o_ref.dtype)                 # (B, Gp)


# ----------------------------------------------------------------------------
# One-time host-side weight packing
# ----------------------------------------------------------------------------
def _shift_perm_mats(B, H):
    """A[kh] (B*H, B*H): kh row shift with zero halo, fused with the even/odd
    output-row permutation that makes the h max-pool an aligned half-slab max."""
    M = B * H
    A = np.zeros((3, M, M), np.float32)
    for kh in range(3):
        dh = kh - 1
        for b in range(B):
            for h in range(H):
                hs = h + dh
                if 0 <= hs < H:
                    r_new = (h % 2) * (M // 2) + b * (H // 2) + (h // 2)
                    A[kh, r_new, b * H + hs] = 1.0
    return A


def _toeplitz_mats(w_hwio, W):
    """T[kh] (W*Cin, W*Cout): kw taps + channel mix as a block-Toeplitz matrix
    ('same' zero padding = the band); output columns permuted even/odd-w so the
    w max-pool is an aligned half-slab max."""
    KH, KW, Ci, Co = w_hwio.shape
    T = np.zeros((KH, W * Ci, W * Co), np.float32)
    half = (W // 2) * Co
    for kh in range(KH):
        for kw in range(KW):
            for wo in range(W):
                wi = wo + kw - 1
                if 0 <= wi < W:
                    col = (wo % 2) * half + (wo // 2) * Co
                    T[kh, wi * Ci:(wi + 1) * Ci, col:col + Co] = w_hwio[kh, kw]
    return T


# ----------------------------------------------------------------------------
# Wrapper: layout transform + weight packing + single pallas_call
# ----------------------------------------------------------------------------
def movie_genre_cnn_forward(x_nchw, params, batch_tile=None):
    x = jnp.transpose(x_nchw, (0, 2, 3, 1)).astype(jnp.float32)  # NCHW -> NHWC
    N, H, W, Cin = x.shape
    assert Cin == 3, "MovieGenreClassifierCNN takes 3-channel posters"
    assert H % 8 == 0 and W % 8 == 0, "three 2x2 pools require H, W % 8 == 0"
    Hf, Wf = H // 8, W // 8
    G = params["fc2_w"].shape[1]
    Gp = max(128, ((G + 127) // 128) * 128)               # lane-dense logits

    # Batch tile: fold B images into the matmul M dim, but keep >=2 grid steps
    # (when N >= 2) so both v7x TensorCores get work.
    if batch_tile is None:
        batch_tile = max(1, min(8, (N + 1) // 2))
    B = int(batch_tile)
    steps = -(-N // B)
    Npad = steps * B
    if Npad != N:
        x = jnp.concatenate(
            [x, jnp.zeros((Npad - N, H, W, Cin), x.dtype)], axis=0)
    x = x.reshape(Npad, H, W * Cin)                       # lanes = (w, cin)

    bf16 = jnp.bfloat16
    a1 = jnp.asarray(_shift_perm_mats(B, H), bf16)
    a2 = jnp.asarray(_shift_perm_mats(B, H // 2), bf16)
    a3 = jnp.asarray(_shift_perm_mats(B, H // 4), bf16)
    t1 = jnp.asarray(_toeplitz_mats(np.asarray(params["conv1_w"]), W), bf16)
    t2 = jnp.asarray(_toeplitz_mats(np.asarray(params["conv2_w"]), W // 2), bf16)
    t3 = jnp.asarray(_toeplitz_mats(np.asarray(params["conv3_w"]), W // 4), bf16)
    b1 = jnp.asarray(np.tile(np.asarray(params["conv1_b"]), W)[None], jnp.float32)
    b2 = jnp.asarray(np.tile(np.asarray(params["conv2_b"]), W // 2)[None], jnp.float32)
    b3 = jnp.asarray(np.tile(np.asarray(params["conv3_b"]), W // 4)[None], jnp.float32)
    pm = np.zeros((B, B * Hf), np.float32)                # per-image h-sum
    for bi in range(B):
        pm[bi, bi * Hf:(bi + 1) * Hf] = 1.0
    pm = jnp.asarray(pm, bf16)
    f1 = jnp.asarray(np.asarray(params["fc1_w"]) / float(Hf * Wf), bf16)
    fb1 = jnp.asarray(np.asarray(params["fc1_b"])[None], jnp.float32)
    f2 = np.zeros((params["fc1_w"].shape[1], Gp), np.float32)
    f2[:, :G] = np.asarray(params["fc2_w"])
    f2 = jnp.asarray(f2, bf16)
    fb2 = np.zeros((1, Gp), np.float32)
    fb2[0, :G] = np.asarray(params["fc2_b"])
    fb2 = jnp.asarray(fb2)

    def _const_spec(arr):
        if arr.ndim == 2:
            return pl.BlockSpec(arr.shape, lambda n: (0, 0))
        return pl.BlockSpec(arr.shape, lambda n: (0, 0, 0))

    consts = (a1, t1, b1, a2, t2, b2, a3, t3, b3, pm, f1, fb1, f2, fb2)
    kern = functools.partial(fused_cnn_kernel, B=B, H=H, W=W)
    out = pl.pallas_call(
        kern,
        out_shape=jax.ShapeDtypeStruct((steps, B, Gp), jnp.float32),
        grid=(steps,),
        in_specs=[pl.BlockSpec((B, H, W * Cin), lambda n: (n, 0, 0))]
                 + [_const_spec(c) for c in consts],
        out_specs=pl.BlockSpec((1, B, Gp), lambda n: (n, 0, 0)),
        compiler_params=pltpu.CompilerParams(
            dimension_semantics=("parallel",)),
    )(x, *consts)
    return out.reshape(Npad, Gp)[:N, :G]


# ----------------------------------------------------------------------------
# Deterministic parameter init (PyTorch-default-style uniform bounds)
# ----------------------------------------------------------------------------
def init_params(key, num_genres):
    def uni(k, shape, fan_in):
        bound = 1.0 / np.sqrt(fan_in)
        return jax.random.uniform(k, shape, jnp.float32, -bound, bound)

    ks = jax.random.split(key, 10)
    return {
        "conv1_w": uni(ks[0], (3, 3, 3, 32), 27),
        "conv1_b": uni(ks[1], (32,), 27),
        "conv2_w": uni(ks[2], (3, 3, 32, 64), 288),
        "conv2_b": uni(ks[3], (64,), 288),
        "conv3_w": uni(ks[4], (3, 3, 64, 128), 576),
        "conv3_b": uni(ks[5], (128,), 576),
        "fc1_w": uni(ks[6], (128, 512), 128),
        "fc1_b": uni(ks[7], (512,), 128),
        "fc2_w": uni(ks[8], (512, num_genres), 512),
        "fc2_b": uni(ks[9], (num_genres,), 512),
    }


# ----------------------------------------------------------------------------
# Pure-JAX reference (numerical verification of the Pallas path)
# ----------------------------------------------------------------------------
def reference_forward(x_nchw, params):
    x = jnp.transpose(x_nchw, (0, 2, 3, 1)).astype(jnp.float32)
    for i in (1, 2, 3):
        y = jax.lax.conv_general_dilated(
            x, params[f"conv{i}_w"], (1, 1), "SAME",
            dimension_numbers=("NHWC", "HWIO", "NHWC")) + params[f"conv{i}_b"]
        y = jnp.maximum(y, 0.0)
        x = jax.lax.reduce_window(y, -jnp.inf, jax.lax.max,
                                  (1, 2, 2, 1), (1, 2, 2, 1), "VALID")
    feat = jnp.mean(x, axis=(1, 2))
    h = jnp.maximum(feat @ params["fc1_w"] + params["fc1_b"], 0.0)
    return h @ params["fc2_w"] + params["fc2_b"]


if __name__ == "__main__":
    num_genres = 8
    key = jax.random.PRNGKey(0)
    kx, kp = jax.random.split(key)
    # PyTorch-convention input: NCHW, 3-channel 16x16 "posters".  batch=8 so
    # batch tiling (B_TILE=4) and two parallel grid steps are exercised.
    x = jax.random.normal(kx, (8, 3, 16, 16), jnp.float32)
    params = init_params(kp, num_genres)

    out = jax.block_until_ready(movie_genre_cnn_forward(x, params))
    assert out.shape == (8, num_genres), out.shape

    ref = jax.block_until_ready(reference_forward(x, params))
    # bf16 MXU operands across 5 stacked matmul layers -> ~1e-2 tolerance.
    np.testing.assert_allclose(np.asarray(out), np.asarray(ref),
                               rtol=2e-2, atol=2e-2)
    print("KERNEL_OK")
</pallas_src>

<mosaic_0001>
module attributes {stable_mosaic.version = 11 : i64} {
  func.func @fused_cnn_kernel(%arg0: i32, %arg1: memref<4x16x48xf32, #tpu.memory_space<vmem>>, %arg2: memref<3x64x64xbf16, #tpu.memory_space<vmem>>, %arg3: memref<3x48x512xbf16, #tpu.memory_space<vmem>>, %arg4: memref<1x512xf32, #tpu.memory_space<vmem>>, %arg5: memref<3x32x32xbf16, #tpu.memory_space<vmem>>, %arg6: memref<3x256x512xbf16, #tpu.memory_space<vmem>>, %arg7: memref<1x512xf32, #tpu.memory_space<vmem>>, %arg8: memref<3x16x16xbf16, #tpu.memory_space<vmem>>, %arg9: memref<3x256x512xbf16, #tpu.memory_space<vmem>>, %arg10: memref<1x512xf32, #tpu.memory_space<vmem>>, %arg11: memref<4x8xbf16, #tpu.memory_space<vmem>>, %arg12: memref<128x512xbf16, #tpu.memory_space<vmem>>, %arg13: memref<1x512xf32, #tpu.memory_space<vmem>>, %arg14: memref<512x128xbf16, #tpu.memory_space<vmem>>, %arg15: memref<1x128xf32, #tpu.memory_space<vmem>>, %arg16: memref<1x4x128xf32, #tpu.memory_space<vmem>>) attributes {dimension_semantics = [#tpu.dimension_semantics<parallel>], iteration_bounds = array<i64: 2>, scalar_prefetch = 0 : i64, scratch_operands = 0 : i64, tpu.core_type = #tpu.core_type<tc>, window_params = [{transform_indices = @transform_0, window_bounds = array<i64: 4, 16, 48>}, {pipeline_mode = #tpu.pipeline_mode<synchronous>, transform_indices = @transform_1, window_bounds = array<i64: 3, 64, 64>}, {pipeline_mode = #tpu.pipeline_mode<synchronous>, transform_indices = @transform_2, window_bounds = array<i64: 3, 48, 512>}, {pipeline_mode = #tpu.pipeline_mode<synchronous>, transform_indices = @transform_3, window_bounds = array<i64: 1, 512>}, {pipeline_mode = #tpu.pipeline_mode<synchronous>, transform_indices = @transform_4, window_bounds = array<i64: 3, 32, 32>}, {pipeline_mode = #tpu.pipeline_mode<synchronous>, transform_indices = @transform_5, window_bounds = array<i64: 3, 256, 512>}, {pipeline_mode = #tpu.pipeline_mode<synchronous>, transform_indices = @transform_6, window_bounds = array<i64: 1, 512>}, {pipeline_mode = #tpu.pipeline_mode<synchronous>, transform_indices = @transform_7, window_bounds = array<i64: 3, 16, 16>}, {pipeline_mode = #tpu.pipeline_mode<synchronous>, transform_indices = @transform_8, window_bounds = array<i64: 3, 256, 512>}, {pipeline_mode = #tpu.pipeline_mode<synchronous>, transform_indices = @transform_9, window_bounds = array<i64: 1, 512>}, {pipeline_mode = #tpu.pipeline_mode<synchronous>, transform_indices = @transform_10, window_bounds = array<i64: 4, 8>}, {pipeline_mode = #tpu.pipeline_mode<synchronous>, transform_indices = @transform_11, window_bounds = array<i64: 128, 512>}, {pipeline_mode = #tpu.pipeline_mode<synchronous>, transform_indices = @transform_12, window_bounds = array<i64: 1, 512>}, {pipeline_mode = #tpu.pipeline_mode<synchronous>, transform_indices = @transform_13, window_bounds = array<i64: 512, 128>}, {pipeline_mode = #tpu.pipeline_mode<synchronous>, transform_indices = @transform_14, window_bounds = array<i64: 1, 128>}, {transform_indices = @transform_15, window_bounds = array<i64: 1, 4, 128>}]} {
    %c0 = arith.constant 0 : index
    %c0_0 = arith.constant 0 : index
    %c0_1 = arith.constant 0 : index
    %0 = vector.load %arg1[%c0, %c0_0, %c0_1] : memref<4x16x48xf32, #tpu.memory_space<vmem>>, vector<4x16x48xf32>
    %1 = vector.shape_cast %0 : vector<4x16x48xf32> to vector<64x48xf32>
    %2 = arith.truncf %1 : vector<64x48xf32> to vector<64x48xbf16>
    %c0_2 = arith.constant 0 : index
    %c0_3 = arith.constant 0 : index
    %c0_4 = arith.constant 0 : index
    %3 = vector.load %arg2[%c0_2, %c0_3, %c0_4] : memref<3x64x64xbf16, #tpu.memory_space<vmem>>, vector<1x64x64xbf16>
    %4 = vector.shape_cast %3 : vector<1x64x64xbf16> to vector<64x64xbf16>
    %cst = arith.constant dense<0.000000e+00> : vector<64x48xf32>
    %5 = tpu.matmul %4, %2, %cst {dimension_numbers = #tpu.dot_dimension_numbers<[1], [0], [0], [1], [0, 0, 1, 1], [], []>} : vector<64x64xbf16>, vector<64x48xbf16>, vector<64x48xf32> -> vector<64x48xf32>
    %6 = arith.truncf %5 : vector<64x48xf32> to vector<64x48xbf16>
    %c0_5 = arith.constant 0 : index
    %c0_6 = arith.constant 0 : index
    %c0_7 = arith.constant 0 : index
    %7 = vector.load %arg3[%c0_5, %c0_6, %c0_7] : memref<3x48x512xbf16, #tpu.memory_space<vmem>>, vector<1x48x512xbf16>
    %8 = vector.shape_cast %7 : vector<1x48x512xbf16> to vector<48x512xbf16>
    %cst_8 = arith.constant dense<0.000000e+00> : vector<64x512xf32>
    %9 = tpu.matmul %6, %8, %cst_8 {dimension_numbers = #tpu.dot_dimension_numbers<[1], [0], [0], [1], [0, 0, 1, 1], [], []>} : vector<64x48xbf16>, vector<48x512xbf16>, vector<64x512xf32> -> vector<64x512xf32>
    %c1 = arith.constant 1 : index
    %c0_9 = arith.constant 0 : index
    %c0_10 = arith.constant 0 : index
    %10 = vector.load %arg2[%c1, %c0_9, %c0_10] : memref<3x64x64xbf16, #tpu.memory_space<vmem>>, vector<1x64x64xbf16>
    %11 = vector.shape_cast %10 : vector<1x64x64xbf16> to vector<64x64xbf16>
    %cst_11 = arith.constant dense<0.000000e+00> : vector<64x48xf32>
    %12 = tpu.matmul %11, %2, %cst_11 {dimension_numbers = #tpu.dot_dimension_numbers<[1], [0], [0], [1], [0, 0, 1, 1], [], []>} : vector<64x64xbf16>, vector<64x48xbf16>, vector<64x48xf32> -> vector<64x48xf32>
    %13 = arith.truncf %12 : vector<64x48xf32> to vector<64x48xbf16>
    %c1_12 = arith.constant 1 : index
    %c0_13 = arith.constant 0 : index
    %c0_14 = arith.constant 0 : index
    %14 = vector.load %arg3[%c1_12, %c0_13, %c0_14] : memref<3x48x512xbf16, #tpu.memory_space<vmem>>, vector<1x48x512xbf16>
    %15 = vector.shape_cast %14 : vector<1x48x512xbf16> to vector<48x512xbf16>
    %cst_15 = arith.constant dense<0.000000e+00> : vector<64x512xf32>
    %16 = tpu.matmul %13, %15, %cst_15 {dimension_numbers = #tpu.dot_dimension_numbers<[1], [0], [0], [1], [0, 0, 1, 1], [], []>} : vector<64x48xbf16>, vector<48x512xbf16>, vector<64x512xf32> -> vector<64x512xf32>
    %17 = arith.addf %9, %16 : vector<64x512xf32>
    %c2 = arith.constant 2 : index
    %c0_16 = arith.constant 0 : index
    %c0_17 = arith.constant 0 : index
    %18 = vector.load %arg2[%c2, %c0_16, %c0_17] : memref<3x64x64xbf16, #tpu.memory_space<vmem>>, vector<1x64x64xbf16>
    %19 = vector.shape_cast %18 : vector<1x64x64xbf16> to vector<64x64xbf16>
    %cst_18 = arith.constant dense<0.000000e+00> : vector<64x48xf32>
    %20 = tpu.matmul %19, %2, %cst_18 {dimension_numbers = #tpu.dot_dimension_numbers<[1], [0], [0], [1], [0, 0, 1, 1], [], []>} : vector<64x64xbf16>, vector<64x48xbf16>, vector<64x48xf32> -> vector<64x48xf32>
    %21 = arith.truncf %20 : vector<64x48xf32> to vector<64x48xbf16>
    %c2_19 = arith.constant 2 : index
    %c0_20 = arith.constant 0 : index
    %c0_21 = arith.constant 0 : index
    %22 = vector.load %arg3[%c2_19, %c0_20, %c0_21] : memref<3x48x512xbf16, #tpu.memory_space<vmem>>, vector<1x48x512xbf16>
    %23 = vector.shape_cast %22 : vector<1x48x512xbf16> to vector<48x512xbf16>
    %cst_22 = arith.constant dense<0.000000e+00> : vector<64x512xf32>
    %24 = tpu.matmul %21, %23, %cst_22 {dimension_numbers = #tpu.dot_dimension_numbers<[1], [0], [0], [1], [0, 0, 1, 1], [], []>} : vector<64x48xbf16>, vector<48x512xbf16>, vector<64x512xf32> -> vector<64x512xf32>
    %25 = arith.addf %17, %24 : vector<64x512xf32>
    %c0_23 = arith.constant 0 : index
    %c0_24 = arith.constant 0 : index
    %26 = vector.load %arg4[%c0_23, %c0_24] : memref<1x512xf32, #tpu.memory_space<vmem>>, vector<1x512xf32>
    %27 = vector.broadcast %26 : vector<1x512xf32> to vector<64x512xf32>
    %28 = arith.addf %25, %27 : vector<64x512xf32>
    %cst_25 = arith.constant 0.000000e+00 : f32
    %29 = vector.broadcast %cst_25 : f32 to vector<64x512xf32>
    %30 = arith.maximumf %28, %29 : vector<64x512xf32>
    %31 = vector.extract_strided_slice %30 {offsets = [0, 0], sizes = [64, 256], strides = [1, 1]} : vector<64x512xf32> to vector<64x256xf32>
    %32 = vector.extract_strided_slice %30 {offsets = [0, 256], sizes = [64, 256], strides = [1, 1]} : vector<64x512xf32> to vector<64x256xf32>
    %33 = arith.maximumf %31, %32 : vector<64x256xf32>
    %34 = vector.extract_strided_slice %33 {offsets = [0, 0], sizes = [32, 256], strides = [1, 1]} : vector<64x256xf32> to vector<32x256xf32>
    %35 = vector.extract_strided_slice %33 {offsets = [32, 0], sizes = [32, 256], strides = [1, 1]} : vector<64x256xf32> to vector<32x256xf32>
    %36 = arith.maximumf %34, %35 : vector<32x256xf32>
    %37 = arith.truncf %36 : vector<32x256xf32> to vector<32x256xbf16>
    %c0_26 = arith.constant 0 : index
    %c0_27 = arith.constant 0 : index
    %c0_28 = arith.constant 0 : index
    %38 = vector.load %arg5[%c0_26, %c0_27, %c0_28] : memref<3x32x32xbf16, #tpu.memory_space<vmem>>, vector<1x32x32xbf16>
    %39 = vector.shape_cast %38 : vector<1x32x32xbf16> to vector<32x32xbf16>
    %cst_29 = arith.constant dense<0.000000e+00> : vector<32x256xf32>
    %40 = tpu.matmul %39, %37, %cst_29 {dimension_numbers = #tpu.dot_dimension_numbers<[1], [0], [0], [1], [0, 0, 1, 1], [], []>} : vector<32x32xbf16>, vector<32x256xbf16>, vector<32x256xf32> -> vector<32x256xf32>
    %41 = arith.truncf %40 : vector<32x256xf32> to vector<32x256xbf16>
    %c0_30 = arith.constant 0 : index
    %c0_31 = arith.constant 0 : index
    %c0_32 = arith.constant 0 : index
    %42 = vector.load %arg6[%c0_30, %c0_31, %c0_32] : memref<3x256x512xbf16, #tpu.memory_space<vmem>>, vector<1x256x512xbf16>
    %43 = vector.shape_cast %42 : vector<1x256x512xbf16> to vector<256x512xbf16>
    %cst_33 = arith.constant dense<0.000000e+00> : vector<32x512xf32>
    %44 = tpu.matmul %41, %43, %cst_33 {dimension_numbers = #tpu.dot_dimension_numbers<[1], [0], [0], [1], [0, 0, 1, 1], [], []>} : vector<32x256xbf16>, vector<256x512xbf16>, vector<32x512xf32> -> vector<32x512xf32>
    %c1_34 = arith.constant 1 : index
    %c0_35 = arith.constant 0 : index
    %c0_36 = arith.constant 0 : index
    %45 = vector.load %arg5[%c1_34, %c0_35, %c0_36] : memref<3x32x32xbf16, #tpu.memory_space<vmem>>, vector<1x32x32xbf16>
    %46 = vector.shape_cast %45 : vector<1x32x32xbf16> to vector<32x32xbf16>
    %cst_37 = arith.constant dense<0.000000e+00> : vector<32x256xf32>
    %47 = tpu.matmul %46, %37, %cst_37 {dimension_numbers = #tpu.dot_dimension_numbers<[1], [0], [0], [1], [0, 0, 1, 1], [], []>} : vector<32x32xbf16>, vector<32x256xbf16>, vector<32x256xf32> -> vector<32x256xf32>
    %48 = arith.truncf %47 : vector<32x256xf32> to vector<32x256xbf16>
    %c1_38 = arith.constant 1 : index
    %c0_39 = arith.constant 0 : index
    %c0_40 = arith.constant 0 : index
    %49 = vector.load %arg6[%c1_38, %c0_39, %c0_40] : memref<3x256x512xbf16, #tpu.memory_space<vmem>>, vector<1x256x512xbf16>
    %50 = vector.shape_cast %49 : vector<1x256x512xbf16> to vector<256x512xbf16>
    %cst_41 = arith.constant dense<0.000000e+00> : vector<32x512xf32>
    %51 = tpu.matmul %48, %50, %cst_41 {dimension_numbers = #tpu.dot_dimension_numbers<[1], [0], [0], [1], [0, 0, 1, 1], [], []>} : vector<32x256xbf16>, vector<256x512xbf16>, vector<32x512xf32> -> vector<32x512xf32>
    %52 = arith.addf %44, %51 : vector<32x512xf32>
    %c2_42 = arith.constant 2 : index
    %c0_43 = arith.constant 0 : index
    %c0_44 = arith.constant 0 : index
    %53 = vector.load %arg5[%c2_42, %c0_43, %c0_44] : memref<3x32x32xbf16, #tpu.memory_space<vmem>>, vector<1x32x32xbf16>
    %54 = vector.shape_cast %53 : vector<1x32x32xbf16> to vector<32x32xbf16>
    %cst_45 = arith.constant dense<0.000000e+00> : vector<32x256xf32>
    %55 = tpu.matmul %54, %37, %cst_45 {dimension_numbers = #tpu.dot_dimension_numbers<[1], [0], [0], [1], [0, 0, 1, 1], [], []>} : vector<32x32xbf16>, vector<32x256xbf16>, vector<32x256xf32> -> vector<32x256xf32>
    %56 = arith.truncf %55 : vector<32x256xf32> to vector<32x256xbf16>
    %c2_46 = arith.constant 2 : index
    %c0_47 = arith.constant 0 : index
    %c0_48 = arith.constant 0 : index
    %57 = vector.load %arg6[%c2_46, %c0_47, %c0_48] : memref<3x256x512xbf16, #tpu.memory_space<vmem>>, vector<1x256x512xbf16>
    %58 = vector.shape_cast %57 : vector<1x256x512xbf16> to vector<256x512xbf16>
    %cst_49 = arith.constant dense<0.000000e+00> : vector<32x512xf32>
    %59 = tpu.matmul %56, %58, %cst_49 {dimension_numbers = #tpu.dot_dimension_numbers<[1], [0], [0], [1], [0, 0, 1, 1], [], []>} : vector<32x256xbf16>, vector<256x512xbf16>, vector<32x512xf32> -> vector<32x512xf32>
    %60 = arith.addf %52, %59 : vector<32x512xf32>
    %c0_50 = arith.constant 0 : index
    %c0_51 = arith.constant 0 : index
    %61 = vector.load %arg7[%c0_50, %c0_51] : memref<1x512xf32, #tpu.memory_space<vmem>>, vector<1x512xf32>
    %62 = vector.broadcast %61 : vector<1x512xf32> to vector<32x512xf32>
    %63 = arith.addf %60, %62 : vector<32x512xf32>
    %cst_52 = arith.constant 0.000000e+00 : f32
    %64 = vector.broadcast %cst_52 : f32 to vector<32x512xf32>
    %65 = arith.maximumf %63, %64 : vector<32x512xf32>
    %66 = vector.extract_strided_slice %65 {offsets = [0, 0], sizes = [32, 256], strides = [1, 1]} : vector<32x512xf32> to vector<32x256xf32>
    %67 = vector.extract_strided_slice %65 {offsets = [0, 256], sizes = [32, 256], strides = [1, 1]} : vector<32x512xf32> to vector<32x256xf32>
    %68 = arith.maximumf %66, %67 : vector<32x256xf32>
    %69 = vector.extract_strided_slice %68 {offsets = [0, 0], sizes = [16, 256], strides = [1, 1]} : vector<32x256xf32> to vector<16x256xf32>
    %70 = vector.extract_strided_slice %68 {offsets = [16, 0], sizes = [16, 256], strides = [1, 1]} : vector<32x256xf32> to vector<16x256xf32>
    %71 = arith.maximumf %69, %70 : vector<16x256xf32>
    %72 = arith.truncf %71 : vector<16x256xf32> to vector<16x256xbf16>
    %c0_53 = arith.constant 0 : index
    %c0_54 = arith.constant 0 : index
    %c0_55 = arith.constant 0 : index
    %73 = vector.load %arg8[%c0_53, %c0_54, %c0_55] : memref<3x16x16xbf16, #tpu.memory_space<vmem>>, vector<1x16x16xbf16>
    %74 = vector.shape_cast %73 : vector<1x16x16xbf16> to vector<16x16xbf16>
    %cst_56 = arith.constant dense<0.000000e+00> : vector<16x256xf32>
    %75 = tpu.matmul %74, %72, %cst_56 {dimension_numbers = #tpu.dot_dimension_numbers<[1], [0], [0], [1], [0, 0, 1, 1], [], []>} : vector<16x16xbf16>, vector<16x256xbf16>, vector<16x256xf32> -> vector<16x256xf32>
    %76 = arith.truncf %75 : vector<16x256xf32> to vector<16x256xbf16>
    %c0_57 = arith.constant 0 : index
    %c0_58 = arith.constant 0 : index
    %c0_59 = arith.constant 0 : index
    %77 = vector.load %arg9[%c0_57, %c0_58, %c0_59] : memref<3x256x512xbf16, #tpu.memory_space<vmem>>, vector<1x256x512xbf16>
    %78 = vector.shape_cast %77 : vector<1x256x512xbf16> to vector<256x512xbf16>
    %cst_60 = arith.constant dense<0.000000e+00> : vector<16x512xf32>
    %79 = tpu.matmul %76, %78, %cst_60 {dimension_numbers = #tpu.dot_dimension_numbers<[1], [0], [0], [1], [0, 0, 1, 1], [], []>} : vector<16x256xbf16>, vector<256x512xbf16>, vector<16x512xf32> -> vector<16x512xf32>
    %c1_61 = arith.constant 1 : index
    %c0_62 = arith.constant 0 : index
    %c0_63 = arith.constant 0 : index
    %80 = vector.load %arg8[%c1_61, %c0_62, %c0_63] : memref<3x16x16xbf16, #tpu.memory_space<vmem>>, vector<1x16x16xbf16>
    %81 = vector.shape_cast %80 : vector<1x16x16xbf16> to vector<16x16xbf16>
    %cst_64 = arith.constant dense<0.000000e+00> : vector<16x256xf32>
    %82 = tpu.matmul %81, %72, %cst_64 {dimension_numbers = #tpu.dot_dimension_numbers<[1], [0], [0], [1], [0, 0, 1, 1], [], []>} : vector<16x16xbf16>, vector<16x256xbf16>, vector<16x256xf32> -> vector<16x256xf32>
    %83 = arith.truncf %82 : vector<16x256xf32> to vector<16x256xbf16>
    %c1_65 = arith.constant 1 : index
    %c0_66 = arith.constant 0 : index
    %c0_67 = arith.constant 0 : index
    %84 = vector.load %arg9[%c1_65, %c0_66, %c0_67] : memref<3x256x512xbf16, #tpu.memory_space<vmem>>, vector<1x256x512xbf16>
    %85 = vector.shape_cast %84 : vector<1x256x512xbf16> to vector<256x512xbf16>
    %cst_68 = arith.constant dense<0.000000e+00> : vector<16x512xf32>
    %86 = tpu.matmul %83, %85, %cst_68 {dimension_numbers = #tpu.dot_dimension_numbers<[1], [0], [0], [1], [0, 0, 1, 1], [], []>} : vector<16x256xbf16>, vector<256x512xbf16>, vector<16x512xf32> -> vector<16x512xf32>
    %87 = arith.addf %79, %86 : vector<16x512xf32>
    %c2_69 = arith.constant 2 : index
    %c0_70 = arith.constant 0 : index
    %c0_71 = arith.constant 0 : index
    %88 = vector.load %arg8[%c2_69, %c0_70, %c0_71] : memref<3x16x16xbf16, #tpu.memory_space<vmem>>, vector<1x16x16xbf16>
    %89 = vector.shape_cast %88 : vector<1x16x16xbf16> to vector<16x16xbf16>
    %cst_72 = arith.constant dense<0.000000e+00> : vector<16x256xf32>
    %90 = tpu.matmul %89, %72, %cst_72 {dimension_numbers = #tpu.dot_dimension_numbers<[1], [0], [0], [1], [0, 0, 1, 1], [], []>} : vector<16x16xbf16>, vector<16x256xbf16>, vector<16x256xf32> -> vector<16x256xf32>
    %91 = arith.truncf %90 : vector<16x256xf32> to vector<16x256xbf16>
    %c2_73 = arith.constant 2 : index
    %c0_74 = arith.constant 0 : index
    %c0_75 = arith.constant 0 : index
    %92 = vector.load %arg9[%c2_73, %c0_74, %c0_75] : memref<3x256x512xbf16, #tpu.memory_space<vmem>>, vector<1x256x512xbf16>
    %93 = vector.shape_cast %92 : vector<1x256x512xbf16> to vector<256x512xbf16>
    %cst_76 = arith.constant dense<0.000000e+00> : vector<16x512xf32>
    %94 = tpu.matmul %91, %93, %cst_76 {dimension_numbers = #tpu.dot_dimension_numbers<[1], [0], [0], [1], [0, 0, 1, 1], [], []>} : vector<16x256xbf16>, vector<256x512xbf16>, vector<16x512xf32> -> vector<16x512xf32>
    %95 = arith.addf %87, %94 : vector<16x512xf32>
    %c0_77 = arith.constant 0 : index
    %c0_78 = arith.constant 0 : index
    %96 = vector.load %arg10[%c0_77, %c0_78] : memref<1x512xf32, #tpu.memory_space<vmem>>, vector<1x512xf32>
    %97 = vector.broadcast %96 : vector<1x512xf32> to vector<16x512xf32>
    %98 = arith.addf %95, %97 : vector<16x512xf32>
    %cst_79 = arith.constant 0.000000e+00 : f32
    %99 = vector.broadcast %cst_79 : f32 to vector<16x512xf32>
    %100 = arith.maximumf %98, %99 : vector<16x512xf32>
    %101 = vector.extract_strided_slice %100 {offsets = [0, 0], sizes = [16, 256], strides = [1, 1]} : vector<16x512xf32> to vector<16x256xf32>
    %102 = vector.extract_strided_slice %100 {offsets = [0, 256], sizes = [16, 256], strides = [1, 1]} : vector<16x512xf32> to vector<16x256xf32>
    %103 = arith.maximumf %101, %102 : vector<16x256xf32>
    %104 = vector.extract_strided_slice %103 {offsets = [0, 0], sizes = [8, 256], strides = [1, 1]} : vector<16x256xf32> to vector<8x256xf32>
    %105 = vector.extract_strided_slice %103 {offsets = [8, 0], sizes = [8, 256], strides = [1, 1]} : vector<16x256xf32> to vector<8x256xf32>
    %106 = arith.maximumf %104, %105 : vector<8x256xf32>
    %107 = vector.extract_strided_slice %106 {offsets = [0, 0], sizes = [8, 128], strides = [1, 1]} : vector<8x256xf32> to vector<8x128xf32>
    %108 = vector.extract_strided_slice %106 {offsets = [0, 128], sizes = [8, 128], strides = [1, 1]} : vector<8x256xf32> to vector<8x128xf32>
    %109 = arith.addf %107, %108 : vector<8x128xf32>
    %c0_80 = arith.constant 0 : index
    %c0_81 = arith.constant 0 : index
    %110 = vector.load %arg11[%c0_80, %c0_81] : memref<4x8xbf16, #tpu.memory_space<vmem>>, vector<4x8xbf16>
    %111 = arith.truncf %109 : vector<8x128xf32> to vector<8x128xbf16>
    %cst_82 = arith.constant dense<0.000000e+00> : vector<4x128xf32>
    %112 = tpu.matmul %110, %111, %cst_82 {dimension_numbers = #tpu.dot_dimension_numbers<[1], [0], [0], [1], [0, 0, 1, 1], [], []>} : vector<4x8xbf16>, vector<8x128xbf16>, vector<4x128xf32> -> vector<4x128xf32>
    %113 = arith.truncf %112 : vector<4x128xf32> to vector<4x128xbf16>
    %c0_83 = arith.constant 0 : index
    %c0_84 = arith.constant 0 : index
    %114 = vector.load %arg12[%c0_83, %c0_84] : memref<128x512xbf16, #tpu.memory_space<vmem>>, vector<128x512xbf16>
    %cst_85 = arith.constant dense<0.000000e+00> : vector<4x512xf32>
    %115 = tpu.matmul %113, %114, %cst_85 {dimension_numbers = #tpu.dot_dimension_numbers<[1], [0], [0], [1], [0, 0, 1, 1], [], []>} : vector<4x128xbf16>, vector<128x512xbf16>, vector<4x512xf32> -> vector<4x512xf32>
    %c0_86 = arith.constant 0 : index
    %c0_87 = arith.constant 0 : index
    %116 = vector.load %arg13[%c0_86, %c0_87] : memref<1x512xf32, #tpu.memory_space<vmem>>, vector<1x512xf32>
    %117 = vector.broadcast %116 : vector<1x512xf32> to vector<4x512xf32>
    %118 = arith.addf %115, %117 : vector<4x512xf32>
    %cst_88 = arith.constant 0.000000e+00 : f32
    %119 = vector.broadcast %cst_88 : f32 to vector<4x512xf32>
    %120 = arith.maximumf %118, %119 : vector<4x512xf32>
    %121 = arith.truncf %120 : vector<4x512xf32> to vector<4x512xbf16>
    %c0_89 = arith.constant 0 : index
    %c0_90 = arith.constant 0 : index
    %122 = vector.load %arg14[%c0_89, %c0_90] : memref<512x128xbf16, #tpu.memory_space<vmem>>, vector<512x128xbf16>
    %cst_91 = arith.constant dense<0.000000e+00> : vector<4x128xf32>
    %123 = tpu.matmul %121, %122, %cst_91 {dimension_numbers = #tpu.dot_dimension_numbers<[1], [0], [0], [1], [0, 0, 1, 1], [], []>} : vector<4x512xbf16>, vector<512x128xbf16>, vector<4x128xf32> -> vector<4x128xf32>
    %c0_92 = arith.constant 0 : index
    %c0_93 = arith.constant 0 : index
    %124 = vector.load %arg15[%c0_92, %c0_93] : memref<1x128xf32, #tpu.memory_space<vmem>>, vector<1x128xf32>
    %125 = vector.broadcast %124 : vector<1x128xf32> to vector<4x128xf32>
    %126 = arith.addf %123, %125 : vector<4x128xf32>
    %c0_94 = arith.constant 0 : index
    %c0_95 = arith.constant 0 : index
    %c0_96 = arith.constant 0 : index
    %127 = vector.load %arg16[%c0_94, %c0_95, %c0_96] : memref<1x4x128xf32, #tpu.memory_space<vmem>>, vector<1x4x128xf32>
    %128 = vector.shape_cast %127 : vector<1x4x128xf32> to vector<4x128xf32>
    %129 = vector.shape_cast %126 : vector<4x128xf32> to vector<1x4x128xf32>
    tpu.vector_store %arg16[%c0_94, %c0_95, %c0_96], %129 {strides = array<i32>} : memref<1x4x128xf32, #tpu.memory_space<vmem>>, vector<1x4x128xf32>,
    return
  }
  func.func @transform_0(%arg0: i32) -> (i32, i32, i32) {
    %c0_i32 = arith.constant 0 : i32
    %c0_i32_0 = arith.constant 0 : i32
    %c0_i32_1 = arith.constant 0 : i32
    return %arg0, %c0_i32, %c0_i32_0 : i32, i32, i32
  }
  func.func @transform_1(%arg0: i32) -> (i32, i32, i32) {
    %c0_i32 = arith.constant 0 : i32
    %c0_i32_0 = arith.constant 0 : i32
    %c0_i32_1 = arith.constant 0 : i32
    %c0_i32_2 = arith.constant 0 : i32
    return %c0_i32, %c0_i32_0, %c0_i32_1 : i32, i32, i32
  }
  func.func @transform_2(%arg0: i32) -> (i32, i32, i32) {
    %c0_i32 = arith.constant 0 : i32
    %c0_i32_0 = arith.constant 0 : i32
    %c0_i32_1 = arith.constant 0 : i32
    %c0_i32_2 = arith.constant 0 : i32
    return %c0_i32, %c0_i32_0, %c0_i32_1 : i32, i32, i32
  }
  func.func @transform_3(%arg0: i32) -> (i32, i32) {
    %c0_i32 = arith.constant 0 : i32
    %c0_i32_0 = arith.constant 0 : i32
    %c0_i32_1 = arith.constant 0 : i32
    return %c0_i32, %c0_i32_0 : i32, i32
  }
  func.func @transform_4(%arg0: i32) -> (i32, i32, i32) {
    %c0_i32 = arith.constant 0 : i32
    %c0_i32_0 = arith.constant 0 : i32
    %c0_i32_1 = arith.constant 0 : i32
    %c0_i32_2 = arith.constant 0 : i32
    return %c0_i32, %c0_i32_0, %c0_i32_1 : i32, i32, i32
  }
  func.func @transform_5(%arg0: i32) -> (i32, i32, i32) {
    %c0_i32 = arith.constant 0 : i32
    %c0_i32_0 = arith.constant 0 : i32
    %c0_i32_1 = arith.constant 0 : i32
    %c0_i32_2 = arith.constant 0 : i32
    return %c0_i32, %c0_i32_0, %c0_i32_1 : i32, i32, i32
  }
  func.func @transform_6(%arg0: i32) -> (i32, i32) {
    %c0_i32 = arith.constant 0 : i32
    %c0_i32_0 = arith.constant 0 : i32
    %c0_i32_1 = arith.constant 0 : i32
    return %c0_i32, %c0_i32_0 : i32, i32
  }
  func.func @transform_7(%arg0: i32) -> (i32, i32, i32) {
    %c0_i32 = arith.constant 0 : i32
    %c0_i32_0 = arith.constant 0 : i32
    %c0_i32_1 = arith.constant 0 : i32
    %c0_i32_2 = arith.constant 0 : i32
    return %c0_i32, %c0_i32_0, %c0_i32_1 : i32, i32, i32
  }
  func.func @transform_8(%arg0: i32) -> (i32, i32, i32) {
    %c0_i32 = arith.constant 0 : i32
    %c0_i32_0 = arith.constant 0 : i32
    %c0_i32_1 = arith.constant 0 : i32
    %c0_i32_2 = arith.constant 0 : i32
    return %c0_i32, %c0_i32_0, %c0_i32_1 : i32, i32, i32
  }
  func.func @transform_9(%arg0: i32) -> (i32, i32) {
    %c0_i32 = arith.constant 0 : i32
    %c0_i32_0 = arith.constant 0 : i32
    %c0_i32_1 = arith.constant 0 : i32
    return %c0_i32, %c0_i32_0 : i32, i32
  }
  func.func @transform_10(%arg0: i32) -> (i32, i32) {
    %c0_i32 = arith.constant 0 : i32
    %c0_i32_0 = arith.constant 0 : i32
    %c0_i32_1 = arith.constant 0 : i32
    return %c0_i32, %c0_i32_0 : i32, i32
  }
  func.func @transform_11(%arg0: i32) -> (i32, i32) {
    %c0_i32 = arith.constant 0 : i32
    %c0_i32_0 = arith.constant 0 : i32
    %c0_i32_1 = arith.constant 0 : i32
    return %c0_i32, %c0_i32_0 : i32, i32
  }
  func.func @transform_12(%arg0: i32) -> (i32, i32) {
    %c0_i32 = arith.constant 0 : i32
    %c0_i32_0 = arith.constant 0 : i32
    %c0_i32_1 = arith.constant 0 : i32
    return %c0_i32, %c0_i32_0 : i32, i32
  }
  func.func @transform_13(%arg0: i32) -> (i32, i32) {
    %c0_i32 = arith.constant 0 : i32
    %c0_i32_0 = arith.constant 0 : i32
    %c0_i32_1 = arith.constant 0 : i32
    return %c0_i32, %c0_i32_0 : i32, i32
  }
  func.func @transform_14(%arg0: i32) -> (i32, i32) {
    %c0_i32 = arith.constant 0 : i32
    %c0_i32_0 = arith.constant 0 : i32
    %c0_i32_1 = arith.constant 0 : i32
    return %c0_i32, %c0_i32_0 : i32, i32
  }
  func.func @transform_15(%arg0: i32) -> (i32, i32, i32) {
    %c0_i32 = arith.constant 0 : i32
    %c0_i32_0 = arith.constant 0 : i32
    %c0_i32_1 = arith.constant 0 : i32
    return %arg0, %c0_i32, %c0_i32_0 : i32, i32, i32
  }
}

</mosaic_0001>

<bundles_post_ra>
// kernel: tpu_custom_call.1
= control target key start
LH: loop header
LB: loop body
LE: loop exit
PB: predicated region body
PF: predicated region fallthrough
CT: control target
= control target key end

     0   :  { %s10234_s0 = inlined_call_operand.hbm [shape: f32[8,16,48], index: 0, kind: input, shape index: {}]   ;;  %s10235_s1 = inlined_call_operand.hbm [shape: bf16[3,64,64], index: 1, kind: input, shape index: {}]   ;;  %s10236_s2 = inlined_call_operand.hbm [shape: bf16[3,48,512], index: 2, kind: input, shape index: {}]   ;;  %s10237_s3 = inlined_call_operand.hbm [shape: f32[1,512], index: 3, kind: input, shape index: {}]   ;;  %s10238_s4 = inlined_call_operand.hbm [shape: bf16[3,32,32], index: 4, kind: input, shape index: {}]   ;;  %s10239_s5 = inlined_call_operand.hbm [shape: bf16[3,256,512], index: 5, kind: input, shape index: {}]   ;;  %s10240_s6 = inlined_call_operand.vmem [shape: f32[1,512], index: 6, kind: input, shape index: {}]   ;;  %s10241_s7 = inlined_call_operand.hbm [shape: bf16[3,16,16], index: 7, kind: input, shape index: {}]   ;;  %s10242_s8 = inlined_call_operand.hbm [shape: bf16[3,256,512], index: 8, kind: input, shape index: {}]   ;;  %s10243_s9 = inlined_call_operand.vmem [shape: f32[1,512], index: 9, kind: input, shape index: {}]   ;;  %s10244_s10 = inlined_call_operand.hbm [shape: bf16[4,8], index: 10, kind: input, shape index: {}]   ;;  %s10245_s11 = inlined_call_operand.hbm [shape: bf16[128,512], index: 11, kind: input, shape index: {}]   ;;  %s10246_s12 = inlined_call_operand.hbm [shape: f32[1,512], index: 12, kind: input, shape index: {}]   ;;  %s10247_s13 = inlined_call_operand.hbm [shape: bf16[512,128], index: 13, kind: input, shape index: {}]   ;;  %s10248_s14 = inlined_call_operand.vmem [shape: f32[1,128], index: 14, kind: input, shape index: {}]   ;;  %s10249_s15 = inlined_call_operand.hbm [shape: f32[2,4,128], index: 15, kind: output, shape index: {}]  }
   0x1   :  { %10255 = sst [smem:[#allocation40_spill]] %s10234_s0 }
   0x2   :  { %10256 = sst [smem:[#allocation41_spill]] %s10235_s1 }
   0x3   :  { %10257 = sst [smem:[#allocation42_spill]] %s10236_s2 }
   0x4   :  { %10258 = sst [smem:[#allocation43_spill]] %s10237_s3 }
   0x5   :  { %10259 = sst [smem:[#allocation44_spill]] %s10238_s4 }
   0x6   :  { %10260 = sst [smem:[#allocation45_spill]] %s10239_s5 }
   0x7   :  { %10261 = sst [smem:[#allocation46_spill]] %s10240_s6 }
   0x8   :  { %10262 = sst [smem:[#allocation47_spill]] %s10243_s9 }
   0x9   :  { %10263 = sst [smem:[#allocation48_spill]] %s10248_s14 }
   0xa   :  { %10264 = sst [smem:[#allocation49_spill]] %s10249_s15 }
   0xb   :  { %20 = vsyncpa [#allocation3], 0 }
   0xc   :  { %22 = vsyncpa [#allocation3 + $0x1], 0 }
   0xd   :  { %23 = vsyncpa [#allocation6], 0 }
   0xe   :  { %24 = vsyncpa [#allocation9], 0 }
   0xf   :  { %25 = vsyncpa [#allocation12], 0 }
  0x10   :  { %26 = vsyncpa [#allocation15], 0 }
  0x11   :  { %27 = vsyncpa [#allocation18], 0 }
  0x12   :  { %28 = vsyncpa [#allocation21], 0 }
  0x13   :  { %29 = vsyncpa [#allocation4], 0 }
  0x14   :  { %31 = vsyncpa [#allocation4 + $0x1], 0  ;;  %s9335_s18 = smov 0   ;;  %s9337_s19 = smov 0  }
  0x15   :  { %s9339_s20 = smov 0   ;;  %s9341_s21 = smov 0  }
  0x16 LB: > { %s10265_s1 = sld [smem:[#allocation41_spill]]  ;;  %s9359_s25 = sadd.s32 4294967295, %s9236_s21   ;;  %s9236_s21 = sphi %s9341_s21, %s10317_s21   ;;  %s9232_s20 = sphi %s9339_s20, %s10316_s20   ;;  %s9228_s19 = sphi %s9337_s19, %s10315_s19   ;;  %s9224_s18 = sphi %s9335_s18, %s10314_s18  }
  0x17   : > { %p5981_p0 = scmp.ge.s32.totalorder %s9236_s21, 1  ;;  %p58_p1 = scmp.eq.s32.totalorder %s9359_s25, 0 }
  0x18   : > { %p388_p2 = scmp.lt.s32.totalorder %s9236_s21, 3  ;;  %s9238_s27 = smov [#allocation5]  }
  0x19   : > { %s401_s28 = sshll.u32 %s9238_s27, 4  ;;  %s10268_s3 = sld [smem:[#allocation43_spill]]  ;;  %s402_s28 = int_to_ptr.vmem [resolvable:$true] %s401_s28 }
  0x1a   : > { %p9364_p3 = pnand %p5981_p0, %p388_p2  ;;  %s9239_s22 = smov [#allocation8]  }
  0x1b   : > { %s430_s23 = sshll.u32 %s9239_s22, 4  ;;  %s10253_s27 = smov 64   ;;  %s431_s23 = int_to_ptr.vmem [resolvable:$true] %s430_s23 }
  0x1c   : > { %s399_s24 = sshll.u32 %s10265_s1, 4  ;;  %p8670_p4 = pneg %p9364_p3  ;;  %s400_s24 = int_to_ptr.hbm [resolvable:$true] %s399_s24 }
  0x1d   : > { %s10266_s26 = scalar_select %p9364_p3, 1, 0 }
  0x1e   : > { %p9376_p6 = pnand %p8670_p4, %p58_p1  ;;  %s9241_s1 = smov 4  }
  0x1f   : > { %10267 = sst [smem:[#allocation31_spill]] %s10266_s26  ;;  %s428_s16 = sshll.u32 %s10268_s3, 4  ;;  %s429_s16 = int_to_ptr.hbm [resolvable:$true] %s428_s16 }
  0x20   : > { %8673 = dma.hbm_to_vmem [thread:$0]  (!%p9376_p6), %s400_s24, 1536, %s402_s28, [#allocation6], %s10253_s27, %s10253_s27, %s9241_s1  }
  0x21   : > { %8679 = dma.hbm_to_vmem [thread:$0]  (!%p9376_p6), %s429_s16, 64, %s431_s23, [#allocation9]  }
  0x22   : > { %s10270_s5 = sld [smem:[#allocation45_spill]]  ;;  %s9242_s15 = smov [#allocation11]  }
  0x23   : > { %s455_s14 = sshll.u32 %s9242_s15, 4  ;;  %s484_s6 = sshll.u32 %s10242_s8, 4  ;;  %s456_s14 = int_to_ptr.vmem [resolvable:$true] %s455_s14  ;;  %s485_s6 = int_to_ptr.hbm [resolvable:$true] %s484_s6 }
  0x24   : > { %s9243_s26 = smov 256   ;;  %s9244_s0 = smov 16  }
  0x25   : > { %s9245_s24 = smov [#allocation14]   ;;  %s513_s29 = sshll.u32 %s10245_s11, 4  ;;  %s514_s29 = int_to_ptr.hbm [resolvable:$true] %s513_s29 }
  0x26   : > { %s486_s28 = sshll.u32 %s9245_s24, 4  ;;  %s10271_s2 = sld [smem:[#allocation42_spill]]  ;;  %s487_s28 = int_to_ptr.vmem [resolvable:$true] %s486_s28 }
  0x27   : > { %8691 = dma.hbm_to_vmem [thread:$0]  (!%p9376_p6), %s485_s6, 24576, %s487_s28, [#allocation15], %s9243_s26, %s9243_s26, %s9244_s0  }
  0x28   : > { %s453_s3 = sshll.u32 %s10270_s5, 4  ;;  %s9246_s22 = smov [#allocation17]   ;;  %s454_s3 = int_to_ptr.hbm [resolvable:$true] %s453_s3 }
  0x29   : > { %8685 = dma.hbm_to_vmem [thread:$0]  (!%p9376_p6), %s454_s3, 24576, %s456_s14, [#allocation12], %s9243_s26, %s9243_s26, %s9244_s0  }
  0x2a   : > { %s515_s27 = sshll.u32 %s9246_s22, 4  ;;  %s9247_s3 = smov [#allocation7]   ;;  %s516_s27 = int_to_ptr.vmem [resolvable:$true] %s515_s27 }
  0x2b   : > { %8697 = dma.hbm_to_vmem [thread:$0]  (!%p9376_p6), %s514_s29, 4096, %s516_s27, [#allocation18], %s9243_s26, %s9243_s26, %s9244_s0  }
  0x2c   : > { %s413_s30 = sshll.u32 %s10271_s2, 4  ;;  %s415_s14 = sshll.u32 %s9247_s3, 4  ;;  %s414_s30 = int_to_ptr.hbm [resolvable:$true] %s413_s30  ;;  %s416_s14 = int_to_ptr.vmem [resolvable:$true] %s415_s14 }
  0x2d   : > { %s10272_s4 = sld [smem:[#allocation44_spill]]  ;;  %s470_s15 = sshll.u32 %s10241_s7, 4  ;;  %s471_s15 = int_to_ptr.hbm [resolvable:$true] %s470_s15 }
  0x2e   : > { %8676 = dma.hbm_to_vmem [thread:$0]  (!%p9376_p6), %s414_s30, 4608, %s416_s14, [#allocation6], %s9243_s26, %s9243_s26, %s9244_s0  }
  0x2f   : > { %s9248_s9 = smov [#allocation10]   ;;  %s10273_s27 = smov 64  }
  0x30   : > { %s441_s22 = sshll.u32 %s9248_s9, 4  ;;  %s9249_s29 = smov [#allocation13]   ;;  %s442_s22 = int_to_ptr.vmem [resolvable:$true] %s441_s22 }
  0x31   : > { %s472_s3 = sshll.u32 %s9249_s29, 4  ;;  %s502_s0 = sshll.u32 %s10244_s10, 4  ;;  %s473_s3 = int_to_ptr.vmem [resolvable:$true] %s472_s3  ;;  %s503_s0 = int_to_ptr.hbm [resolvable:$true] %s502_s0 }
  0x32   : > { %8688 = dma.hbm_to_vmem [thread:$0]  (!%p9376_p6), %s471_s15, 384, %s473_s3, [#allocation12], %s10273_s27, %s10273_s27, %s9241_s1  }
  0x33   : > { %s439_s23 = sshll.u32 %s10272_s4, 4  ;;  %s528_s14 = sshll.u32 %s10246_s12, 4  ;;  %s440_s23 = int_to_ptr.hbm [resolvable:$true] %s439_s23  ;;  %s529_s14 = int_to_ptr.hbm [resolvable:$true] %s528_s14 }
  0x34   : > { %8682 = dma.hbm_to_vmem [thread:$0]  (!%p9376_p6), %s440_s23, 768, %s442_s22, [#allocation9], %s10273_s27, %s10273_s27, %s9241_s1  }
  0x35   : > { %s9250_s23 = smov [#allocation16]   ;;  %s9251_s28 = smov [#allocation19]  }
  0x36   : > { %s504_s6 = sshll.u32 %s9250_s23, 4  ;;  %s530_s15 = sshll.u32 %s9251_s28, 4  ;;  %s505_s6 = int_to_ptr.vmem [resolvable:$true] %s504_s6  ;;  %s531_s15 = int_to_ptr.vmem [resolvable:$true] %s530_s15 }
  0x37   : > { %8694 = dma.hbm_to_vmem [thread:$0]  (!%p9376_p6), %s503_s0, 32, %s505_s6, [#allocation15]  }
  0x38   : > { %s539_s29 = sshll.u32 %s10247_s13, 4  ;;  %s9252_s3 = smov [#allocation20]   ;;  %s540_s29 = int_to_ptr.hbm [resolvable:$true] %s539_s29 }
  0x39   : > { %8700 = dma.hbm_to_vmem [thread:$0]  (!%p9376_p6), %s529_s14, 64, %s531_s15, [#allocation18]  }
  0x3a   : > { %s541_s24 = sshll.u32 %s9252_s3, 4  ;;  %s5980_s16 = sadd.s32 4294967294, %s9236_s21   ;;  %s542_s24 = int_to_ptr.vmem [resolvable:$true] %s541_s24 }
  0x3b   : > { %8703 = dma.hbm_to_vmem [thread:$0]  (!%p9376_p6), %s540_s29, 4096, %s542_s24, [#allocation21], %s10273_s27, %s10273_s27, %s9241_s1  }
  0x3c   : > { %s9443_s0 = sadd.s32 1, %s9236_s21   ;;  %s44_s26 = sadd.s32 1, %s9232_s20 }
  0x3d   : > { %s41_s30 = ssub.s32 %s9236_s21, %s9443_s0  ;;  %p51_p7 = scmp.ne.s32.totalorder %s9232_s20, %s9228_s19 }
  0x3e   : > { %p42_p8 = scmp.eq.s32.totalorder %s41_s30, 0  ;;  %p52_p9 = scmp.eq.s32.totalorder %s9236_s21, 0 }
  0x3f   : > { %p57_p10 = scmp.ne.s32.totalorder %s9228_s19, %s9224_s18  ;;  %p375_p11 = scmp.eq.s32.totalorder %s9359_s25, 1 }
  0x40   : > { %s9455_s14 = scalar_select %p42_p8, %s9232_s20, %s44_s26  }
  0x41   : > { %p9457_p12 = por %p52_p9, %p51_p7  ;;  %p9463_p13 = por %p58_p1, %p57_p10 }
  0x42   : > { %p9467_p0 = por %p375_p11, %p51_p7  ;;  %p381_p2 = scmp.eq.s32.totalorder %s5980_s16, 1 }
  0x43   : > { %p8723_p4 = scmp.lt.s32.totalorder %s9236_s21, 2  ;;  %s558_s23 = sand.u32 1, %s9232_s20  }
  0x44   : > { %p9473_p6 = por %p381_p2, %p57_p10  ;;  %s5994_s28 = sshll.u32 %s558_s23, 6 }
  0x45   : > { %s8116_s15 = sshll.u32 %s9236_s21, 6  ;;  %s10278_s29 = sld [smem:[#allocation40_spill]] }
  0x46   : > { %s562_s26 = scalar_lea.vmem [#allocation2], %s5994_s28  ;;  %p9483_p7 = pnand %p8723_p4, %p9457_p12 }
  0x47   : > { %s571_s30 = sshll.u32 %s562_s26, 4  ;;  %s559_s2 = scalar_lea.sflag [#allocation3], %s558_s23  ;;  %s572_s30 = int_to_ptr.vmem [resolvable:$true] %s571_s30 }
  0x48   : > { %p9120_p9 = pneg %p9483_p7 }
  0x4b   : > { %s568_s3 = scalar_lea.hbm %s10278_s29, %s8116_s15  ;;  %s9123_s9 = scalar_lea.hbm %s10278_s29, 128 }
  0x4c   : > { %s569_s24 = sshll.u32 %s568_s3, 4  ;;  %s570_s24 = int_to_ptr.hbm [resolvable:$true] %s569_s24 }
  0x4d   : > { %s9116_s4 = sshra.s32 %s570_s24, 4  ;;  %s9117_s4 = int_to_ptr.hbm [resolvable:$true] %s9116_s4 }
  0x4e   : > { %s9118_s5 = scalar_lea.hbm %s9117_s4, 64  ;;  %p9124_p12 = scmp.lt.s32.totalorder %s9117_s4, %s10278_s29 }
  0x4f   : > { %p9119_p8 = scmp.ne.s32.totalorder %s9117_s4, %s9118_s5  ;;  %p9125_p2 = scmp.lt.s32.totalorder %s9123_s9, %s9118_s5 }
  0x51   : > { %p9121_p10 = pnand %p9120_p9, %p9119_p8  ;;  %p9126_p4 = por %p9125_p2, %p9124_p12 }
  0x53   : > { %p9122_p11 = pneg %p9121_p10 }
  0x55   : > { %p9127_p5 = pnand %p9126_p4, %p9122_p11 }
  0x57   : > { %9130 = shalt.err (!%p9127_p5)
}
  0x58   : > { %s9253_s23 = smov 128   ;;  %s9254_s3 = smov 8  }
  0x59   : > { %8707 = dma.hbm_to_vmem [thread:$0]  (!%p9483_p7), %s570_s24, 1024, %s572_s30, %s559_s2, %s9253_s23, %s9253_s23, %s9254_s3  }
  0x5a   : > { %583 = sbr.rel (%p9364_p3) target bundleno = 2227 (0x8b3), region = 80 }
  0x5f   : > { %s9500_s15 = sand.u32 1, %s9228_s19  }
  0x60   : > { %s5999_s28 = sshll.u32 %s9500_s15, 6  ;;  %s586_s4 = scalar_lea.sflag [#allocation3], %s9500_s15 }
  0x61   : > { %s589_s5 = scalar_lea.vmem [#allocation2], %s5999_s28 }
  0x62   : > { %9191 = dma.done.wait (%p9463_p13), %s586_s4, 1024  }
  0x63   : > { %9193 = vsyncadd (%p9463_p13), %s586_s4, 4294966272 }
  0x64   : > { %9195 = dma.done.wait (%p58_p1), [#allocation6], 6144  }
  0x65   : > { %9197 = vsyncadd (%p58_p1), [#allocation6], 4294961152 }
  0x66   : > { %9199 = dma.done.wait (%p58_p1), [#allocation9], 832  }
  0x67   : > { %9201 = vsyncadd (%p58_p1), [#allocation9], 4294966464 }
  0x68   : > { %9203 = dma.done.wait (%p58_p1), [#allocation12], 24960  }
  0x69   : > { %9205 = vsyncadd (%p58_p1), [#allocation12], 4294942336 }
  0x6a   : > { %9207 = dma.done.wait (%p58_p1), [#allocation15], 24608  }
  0x6b   : > { %9209 = vsyncadd (%p58_p1), [#allocation15], 4294942688 }
  0x6c   : > { %9211 = dma.done.wait (%p58_p1), [#allocation18], 4160  }
  0x6d   : > { %9213 = vsyncadd (%p58_p1), [#allocation18], 4294963136 }
  0x6e   : > { %9215 = dma.done.wait (%p58_p1), [#allocation21], 4096  }
  0x6f   : > { %9217 = vsyncadd (%p58_p1), [#allocation21], 4294963200  ;;  %v700_v0 = vld [vmem:[%s589_s5 + $0x30] sm:$0xff]  ;;  %v701_v1 = vld [vmem:[%s589_s5 + $0x38] sm:$0xff]  ;;  %vm734_vm0 = vcmask 523264   ;;  %vm939_vm1 = vcmask 392192  }
  0x70   : > { %v698_v2 = vld [vmem:[%s589_s5 + $0x20] sm:$0xff]  ;;  %v9532_v3 = vpack.c.bf16 %v701_v1, %v700_v0  ;;  %v699_v4 = vld [vmem:[%s589_s5 + $0x28] sm:$0xff]  ;;  %v696_v6 = vld [vmem:[%s589_s5 + $0x10] sm:$0xff]  ;;  %vm1679_vm2 = vcmask 261120   ;;  %s10299_s24 = sld [smem:[#allocation46_spill]]  ;;  %vm3543_vm3 = vcmask 130048  }
  0x71   : > { %v9536_v5 = vpack.c.bf16 %v699_v4, %v698_v2  ;;  %v697_v7 = vld [vmem:[%s589_s5 + $0x18] sm:$0xff]  ;;  %v694_v9 = vld [vmem:[%s589_s5] sm:$0xff]  ;;  %v695_v10 = vld [vmem:[%s589_s5 + $0x8] sm:$0xff]  ;;  %s10310_s9 = sld [smem:[#allocation47_spill]]  ;;  %vm5196_vm4 = vcmask 1043456   ;;  %vm5192_vm5 = vcmask 64512  }
  0x72   : > { %751 = vmatpush.bf16.msra.mxu0 %v9532_v3  ;;  %837 = vmatpush.bf16.msra.mxu1 %v9532_v3  ;;  %v9540_v8 = vpack.c.bf16 %v697_v7, %v696_v6  ;;  %v9544_v11 = vpack.c.bf16 %v695_v10, %v694_v9  ;;  %v8117_v12 = vld [vmem:[#allocation5] sm:$0xff]  ;;  %v8118_v14 = vld [vmem:[#allocation5 + $0x8] sm:$0xff]  ;;  %v8119_v16 = vld [vmem:[#allocation5 + $0x10] sm:$0xff]  ;;  %s10311_s23 = sld [smem:[#allocation48_spill]]  ;;  %s6011_s3 = sshll.u32 %s9500_s15, 2 }
  0x73   : > { %v8133_v13 = vld [vmem:[#allocation5 + $0x20] sm:$0xff]  ;;  %v8134_v15 = vld [vmem:[#allocation5 + $0x28] sm:$0xff]  ;;  %v8135_v17 = vld [vmem:[#allocation5 + $0x30] sm:$0xff]  ;;  %s8112_s26 = sshll.u32 %s9359_s25, 2  ;;  %s10312_s5 = sld [smem:[#allocation49_spill]] }
  0x74   : > { %v8120_v18 = vld [vmem:[#allocation5 + $0x18] sm:$0xff]  ;;  %v6086_v20 = vld [vmem:[#allocation7 + $0xa0] sm:$0xf]  ;;  %v8147_v21 = vld [vmem:[#allocation7 + $0xac] sm:$0xf0]  ;;  %s691_s1 = scalar_lea.vmem [#allocation22], %s6011_s3 }
  0x75   : > { %v8136_v19 = vld [vmem:[#allocation5 + $0x38] sm:$0xff]  ;;  %v8145_v22 = vld [vmem:[#allocation7 + $0xa4] sm:$0xf]  ;;  %v6087_v23 = vor.u32 %v8147_v21, %v6086_v20  ;;  %v6088_v24 = vld [vmem:[#allocation7 + $0xb0] sm:$0xf0]  ;;  %s5790_s25 = scalar_lea.sflag [#allocation4], %s9500_s15 }
  0x76   : > { %752 = vmatpush.bf16.msra.mxu0 %v9536_v5  ;;  %838 = vmatpush.bf16.msra.mxu1 %v9536_v5  ;;  %v6150_v25 = vld [vmem:[#allocation7 + $0x40] sm:$0xf]  ;;  %v8131_v26 = vld [vmem:[#allocation7 + $0x4c] sm:$0xf0]  ;;  %v6091_v27 = vor.u32 %v8145_v22, %v6088_v24  ;;  %v8129_v29 = vld [vmem:[#allocation7 + $0x44] sm:$0xf] }
  0x77   : > { %v6151_v28 = vor.u32 %v8131_v26, %v6150_v25  ;;  %v6152_v30 = vld [vmem:[#allocation7 + $0x50] sm:$0xf0]  ;;  %957 = vmatpush.bf16.msra.mxu2 %v6087_v23  ;;  %v6070_v32 = vld [vmem:[#allocation7 + $0x80] sm:$0xf]  ;;  %v8143_v33 = vld [vmem:[#allocation7 + $0x8c] sm:$0xf0] }
  0x78   : > { %v6155_v31 = vor.u32 %v8129_v29, %v6152_v30  ;;  %v8141_v34 = vld [vmem:[#allocation7 + $0x84] sm:$0xf]  ;;  %986 = vmatpush.bf16.msra.mxu3 %v6091_v27  ;;  %v6071_v35 = vor.u32 %v8143_v33, %v6070_v32  ;;  %v6072_v36 = vld [vmem:[#allocation7 + $0x90] sm:$0xf0]  ;;  %v6134_v37 = vld [vmem:[#allocation7 + $0x20] sm:$0xf] }
  0x79   : > { %v8127_v38 = vld [vmem:[#allocation7 + $0x2c] sm:$0xf0]  ;;  %v6075_v39 = vor.u32 %v8141_v34, %v6072_v36  ;;  %v8125_v41 = vld [vmem:[#allocation7 + $0x24] sm:$0xf]  ;;  %v6136_v42 = vld [vmem:[#allocation7 + $0x30] sm:$0xf0]  ;;  %s5800_s2 = scalar_lea.hbm %s10312_s5, %s8112_s26 }
  0x7a   : > { %753 = vmatpush.bf16.msra.mxu0 %v9540_v8  ;;  %839 = vmatpush.bf16.msra.mxu1 %v9540_v8  ;;  %v6135_v40 = vor.u32 %v8127_v38, %v6134_v37  ;;  %v6139_v43 = vor.u32 %v8125_v41, %v6136_v42  ;;  %v6054_v44 = vld [vmem:[#allocation7 + $0x60] sm:$0xf]  ;;  %v8139_v45 = vld [vmem:[#allocation7 + $0x6c] sm:$0xf0]  ;;  %v8137_v46 = vld [vmem:[#allocation7 + $0x64] sm:$0xf] }
  0x7b   : > { %958 = vmatpush.bf16.msra.mxu2 %v6071_v35  ;;  %v6055_v47 = vor.u32 %v8139_v45, %v6054_v44  ;;  %v6056_v48 = vld [vmem:[#allocation7 + $0x70] sm:$0xf0]  ;;  %v6118_v49 = vld [vmem:[#allocation7] sm:$0xf]  ;;  %v8123_v50 = vld [vmem:[#allocation7 + $0xc] sm:$0xf0] }
  0x7c   : > { %987 = vmatpush.bf16.msra.mxu3 %v6075_v39  ;;  %v6059_v51 = vor.u32 %v8137_v46, %v6056_v48  ;;  %v6119_v52 = vor.u32 %v8123_v50, %v6118_v49  ;;  %v8121_v53 = vld [vmem:[#allocation7 + $0x4] sm:$0xf]  ;;  %v6120_v54 = vld [vmem:[#allocation7 + $0x10] sm:$0xf0]  ;;  %v6094_v4 = vld [vmem:[#allocation7 + $0xa8] sm:$0xf] }
  0x7d   : > { %v6123_v55 = vor.u32 %v8121_v53, %v6120_v54  ;;  %v8146_v6 = vld [vmem:[#allocation7 + $0xac] sm:$0xf]  ;;  %v6078_v9 = vld [vmem:[#allocation7 + $0x88] sm:$0xf]  ;;  %v8144_v10 = vld [vmem:[#allocation7 + $0x94] sm:$0xf0] }
  0x7e   : > { %754 = vmatpush.bf16.msra.mxu0 %v9544_v11  ;;  %840 = vmatpush.bf16.msra.mxu1 %v9544_v11  ;;  %v8138_v20 = vld [vmem:[#allocation7 + $0x6c] sm:$0xf]  ;;  %v6064_v21 = vld [vmem:[#allocation7 + $0x78] sm:$0xf0]  ;;  %v8149_v34 = vld [vmem:[#allocation5 + $0x40] sm:$0xff]  ;;  %s5804_s30 = sshll.u32 %s5800_s2, 4  ;;  %s5805_s30 = int_to_ptr.hbm [resolvable:$true] %s5804_s30 }
  0x7f   : > { %959 = vmatpush.bf16.msra.mxu2 %v6055_v47  ;;  %v6067_v23 = vor.u32 %v8138_v20, %v6064_v21  ;;  %v8150_v35 = vld [vmem:[#allocation5 + $0x48] sm:$0xff]  ;;  %v8132_v37 = vld [vmem:[#allocation7 + $0x54] sm:$0xf0]  ;;  %v6144_v45 = vld [vmem:[#allocation7 + $0x38] sm:$0xf0]  ;;  %s9160_s16 = sshra.s32 %s5805_s30, 4  ;;  %s9161_s16 = int_to_ptr.hbm [resolvable:$true] %s9160_s16 }
  0x80   : > { %988 = vmatpush.bf16.msra.mxu3 %v6059_v51  ;;  %v6158_v36 = vld [vmem:[#allocation7 + $0x48] sm:$0xf]  ;;  %v8130_v38 = vld [vmem:[#allocation7 + $0x4c] sm:$0xf]  ;;  %v8128_v42 = vld [vmem:[#allocation7 + $0x34] sm:$0xf0]  ;;  %p9167_p13 = scmp.lt.s32.totalorder %s9161_s16, %s10312_s5 }
  0x81   : > { %6028 = vmatmul.msk.bf16.vlgmr.msra.gmra.mxu0 %vm734_vm0, %v8117_v12  ;;  %6048 = vmatmul.msk.bf16.vlgmr.msra.gmra.mxu1 %vm734_vm0, %v8133_v13  ;;  %v8142_v12 = vld [vmem:[#allocation7 + $0x8c] sm:$0xf]  ;;  %v6080_v13 = vld [vmem:[#allocation7 + $0x98] sm:$0xf0]  ;;  %v6159_v39 = vor.u32 %v8132_v37, %v6158_v36  ;;  %v6142_v41 = vld [vmem:[#allocation7 + $0x28] sm:$0xf] }
  0x82   : > { %1145 = vmatpush.bf16.msrb.mxu0 %v6151_v28  ;;  %1174 = vmatpush.bf16.msrb.mxu1 %v6155_v31  ;;  %v8126_v44 = vld [vmem:[#allocation7 + $0x2c] sm:$0xf]  ;;  %v6143_v46 = vor.u32 %v8128_v42, %v6142_v41  ;;  %v6126_v48 = vld [vmem:[#allocation7 + $0x8] sm:$0xf]  ;;  %v8124_v49 = vld [vmem:[#allocation7 + $0x14] sm:$0xf0] }
  0x83   : > { %v6147_v47 = vor.u32 %v8126_v44, %v6144_v45  ;;  %v8122_v50 = vld [vmem:[#allocation7 + $0xc] sm:$0xf]  ;;  %v6127_v51 = vor.u32 %v8124_v49, %v6126_v48  ;;  %v8151_v53 = vld [vmem:[#allocation5 + $0x50] sm:$0xff]  ;;  %v6202_v42 = vld [vmem:[#allocation7 + $0xc0] sm:$0xf] }
  0x84   : > { %v8162_v21 = vld [vmem:[#allocation7 + $0x10c] sm:$0xf]  ;;  %v8153_v44 = vld [vmem:[#allocation7 + $0xc4] sm:$0xf]  ;;  %v6210_v48 = vld [vmem:[#allocation7 + $0xc8] sm:$0xf] }
  0x85   : > { %v8158_v37 = vld [vmem:[#allocation7 + $0xec] sm:$0xf]  ;;  %v8156_v49 = vld [vmem:[#allocation7 + $0xd4] sm:$0xf0] }
  0x86   : > { %1146 = vmatpush.bf16.msrb.mxu0 %v6135_v40  ;;  %1175 = vmatpush.bf16.msrb.mxu1 %v6139_v43  ;;  %v6160_v40 = vld [vmem:[#allocation7 + $0x58] sm:$0xf0] }
  0x87   : > { %v6163_v43 = vor.u32 %v8130_v38, %v6160_v40  ;;  %v6228_v38 = vld [vmem:[#allocation7 + $0xf8] sm:$0xf0] }
  0x8a   : > { %1147 = vmatpush.bf16.msrb.mxu0 %v6119_v52  ;;  %1176 = vmatpush.bf16.msrb.mxu1 %v6123_v55  ;;  %v6128_v52 = vld [vmem:[#allocation7 + $0x18] sm:$0xf0] }
  0x8b   : > { %v6131_v54 = vor.u32 %v8122_v50, %v6128_v52  ;;  %v8152_v55 = vld [vmem:[#allocation5 + $0x58] sm:$0xff]  ;;  %v8154_v52 = vld [vmem:[#allocation7 + $0xcc] sm:$0xf] }
  0x8e   : > { %1301 = vmatpush.bf16.msra.mxu0 %v9532_v3 }
  0x91   : > { %6029 = vmatmul.msk.bf16.gmra.mxu0 %vm734_vm0, %v8118_v14  ;;  %6049 = vmatmul.msk.bf16.gmra.mxu1 %vm734_vm0, %v8134_v15  ;;  %v6079_v14 = vor.u32 %v8144_v10, %v6078_v9 }
  0x92   : > { %1302 = vmatpush.bf16.msra.mxu0 %v9536_v5  ;;  %v8148_v5 = vld [vmem:[#allocation7 + $0xb4] sm:$0xf0] }
  0x93   : > { %v6095_v7 = vor.u32 %v8148_v5, %v6094_v4 }
  0x95   : > { %1015 = vmatpush.bf16.msrb.mxu2 %v6095_v7 }
  0x96   : > { %1303 = vmatpush.bf16.msra.mxu0 %v9540_v8  ;;  %v6096_v8 = vld [vmem:[#allocation7 + $0xb8] sm:$0xf0] }
  0x99   : > { %1016 = vmatpush.bf16.msrb.mxu2 %v6079_v14  ;;  %v8163_v14 = vld [vmem:[#allocation7 + $0x10c] sm:$0xf0] }
  0x9a   : > { %1304 = vmatpush.bf16.msra.mxu0 %v9544_v11  ;;  %v6099_v11 = vor.u32 %v8146_v6, %v6096_v8 }
  0x9c   : > { %1044 = vmatpush.bf16.msrb.mxu3 %v6099_v11 }
  0xa1   : > { %6030 = vmatmul.msk.bf16.gmra.mxu0 %vm734_vm0, %v8119_v16  ;;  %6050 = vmatmul.msk.bf16.gmra.mxu1 %vm734_vm0, %v8135_v17  ;;  %v6083_v17 = vor.u32 %v8142_v12, %v6080_v13  ;;  %v6234_v13 = vld [vmem:[#allocation7 + $0x100] sm:$0xf] }
  0xa3   : > { %1045 = vmatpush.bf16.msrb.mxu3 %v6083_v17  ;;  %v6236_v17 = vld [vmem:[#allocation7 + $0x110] sm:$0xf0] }
  0xa7   : > { %1046 = vmatpush.bf16.msrb.mxu3 %v6067_v23 }
  0xb1   : > { %6031 = vmatmul.msk.bf16.gmra.mxu0 %vm734_vm0, %v8120_v18  ;;  %6051 = vmatmul.msk.bf16.gmra.mxu1 %vm734_vm0, %v8136_v19  ;;  %v6062_v18 = vld [vmem:[#allocation7 + $0x68] sm:$0xf]  ;;  %v8140_v19 = vld [vmem:[#allocation7 + $0x74] sm:$0xf0] }
  0xb2   : > { %v6063_v22 = vor.u32 %v8140_v19, %v6062_v18  ;;  %v8164_v18 = vld [vmem:[#allocation7 + $0x114] sm:$0xf0] }
  0xb4   : > { %1017 = vmatpush.bf16.msrb.mxu2 %v6063_v22  ;;  %v6244_v22 = vld [vmem:[#allocation7 + $0x118] sm:$0xf0] }
  0xfe   : > { %v756_v56 = vpop.f32.mrf.mxu0  ;;  %v842_v57 = vpop.f32.mrf.mxu1 }
 0x106   : > { %v758_v58 = vpop.f32.mrf.mxu0  ;;  %v844_v59 = vpop.f32.mrf.mxu1 }
 0x107   : > { %v9560_v60 = vpack.c.bf16 %v758_v58, %v756_v56  ;;  %v862_v61 = vpack.c.bf16 %v844_v59, %v842_v57 }
 0x109   : > { %6100 = vmatmul.msk.bf16.vlgmr.msra.gmra.mxu2 %vm939_vm1, %v862_v61  ;;  %6104 = vmatmul.msk.bf16.vlgmr.msra.gmra.mxu3 %vm939_vm1, %v862_v61 }
 0x10a   : > { %6164 = vmatmul.msk.bf16.vlgmr.msrb.gmra.mxu0 %vm939_vm1, %v9560_v60  ;;  %6168 = vmatmul.msk.bf16.vlgmr.msrb.gmra.mxu1 %vm939_vm1, %v9560_v60 }
 0x10b   : > { %1203 = vmatpush.bf16.msra.mxu2 %v6159_v39  ;;  %1232 = vmatpush.bf16.msra.mxu3 %v6163_v43  ;;  %v6231_v39 = vor.u32 %v8158_v37, %v6228_v38  ;;  %v8155_v43 = vld [vmem:[#allocation7 + $0xcc] sm:$0xf0] }
 0x10e   : > { %v761_v62 = vpop.f32.mrf.mxu0  ;;  %v847_v63 = vpop.f32.mrf.mxu1 }
 0x10f   : > { %1204 = vmatpush.bf16.msra.mxu2 %v6143_v46  ;;  %1233 = vmatpush.bf16.msra.mxu3 %v6147_v47  ;;  %v6203_v47 = vor.u32 %v8155_v43, %v6202_v42 }
 0x113   : > { %1205 = vmatpush.bf16.msra.mxu2 %v6127_v51  ;;  %1234 = vmatpush.bf16.msra.mxu3 %v6131_v54  ;;  %v6211_v51 = vor.u32 %v8156_v49, %v6210_v48 }
 0x116   : > { %v763_v0 = vpop.f32.mrf.mxu0  ;;  %v849_v1 = vpop.f32.mrf.mxu1 }
 0x117   : > { %v9568_v2 = vpack.c.bf16 %v763_v0, %v761_v62  ;;  %v863_v3 = vpack.c.bf16 %v849_v1, %v847_v63 }
 0x119   : > { %6101 = vmatmul.msk.bf16.gmra.mxu2 %vm939_vm1, %v863_v3  ;;  %6105 = vmatmul.msk.bf16.gmra.mxu3 %vm939_vm1, %v863_v3 }
 0x11a   : > { %6165 = vmatmul.msk.bf16.gmra.mxu0 %vm939_vm1, %v9568_v2  ;;  %6169 = vmatmul.msk.bf16.gmra.mxu1 %vm939_vm1, %v9568_v2 }
 0x11e   : > { %v766_v15 = vpop.f32.mrf.mxu0  ;;  %v852_v16 = vpop.f32.mrf.mxu1 }
 0x126   : > { %v768_v24 = vpop.f32.mrf.mxu0  ;;  %v854_v25 = vpop.f32.mrf.mxu1 }
 0x127   : > { %v9576_v26 = vpack.c.bf16 %v768_v24, %v766_v15  ;;  %v864_v27 = vpack.c.bf16 %v854_v25, %v852_v16  ;;  %v8161_v15 = vld [vmem:[#allocation7 + $0x104] sm:$0xf]  ;;  %v6235_v16 = vor.u32 %v8163_v14, %v6234_v13  ;;  %v6247_v25 = vor.u32 %v8162_v21, %v6244_v22 }
 0x128   : > { %v6239_v19 = vor.u32 %v8161_v15, %v6236_v17 }
 0x129   : > { %6102 = vmatmul.msk.bf16.gmra.mxu2 %vm939_vm1, %v864_v27  ;;  %6106 = vmatmul.msk.bf16.gmra.mxu3 %vm939_vm1, %v864_v27 }
 0x12a   : > { %6166 = vmatmul.msk.bf16.gmra.mxu0 %vm939_vm1, %v9576_v26  ;;  %6170 = vmatmul.msk.bf16.gmra.mxu1 %vm939_vm1, %v9576_v26 }
 0x12b   : > { %1420 = vmatpush.bf16.msra.mxu1 %v6235_v16  ;;  %1507 = vmatpush.bf16.msrb.mxu0 %v6247_v25 }
 0x12e   : > { %v771_v28 = vpop.f32.mrf.mxu0  ;;  %v857_v29 = vpop.f32.mrf.mxu1 }
 0x12f   : > { %1508 = vmatpush.bf16.msrb.mxu0 %v6231_v39 }
 0x136   : > { %v773_v30 = vpop.f32.mrf.mxu0  ;;  %v859_v31 = vpop.f32.mrf.mxu1 }
 0x137   : > { %v9584_v32 = vpack.c.bf16 %v773_v30, %v771_v28  ;;  %v865_v33 = vpack.c.bf16 %v859_v31, %v857_v29  ;;  %v8159_v28 = vld [vmem:[#allocation7 + $0xec] sm:$0xf0]  ;;  %v8157_v29 = vld [vmem:[#allocation7 + $0xe4] sm:$0xf]  ;;  %v6220_v31 = vld [vmem:[#allocation7 + $0xf0] sm:$0xf0] }
 0x139   : > { %6103 = vmatmul.msk.bf16.gmra.mxu2 %vm939_vm1, %v865_v33  ;;  %6107 = vmatmul.msk.bf16.gmra.mxu3 %vm939_vm1, %v865_v33 }
 0x13a   : > { %6167 = vmatmul.msk.bf16.gmra.mxu0 %vm939_vm1, %v9584_v32  ;;  %6171 = vmatmul.msk.bf16.gmra.mxu1 %vm939_vm1, %v9584_v32 }
 0x149   : > { %6108 = vmatmul.msk.bf16.vlgmr.msrb.gmra.mxu2 %vm939_vm1, %v862_v61  ;;  %6112 = vmatmul.msk.bf16.vlgmr.msrb.gmra.mxu3 %vm939_vm1, %v862_v61 }
 0x14a   : > { %6196 = vmatmul.msk.bf16.vlgmr.msra.gmra.mxu0 %vm734_vm0, %v8149_v34  ;;  %1449 = vmatpush.bf16.msrb.mxu2 %v6239_v19  ;;  %v8160_v34 = vld [vmem:[#allocation7 + $0xf4] sm:$0xf0] }
 0x159   : > { %6109 = vmatmul.msk.bf16.gmra.mxu2 %vm939_vm1, %v863_v3  ;;  %6113 = vmatmul.msk.bf16.gmra.mxu3 %vm939_vm1, %v863_v3 }
 0x15a   : > { %6197 = vmatmul.msk.bf16.gmra.mxu0 %vm734_vm0, %v8150_v35  ;;  %v6223_v35 = vor.u32 %v8157_v29, %v6220_v31 }
 0x15c   : > { %1450 = vmatpush.bf16.msrb.mxu2 %v6223_v35 }
 0x169   : > { %6110 = vmatmul.msk.bf16.gmra.mxu2 %vm939_vm1, %v864_v27  ;;  %6114 = vmatmul.msk.bf16.gmra.mxu3 %vm939_vm1, %v864_v27  ;;  %v6218_v27 = vld [vmem:[#allocation7 + $0xe0] sm:$0xf] }
 0x16a   : > { %6198 = vmatmul.msk.bf16.gmra.mxu0 %vm734_vm0, %v8151_v53  ;;  %v6219_v30 = vor.u32 %v8159_v28, %v6218_v27  ;;  %v6212_v53 = vld [vmem:[#allocation7 + $0xd8] sm:$0xf0] }
 0x16c   : > { %1421 = vmatpush.bf16.msra.mxu1 %v6219_v30 }
 0x170   : > { %1422 = vmatpush.bf16.msra.mxu1 %v6203_v47 }
 0x179   : > { %6111 = vmatmul.msk.bf16.gmra.mxu2 %vm939_vm1, %v865_v33  ;;  %6115 = vmatmul.msk.bf16.gmra.mxu3 %vm939_vm1, %v865_v33  ;;  %v6226_v33 = vld [vmem:[#allocation7 + $0xe8] sm:$0xf] }
 0x17a   : > { %6199 = vmatmul.msk.bf16.gmra.mxu0 %vm734_vm0, %v8152_v55  ;;  %v6227_v36 = vor.u32 %v8160_v34, %v6226_v33  ;;  %v6215_v55 = vor.u32 %v8154_v52, %v6212_v53 }
 0x17c   : > { %1509 = vmatpush.bf16.msrb.mxu0 %v6215_v55 }
 0x187   : > { %v1149_v56 = vpop.f32.mrf.mxu0  ;;  %v1178_v57 = vpop.f32.mrf.mxu1 }
 0x189   : > { %6172 = vmatmul.msk.bf16.vlgmr.msra.gmra.mxu2 %vm939_vm1, %v9560_v60  ;;  %6176 = vmatmul.msk.bf16.vlgmr.msra.gmra.mxu3 %vm939_vm1, %v9560_v60 }
 0x18c   : > { %v961_v58 = vpop.f32.mrf.mxu2  ;;  %v990_v59 = vpop.f32.mrf.mxu3 }
 0x18d   : > { %v9608_v61 = vadd.f32 %v1149_v56, %v961_v58  ;;  %v9610_v62 = vadd.f32 %v1178_v57, %v990_v59 }
 0x18f   : > { %v9612_v63 = vpop.f32.mrf.mxu0  ;;  %v9614_v0 = vpop.f32.mrf.mxu1 }
 0x194   : > { %v9616_v1 = vpop.f32.mrf.mxu2  ;;  %v9618_v3 = vpop.f32.mrf.mxu3 }
 0x197   : > { %v1154_v4 = vpop.f32.mrf.mxu0  ;;  %v1183_v5 = vpop.f32.mrf.mxu1 }
 0x199   : > { %6173 = vmatmul.msk.bf16.gmra.mxu2 %vm939_vm1, %v9568_v2  ;;  %6177 = vmatmul.msk.bf16.gmra.mxu3 %vm939_vm1, %v9568_v2  ;;  %v6242_v2 = vld [vmem:[#allocation7 + $0x108] sm:$0xf] }
 0x19a   : > { %v6243_v20 = vor.u32 %v8164_v18, %v6242_v2 }
 0x19c   : > { %v966_v60 = vpop.f32.mrf.mxu2  ;;  %v995_v6 = vpop.f32.mrf.mxu3  ;;  %1478 = vmatpush.bf16.msrb.mxu3 %v6243_v20 }
 0x19d   : > { %v9624_v7 = vadd.f32 %v1154_v4, %v966_v60  ;;  %v9626_v8 = vadd.f32 %v1183_v5, %v995_v6 }
 0x19f   : > { %v9628_v9 = vpop.f32.mrf.mxu0  ;;  %v9630_v10 = vpop.f32.mrf.mxu1 }
 0x1a0   : > { %1479 = vmatpush.bf16.msrb.mxu3 %v6227_v36 }
 0x1a4   : > { %v9632_v11 = vpop.f32.mrf.mxu2  ;;  %v9634_v12 = vpop.f32.mrf.mxu3  ;;  %1480 = vmatpush.bf16.msrb.mxu3 %v6211_v51 }
 0x1a7   : > { %v1159_v23 = vpop.f32.mrf.mxu0  ;;  %v1188_v24 = vpop.f32.mrf.mxu1 }
 0x1a9   : > { %6174 = vmatmul.msk.bf16.gmra.mxu2 %vm939_vm1, %v9576_v26  ;;  %6178 = vmatmul.msk.bf16.gmra.mxu3 %vm939_vm1, %v9576_v26  ;;  %v6204_v26 = vld [vmem:[#allocation7 + $0xd0] sm:$0xf0] }
 0x1aa   : > { %v6207_v50 = vor.u32 %v8153_v44, %v6204_v26 }
 0x1ac   : > { %v971_v40 = vpop.f32.mrf.mxu2  ;;  %v1000_v41 = vpop.f32.mrf.mxu3  ;;  %1451 = vmatpush.bf16.msrb.mxu2 %v6207_v50 }
 0x1ad   : > { %v9640_v45 = vadd.f32 %v1159_v23, %v971_v40  ;;  %v9642_v46 = vadd.f32 %v1188_v24, %v1000_v41 }
 0x1af   : > { %v9644_v54 = vpop.f32.mrf.mxu0  ;;  %v9646_v56 = vpop.f32.mrf.mxu1 }
 0x1b4   : > { %v9648_v57 = vpop.f32.mrf.mxu2  ;;  %v9650_v58 = vpop.f32.mrf.mxu3 }
 0x1b7   : > { %v1164_v59 = vpop.f32.mrf.mxu0  ;;  %v1193_v4 = vpop.f32.mrf.mxu1 }
 0x1b9   : > { %6175 = vmatmul.msk.bf16.gmra.mxu2 %vm939_vm1, %v9584_v32  ;;  %6179 = vmatmul.msk.bf16.gmra.mxu3 %vm939_vm1, %v9584_v32 }
 0x1bc   : > { %v976_v5 = vpop.f32.mrf.mxu2  ;;  %v1005_v60 = vpop.f32.mrf.mxu3 }
 0x1bd   : > { %v9656_v6 = vadd.f32 %v1164_v59, %v976_v5  ;;  %v9658_v13 = vadd.f32 %v1193_v4, %v1005_v60 }
 0x1bf   : > { %v9660_v14 = vpop.f32.mrf.mxu0 }
 0x1c0   : > { %10281 = vst [vmem:[#allocation32_spill] sm:$0xff] %v9660_v14 }
 0x1c4   : > { %v9662_v15 = vpop.f32.mrf.mxu2  ;;  %v9664_v16 = vpop.f32.mrf.mxu3 }
 0x1c5   : > { %10282 = vst [vmem:[#allocation33_spill] sm:$0xff] %v9664_v16 }
 0x1c7   : > { %v1306_v17 = vpop.f32.mrf.mxu0 }
 0x1cc   : > { %v1019_v2 = vpop.f32.mrf.mxu2  ;;  %v1048_v18 = vpop.f32.mrf.mxu3 }
 0x1cf   : > { %v1308_v19 = vpop.f32.mrf.mxu0 }
 0x1d0   : > { %v1326_v20 = vpack.c.bf16 %v1308_v19, %v1306_v17 }
 0x1d2   : > { %6248 = vmatmul.msk.bf16.vlgmr.msra.gmra.mxu1 %vm939_vm1, %v1326_v20  ;;  %6252 = vmatmul.msk.bf16.vlgmr.msrb.gmra.mxu2 %vm939_vm1, %v1326_v20 }
 0x1d3   : > { %6256 = vmatmul.msk.bf16.vlgmr.msrb.gmra.mxu3 %vm939_vm1, %v1326_v20  ;;  %6260 = vmatmul.msk.bf16.vlgmr.msrb.gmra.mxu0 %vm939_vm1, %v1326_v20 }
 0x1d4   : > { %v9670_v32 = vpop.f32.mrf.mxu2  ;;  %v9672_v21 = vpop.f32.mrf.mxu3 }
 0x1d7   : > { %v1311_v22 = vpop.f32.mrf.mxu0 }
 0x1dc   : > { %v1024_v23 = vpop.f32.mrf.mxu2  ;;  %v1053_v24 = vpop.f32.mrf.mxu3 }
 0x1df   : > { %v1313_v25 = vpop.f32.mrf.mxu0 }
 0x1e0   : > { %v1327_v27 = vpack.c.bf16 %v1313_v25, %v1311_v22 }
 0x1e2   : > { %6249 = vmatmul.msk.bf16.gmra.mxu1 %vm939_vm1, %v1327_v27  ;;  %6253 = vmatmul.msk.bf16.gmra.mxu2 %vm939_vm1, %v1327_v27 }
 0x1e3   : > { %6257 = vmatmul.msk.bf16.gmra.mxu3 %vm939_vm1, %v1327_v27  ;;  %6261 = vmatmul.msk.bf16.gmra.mxu0 %vm939_vm1, %v1327_v27 }
 0x1e4   : > { %v9678_v28 = vpop.f32.mrf.mxu2  ;;  %v9680_v29 = vpop.f32.mrf.mxu3 }
 0x1e7   : > { %v1316_v30 = vpop.f32.mrf.mxu0 }
 0x1ec   : > { %v1029_v31 = vpop.f32.mrf.mxu2  ;;  %v1058_v33 = vpop.f32.mrf.mxu3 }
 0x1ef   : > { %v1318_v34 = vpop.f32.mrf.mxu0 }
 0x1f0   : > { %v1328_v35 = vpack.c.bf16 %v1318_v34, %v1316_v30 }
 0x1f2   : > { %6250 = vmatmul.msk.bf16.gmra.mxu1 %vm939_vm1, %v1328_v35  ;;  %6254 = vmatmul.msk.bf16.gmra.mxu2 %vm939_vm1, %v1328_v35 }
 0x1f3   : > { %6258 = vmatmul.msk.bf16.gmra.mxu3 %vm939_vm1, %v1328_v35  ;;  %6262 = vmatmul.msk.bf16.gmra.mxu0 %vm939_vm1, %v1328_v35 }
 0x1f4   : > { %v9686_v36 = vpop.f32.mrf.mxu2  ;;  %v9688_v37 = vpop.f32.mrf.mxu3 }
 0x1f7   : > { %v1321_v38 = vpop.f32.mrf.mxu0 }
 0x1fc   : > { %v1034_v39 = vpop.f32.mrf.mxu2  ;;  %v1063_v40 = vpop.f32.mrf.mxu3 }
 0x1ff   : > { %v1323_v41 = vpop.f32.mrf.mxu0 }
 0x200   : > { %v1329_v42 = vpack.c.bf16 %v1323_v41, %v1321_v38 }
 0x202   : > { %6251 = vmatmul.msk.bf16.gmra.mxu1 %vm939_vm1, %v1329_v42  ;;  %6255 = vmatmul.msk.bf16.gmra.mxu2 %vm939_vm1, %v1329_v42 }
 0x203   : > { %6259 = vmatmul.msk.bf16.gmra.mxu3 %vm939_vm1, %v1329_v42  ;;  %6263 = vmatmul.msk.bf16.gmra.mxu0 %vm939_vm1, %v1329_v42 }
 0x204   : > { %v9694_v43 = vpop.f32.mrf.mxu2  ;;  %v9696_v44 = vpop.f32.mrf.mxu3 }
 0x205   : > { %10283 = vst [vmem:[#allocation34_spill] sm:$0xff] %v9694_v43 }
 0x20c   : > { %v1207_v47 = vpop.f32.mrf.mxu2  ;;  %v1236_v26 = vpop.f32.mrf.mxu3 }
 0x20d   : > { %v1208_v48 = vadd.f32 %v1207_v47, %v1019_v2  ;;  %v1237_v49 = vadd.f32 %v1236_v26, %v1048_v18 }
 0x214   : > { %v9698_v50 = vpop.f32.mrf.mxu2  ;;  %v9700_v51 = vpop.f32.mrf.mxu3 }
 0x21c   : > { %v1212_v52 = vpop.f32.mrf.mxu2  ;;  %v1241_v53 = vpop.f32.mrf.mxu3 }
 0x21d   : > { %v1213_v55 = vadd.f32 %v1212_v52, %v1024_v23  ;;  %v1242_v59 = vadd.f32 %v1241_v53, %v1053_v24  ;;  %v9716_v23 = vpop.f32.mrf.mxu1 }
 0x21e   : > { %10284 = vst [vmem:[#allocation35_spill] sm:$0xff] %v9716_v23 }
 0x224   : > { %v9702_v4 = vpop.f32.mrf.mxu2  ;;  %v9704_v5 = vpop.f32.mrf.mxu3 }
 0x22c   : > { %v1217_v60 = vpop.f32.mrf.mxu2  ;;  %v1246_v17 = vpop.f32.mrf.mxu3 }
 0x22d   : > { %v9706_v19 = vadd.f32 %v1217_v60, %v1029_v31  ;;  %v1247_v20 = vadd.f32 %v1246_v17, %v1058_v33  ;;  %v1563_v31 = vld [vmem:[#allocation8] sm:$0xf] }
 0x22e   : > { %v9722_v41 = vperm.slane %v1563_v31, 3  ;;  %v9725_v47 = vperm.slane %v1563_v31, 0  ;;  %v9729_v26 = vperm.slane %v1563_v31, 2 }
 0x234   : > { %v9708_v22 = vpop.f32.mrf.mxu2  ;;  %v9710_v2 = vpop.f32.mrf.mxu3 }
 0x23c   : > { %v1222_v18 = vpop.f32.mrf.mxu2  ;;  %v1251_v25 = vpop.f32.mrf.mxu3 }
 0x23d   : > { %v9712_v27 = vadd.f32 %v1222_v18, %v1034_v39  ;;  %v9714_v30 = vadd.f32 %v1251_v25, %v1063_v40  ;;  %v9727_v39 = vperm.slane %v1563_v31, 1 }
 0x244   : > { %v9718_v24 = vpop.f32.mrf.mxu2  ;;  %v9720_v34 = vpop.f32.mrf.mxu3 }
 0x245   : > { %10285 = vst [vmem:[#allocation36_spill] sm:$0xff] %v9718_v24 }
 0x24f   : > { %v1424_v35 = vpop.f32.mrf.mxu1 }
 0x250   : > { %v1511_v38 = vpop.f32.mrf.mxu0  ;;  %v1531_v42 = vadd.f32 %v1424_v35, %v9608_v61 }
 0x251   : > { %v1534_v33 = vadd.f32 %v1511_v38, %v1237_v49 }
 0x252   : > { %v1573_v17 = vadd.f32 %v9725_v47, %v1531_v42 }
 0x253   : > { %v1576_v52 = vadd.f32 %v9722_v41, %v1534_v33 }
 0x254   : > { %v1605_v43 = vmax.f32 %v1573_v17, 0.0 }
 0x255   : > { %v1453_v40 = vpop.f32.mrf.mxu2  ;;  %v1608_v35 = vmax.f32 %v1576_v52, 0.0 }
 0x256   : > { %v1532_v53 = vadd.f32 %v1453_v40, %v9610_v62  ;;  %v1482_v60 = vpop.f32.mrf.mxu3 }
 0x257   : > { %v1533_v18 = vadd.f32 %v1482_v60, %v1208_v48  ;;  %v1426_v49 = vpop.f32.mrf.mxu1 }
 0x258   : > { %v1574_v25 = vadd.f32 %v9727_v39, %v1532_v53  ;;  %v1513_v38 = vpop.f32.mrf.mxu0 }
 0x259   : > { %v1575_v61 = vadd.f32 %v9729_v26, %v1533_v18 }
 0x25a   : > { %v1606_v24 = vmax.f32 %v1574_v25, 0.0 }
 0x25b   : > { %v1607_v23 = vmax.f32 %v1575_v61, 0.0 }
 0x25c   : > { %v9736_v31 = vmax.f32 %v1606_v24, %v1608_v35 }
 0x25d   : > { %v9738_v16 = vmax.f32 %v1605_v43, %v1607_v23  ;;  %v1455_v33 = vpop.f32.mrf.mxu2 }
 0x25e   : > { %v1484_v62 = vpop.f32.mrf.mxu3 }
 0x25f   : > { %v1429_v40 = vpop.f32.mrf.mxu1 }
 0x260   : > { %v1516_v14 = vpop.f32.mrf.mxu0  ;;  %v1539_v48 = vadd.f32 %v1429_v40, %v9624_v7 }
 0x261   : > { %v1542_v42 = vadd.f32 %v1516_v14, %v1242_v59 }
 0x262   : > { %v1581_v17 = vadd.f32 %v9725_v47, %v1539_v48 }
 0x263   : > { %v1584_v53 = vadd.f32 %v9722_v41, %v1542_v42 }
 0x264   : > { %v1613_v7 = vmax.f32 %v1581_v17, 0.0 }
 0x265   : > { %v1458_v60 = vpop.f32.mrf.mxu2  ;;  %v1616_v14 = vmax.f32 %v1584_v53, 0.0  ;;  %v1181_v53 = vadd.f32 %v9614_v0, %v9618_v3 }
 0x266   : > { %v1540_v18 = vadd.f32 %v1458_v60, %v9626_v8  ;;  %v1487_v52 = vpop.f32.mrf.mxu3 }
 0x267   : > { %v1541_v25 = vadd.f32 %v1487_v52, %v1213_v55  ;;  %v9744_v24 = vpop.f32.mrf.mxu1  ;;  %v1536_v0 = vadd.f32 %v1455_v33, %v1181_v53  ;;  %v1191_v33 = vadd.f32 %v9646_v56, %v9650_v58 }
 0x268   : > { %10286 = vst [vmem:[#allocation37_spill] sm:$0xff] %v9744_v24  ;;  %v1582_v43 = vadd.f32 %v9727_v39, %v1540_v18  ;;  %v9747_v23 = vpop.f32.mrf.mxu0 }
 0x269   : > { %v1583_v61 = vadd.f32 %v9729_v26, %v1541_v25 }
 0x26a   : > { %v1614_v59 = vmax.f32 %v1582_v43, 0.0 }
 0x26b   : > { %v1615_v35 = vmax.f32 %v1583_v61, 0.0  ;;  %v1210_v61 = vadd.f32 %v9698_v50, %v9670_v32  ;;  %v1162_v32 = vadd.f32 %v9644_v54, %v9648_v57 }
 0x26c   : > { %v9750_v40 = vmax.f32 %v1614_v59, %v1616_v14 }
 0x26d   : > { %v9752_v42 = vmax.f32 %v1613_v7, %v1615_v35  ;;  %v9754_v8 = vpop.f32.mrf.mxu2  ;;  %v1537_v50 = vadd.f32 %v1484_v62, %v1210_v61 }
 0x26e   : > { %v9756_v48 = vpop.f32.mrf.mxu3 }
 0x26f   : > { %v1434_v55 = vpop.f32.mrf.mxu1  ;;  %v1579_v54 = vadd.f32 %v9729_v26, %v1537_v50 }
 0x270   : > { %v1521_v60 = vpop.f32.mrf.mxu0  ;;  %v1547_v18 = vadd.f32 %v1434_v55, %v9640_v45  ;;  %v1239_v45 = vadd.f32 %v9700_v51, %v9672_v21 }
 0x271   : > { %v1550_v52 = vadd.f32 %v1521_v60, %v1247_v20  ;;  %v1249_v20 = vadd.f32 %v9710_v2, %v9688_v37 }
 0x272   : > { %v1589_v14 = vadd.f32 %v9725_v47, %v1547_v18  ;;  %v1578_v18 = vadd.f32 %v9727_v39, %v1536_v0 }
 0x273   : > { %v1592_v17 = vadd.f32 %v9722_v41, %v1550_v52 }
 0x274   : > { %v1621_v52 = vmax.f32 %v1589_v14, 0.0 }
 0x275   : > { %v1463_v24 = vpop.f32.mrf.mxu2  ;;  %v1624_v55 = vmax.f32 %v1592_v17, 0.0 }
 0x276   : > { %v1548_v25 = vadd.f32 %v1463_v24, %v9642_v46  ;;  %v1492_v43 = vpop.f32.mrf.mxu3  ;;  %v1152_v46 = vadd.f32 %v9612_v63, %v9616_v1  ;;  %v1538_v24 = vadd.f32 %v1513_v38, %v1239_v45  ;;  %v1220_v1 = vadd.f32 %v9708_v22, %v9686_v36 }
 0x277   : > { %v1549_v59 = vadd.f32 %v1492_v43, %v9706_v19  ;;  %v1436_v7 = vpop.f32.mrf.mxu1  ;;  %v1610_v22 = vmax.f32 %v1578_v18, 0.0 }
 0x278   : > { %v1590_v3 = vadd.f32 %v9727_v39, %v1548_v25  ;;  %v1523_v35 = vpop.f32.mrf.mxu0  ;;  %v1535_v51 = vadd.f32 %v1426_v49, %v1152_v46  ;;  %v1551_v2 = vadd.f32 %v1436_v7, %v1162_v32  ;;  %v1580_v62 = vadd.f32 %v9722_v41, %v1538_v24 }
 0x279   : > { %v1591_v19 = vadd.f32 %v9729_v26, %v1549_v59  ;;  %v1554_v21 = vadd.f32 %v1523_v35, %v1249_v20  ;;  %v1611_v7 = vmax.f32 %v1579_v54, 0.0 }
 0x27a   : > { %v1622_v60 = vmax.f32 %v1590_v3, 0.0  ;;  %v1577_v56 = vadd.f32 %v9725_v47, %v1535_v51  ;;  %v1593_v58 = vadd.f32 %v9725_v47, %v1551_v2  ;;  %v1612_v20 = vmax.f32 %v1580_v62, 0.0 }
 0x27b   : > { %v1623_v37 = vmax.f32 %v1591_v19, 0.0  ;;  %v1596_v49 = vadd.f32 %v9722_v41, %v1554_v21 }
 0x27c   : > { %v1646_v63 = vmax.f32 %v1622_v60, %v1624_v55  ;;  %v1609_v35 = vmax.f32 %v1577_v56, 0.0  ;;  %v1625_v46 = vmax.f32 %v1593_v58, 0.0  ;;  %v1640_v19 = vmax.f32 %v1610_v22, %v1612_v20  ;;  %v10290_v56 = vld [vmem:[#allocation35_spill] sm:$0xff] }
 0x27d   : > { %v1645_v57 = vmax.f32 %v1621_v52, %v1623_v37  ;;  %v1465_v38 = vpop.f32.mrf.mxu2  ;;  %v1628_v0 = vmax.f32 %v1596_v49, 0.0  ;;  %v1186_v55 = vadd.f32 %v9630_v10, %v9634_v12  ;;  %v1215_v52 = vadd.f32 %v9702_v4, %v9678_v28 }
 0x27e   : > { %v1552_v53 = vadd.f32 %v1465_v38, %v1191_v33  ;;  %v1494_v17 = vpop.f32.mrf.mxu3  ;;  %v1654_v25 = vmax.f32 %v9736_v31, %v1646_v63  ;;  %v1639_v60 = vmax.f32 %v1609_v35, %v1611_v7  ;;  %v1244_v33 = vadd.f32 %v9704_v5, %v9680_v29  ;;  %v10288_v38 = vld [vmem:[#allocation37_spill] sm:$0xff] }
 0x27f   : > { %v1553_v43 = vadd.f32 %v1494_v17, %v1220_v1  ;;  %v1439_v61 = vpop.f32.mrf.mxu1  ;;  %v1653_v36 = vmax.f32 %v9738_v16, %v1645_v57  ;;  %v1157_v16 = vadd.f32 %v9628_v9, %v9632_v11  ;;  %v1254_v12 = vadd.f32 %v9720_v34, %v9696_v44  ;;  %v10287_v1 = vld [vmem:[#allocation32_spill] sm:$0xff] }
 0x280   : > { %v1594_v14 = vadd.f32 %v9727_v39, %v1552_v53  ;;  %v1526_v59 = vpop.f32.mrf.mxu0  ;;  %v1555_v50 = vadd.f32 %v1439_v61, %v9656_v6  ;;  %v1544_v18 = vadd.f32 %v9754_v8, %v1186_v55  ;;  %v1167_v54 = vadd.f32 %v10287_v1, %v9662_v15  ;;  %v10292_v61 = vld [vmem:[#allocation36_spill] sm:$0xff] }
 0x281   : > { %v1595_v45 = vadd.f32 %v9729_v26, %v1553_v43  ;;  %v1558_v31 = vadd.f32 %v1526_v59, %v9714_v30  ;;  %v1545_v29 = vadd.f32 %v9756_v48, %v1215_v52  ;;  %v1546_v57 = vadd.f32 %v9747_v23, %v1244_v33  ;;  %v10291_v43 = vld [vmem:[#allocation34_spill] sm:$0xff]  ;;  %v8232_v33 = vld [vmem:[#allocation10 + $0x18] sm:$0xff] }
 0x282   : > { %v1626_v3 = vmax.f32 %v1594_v14, 0.0  ;;  %v1597_v9 = vadd.f32 %v9725_v47, %v1555_v50  ;;  %v1543_v62 = vadd.f32 %v10288_v38, %v1157_v16  ;;  %v1586_v15 = vadd.f32 %v9727_v39, %v1544_v18  ;;  %v8287_v38 = vld [vmem:[#allocation11 + $0x3ac] sm:$0xf0] }
 0x283   : > { %v1627_v32 = vmax.f32 %v1595_v45, 0.0  ;;  %v1600_v30 = vadd.f32 %v9722_v41, %v1558_v31  ;;  %v1587_v22 = vadd.f32 %v9729_v26, %v1545_v29  ;;  %v1588_v59 = vadd.f32 %v9722_v41, %v1546_v57  ;;  %v8291_v29 = vld [vmem:[#allocation11 + $0x3cc] sm:$0xf0] }
 0x284   : > { %v1648_v24 = vmax.f32 %v1626_v3, %v1628_v0  ;;  %v1629_v49 = vmax.f32 %v1597_v9, 0.0  ;;  %v1585_v3 = vadd.f32 %v9725_v47, %v1543_v62  ;;  %v9851_v9 = vld [vmem:[#allocation10 + $0x8] sm:$0xff] }
 0x285   : > { %v1647_v21 = vmax.f32 %v1625_v46, %v1627_v32  ;;  %v1468_v51 = vpop.f32.mrf.mxu2  ;;  %v1632_v44 = vmax.f32 %v1600_v30, 0.0  ;;  %v1618_v32 = vmax.f32 %v1586_v15, 0.0  ;;  %v1620_v16 = vmax.f32 %v1588_v59, 0.0  ;;  %v8289_v59 = vld [vmem:[#allocation11 + $0x3c4] sm:$0xf] }
 0x286   : > { %v1556_v37 = vadd.f32 %v1468_v51, %v9658_v13  ;;  %v1497_v2 = vpop.f32.mrf.mxu3  ;;  %v1656_v6 = vmax.f32 %v1640_v19, %v1648_v24  ;;  %v1619_v19 = vmax.f32 %v1587_v22, 0.0  ;;  %v8257_v22 = vld [vmem:[#allocation11 + $0x2c4] sm:$0xf] }
 0x287   : > { %v1557_v11 = vadd.f32 %v1497_v2, %v9712_v27  ;;  %v1655_v10 = vmax.f32 %v1639_v60, %v1647_v21  ;;  %v1441_v4 = vpop.f32.mrf.mxu1  ;;  %v1617_v60 = vmax.f32 %v1585_v3, 0.0  ;;  %v1644_v51 = vmax.f32 %v1618_v32, %v1620_v16  ;;  %v6372_v32 = vld [vmem:[#allocation11 + $0x2b0] sm:$0xf0] }
 0x288   : > { %v1598_v28 = vadd.f32 %v9727_v39, %v1556_v37  ;;  %v1528_v63 = vpop.f32.mrf.mxu0  ;;  %v9809_v13 = vpack.c.bf16 %v1656_v6, %v1654_v25  ;;  %v1559_v17 = vadd.f32 %v1441_v4, %v1167_v54  ;;  %v10289_v25 = vld [vmem:[#allocation33_spill] sm:$0xff]  ;;  %v6386_v4 = vld [vmem:[#allocation11 + $0x2c0] sm:$0xf] }
 0x289   : > { %v1599_v5 = vadd.f32 %v9729_v26, %v1557_v11  ;;  %v9815_v27 = vpack.c.bf16 %v1655_v10, %v1653_v36  ;;  %v1562_v8 = vadd.f32 %v1528_v63, %v1254_v12  ;;  %v1196_v58 = vadd.f32 %v10290_v56, %v10289_v25  ;;  %v6402_v11 = vld [vmem:[#allocation11 + $0x2e0] sm:$0xf]  ;;  %v8263_v10 = vld [vmem:[#allocation11 + $0x2ec] sm:$0xf0]  ;;  %v8261_v25 = vld [vmem:[#allocation11 + $0x2e4] sm:$0xf] }
 0x28a   : > { %v1630_v34 = vmax.f32 %v1598_v28, 0.0  ;;  %v1225_v36 = vadd.f32 %v10292_v61, %v10291_v43  ;;  %v1601_v35 = vadd.f32 %v9725_v47, %v1559_v17  ;;  %v1643_v30 = vmax.f32 %v1617_v60, %v1619_v19  ;;  %v6530_v12 = vld [vmem:[#allocation11 + $0x3e0] sm:$0xf]  ;;  %v8295_v28 = vld [vmem:[#allocation11 + $0x3ec] sm:$0xf0] }
 0x28b   : > { %v1631_v53 = vmax.f32 %v1599_v5, 0.0  ;;  %v1604_v45 = vadd.f32 %v9722_v41, %v1562_v8  ;;  %v6403_v18 = vor.u32 %v8263_v10, %v6402_v11  ;;  %v8259_v63 = vld [vmem:[#allocation11 + $0x2cc] sm:$0xf0]  ;;  %v6531_v1 = vor.u32 %v8295_v28, %v6530_v12  ;;  %v6514_v54 = vld [vmem:[#allocation11 + $0x3c0] sm:$0xf] }
 0x28c   : > { %v1650_v48 = vmax.f32 %v1630_v34, %v1632_v44  ;;  %v1633_v41 = vmax.f32 %v1601_v35, 0.0  ;;  %v6387_v5 = vor.u32 %v8259_v63, %v6386_v4  ;;  %v6515_v57 = vor.u32 %v8291_v29, %v6514_v54  ;;  %v6370_v44 = vld [vmem:[#allocation11 + $0x2a0] sm:$0xf]  ;;  %v8255_v34 = vld [vmem:[#allocation11 + $0x2ac] sm:$0xf0] }
 0x28d   : > { %v1649_v23 = vmax.f32 %v1629_v49, %v1631_v53  ;;  %v1470_v14 = vpop.f32.mrf.mxu2  ;;  %v1636_v55 = vmax.f32 %v1604_v45, 0.0  ;;  %2240 = vmatpush.bf16.msra.mxu0 %v6403_v18  ;;  %v6498_v8 = vld [vmem:[#allocation11 + $0x3a0] sm:$0xf]  ;;  %v6371_v62 = vor.u32 %v8255_v34, %v6370_v44  ;;  %v8251_v53 = vld [vmem:[#allocation11 + $0x28c] sm:$0xf0] }
 0x28e   : > { %v1658_v7 = vmax.f32 %v9750_v40, %v1650_v48  ;;  %v1560_v20 = vadd.f32 %v1470_v14, %v1196_v58  ;;  %v1499_v0 = vpop.f32.mrf.mxu3  ;;  %v6354_v49 = vld [vmem:[#allocation11 + $0x280] sm:$0xf]  ;;  %v6499_v17 = vor.u32 %v8287_v38, %v6498_v8  ;;  %v6404_v56 = vld [vmem:[#allocation11 + $0x2f0] sm:$0xf0]  ;;  %v8293_v58 = vld [vmem:[#allocation11 + $0x3e4] sm:$0xf] }
 0x28f   : > { %v1657_v31 = vmax.f32 %v9752_v42, %v1649_v23  ;;  %v1561_v46 = vadd.f32 %v1499_v0, %v1225_v36  ;;  %v6407_v15 = vor.u32 %v8261_v25, %v6404_v56  ;;  %v6532_v48 = vld [vmem:[#allocation11 + $0x3f0] sm:$0xf0]  ;;  %v6482_v43 = vld [vmem:[#allocation11 + $0x380] sm:$0xf]  ;;  %v8283_v61 = vld [vmem:[#allocation11 + $0x38c] sm:$0xf0]  ;;  %v6355_v23 = vor.u32 %v8251_v53, %v6354_v49 }
 0x290   : > { %v1602_v50 = vadd.f32 %v9727_v39, %v1560_v20  ;;  %v8231_v39 = vld [vmem:[#allocation10 + $0x10] sm:$0xff]  ;;  %v6535_v36 = vor.u32 %v8293_v58, %v6532_v48  ;;  %v6388_v14 = vld [vmem:[#allocation11 + $0x2d0] sm:$0xf0]  ;;  %v8247_v20 = vld [vmem:[#allocation11 + $0x26c] sm:$0xf0] }
 0x291   : > { %v1603_v24 = vadd.f32 %v9729_v26, %v1561_v46  ;;  %v9841_v26 = vld [vmem:[#allocation10] sm:$0xff]  ;;  %2241 = vmatpush.bf16.msra.mxu0 %v6387_v5  ;;  %v6338_v45 = vld [vmem:[#allocation11 + $0x260] sm:$0xf]  ;;  %v6391_v0 = vor.u32 %v8257_v22, %v6388_v14  ;;  %v8253_v46 = vld [vmem:[#allocation11 + $0x2a4] sm:$0xf] }
 0x292   : > { %v1634_v40 = vmax.f32 %v1602_v50, 0.0  ;;  %v6466_v35 = vld [vmem:[#allocation11 + $0x360] sm:$0xf]  ;;  %v8279_v50 = vld [vmem:[#allocation11 + $0x36c] sm:$0xf0]  ;;  %v6339_v16 = vor.u32 %v8247_v20, %v6338_v45 }
 0x293   : > { %v1635_v21 = vmax.f32 %v1603_v24, 0.0  ;;  %v8285_v19 = vld [vmem:[#allocation11 + $0x3a4] sm:$0xf]  ;;  %v6500_v24 = vld [vmem:[#allocation11 + $0x3b0] sm:$0xf0] }
 0x294   : > { %v1652_v52 = vmax.f32 %v1634_v40, %v1636_v55  ;;  %v6322_v55 = vld [vmem:[#allocation11 + $0x240] sm:$0xf]  ;;  %v6375_v40 = vor.u32 %v8253_v46, %v6372_v32  ;;  %v8243_v60 = vld [vmem:[#allocation11 + $0x24c] sm:$0xf0]  ;;  %v6340_v18 = vld [vmem:[#allocation11 + $0x270] sm:$0xf0] }
 0x295   : > { %v1651_v37 = vmax.f32 %v1633_v41, %v1635_v21  ;;  %2242 = vmatpush.bf16.msra.mxu0 %v6371_v62  ;;  %v6503_v41 = vor.u32 %v8285_v19, %v6500_v24  ;;  %v8249_v21 = vld [vmem:[#allocation11 + $0x284] sm:$0xf]  ;;  %v8239_v10 = vld [vmem:[#allocation11 + $0x22c] sm:$0xf0]  ;;  %v6468_v63 = vld [vmem:[#allocation11 + $0x370] sm:$0xf0] }
 0x296   : > { %v1660_v42 = vmax.f32 %v1644_v51, %v1652_v52  ;;  %v6356_v51 = vld [vmem:[#allocation11 + $0x290] sm:$0xf0]  ;;  %v6467_v52 = vor.u32 %v8279_v50, %v6466_v35  ;;  %v8277_v4 = vld [vmem:[#allocation11 + $0x364] sm:$0xf]  ;;  %v8271_v54 = vld [vmem:[#allocation11 + $0x32c] sm:$0xf0] }
 0x297   : > { %v1659_v2 = vmax.f32 %v1643_v30, %v1651_v37  ;;  %v8281_v30 = vld [vmem:[#allocation11 + $0x384] sm:$0xf]  ;;  %v6484_v37 = vld [vmem:[#allocation11 + $0x390] sm:$0xf0]  ;;  %v6359_v11 = vor.u32 %v8249_v21, %v6356_v51  ;;  %v8235_v44 = vld [vmem:[#allocation11 + $0x20c] sm:$0xf0]  ;;  %v6471_v34 = vor.u32 %v8277_v4, %v6468_v63 }
 0x298   : > { %v9833_v47 = vpack.c.bf16 %v1660_v42, %v1658_v7  ;;  %v6516_v7 = vld [vmem:[#allocation11 + $0x3d0] sm:$0xf0]  ;;  %v6450_v42 = vld [vmem:[#allocation11 + $0x340] sm:$0xf]  ;;  %v6487_v12 = vor.u32 %v8281_v30, %v6484_v37  ;;  %v6410_v38 = vld [vmem:[#allocation11 + $0x2e8] sm:$0xf] }
 0x299   : > { %v9835_v6 = vpack.c.bf16 %v1659_v2, %v1657_v31  ;;  %v6519_v3 = vor.u32 %v8289_v59, %v6516_v7  ;;  %v6483_v31 = vor.u32 %v8283_v61, %v6482_v43  ;;  %2243 = vmatpush.bf16.msra.mxu0 %v6355_v23  ;;  %v8275_v2 = vld [vmem:[#allocation11 + $0x34c] sm:$0xf0]  ;;  %v8264_v62 = vld [vmem:[#allocation11 + $0x2f4] sm:$0xf0]  ;;  %v6418_v49 = vld [vmem:[#allocation11 + $0x300] sm:$0xf] }
 0x29a   : > { %1838 = vmatpush.bf16.msra.mxu3 %v9833_v47  ;;  %v6451_v28 = vor.u32 %v8275_v2, %v6450_v42  ;;  %v8267_v53 = vld [vmem:[#allocation11 + $0x30c] sm:$0xf0]  ;;  %v6538_v25 = vld [vmem:[#allocation11 + $0x3e8] sm:$0xf]  ;;  %v8296_v56 = vld [vmem:[#allocation11 + $0x3f4] sm:$0xf0]  ;;  %v6411_v58 = vor.u32 %v8264_v62, %v6410_v38 }
 0x29b   : > { %1692 = vmatpush.bf16.msrb.mxu1 %v9835_v6  ;;  %1819 = vmatpush.bf16.msra.mxu2 %v9835_v6  ;;  %v6394_v48 = vld [vmem:[#allocation11 + $0x2c8] sm:$0xf]  ;;  %v8260_v43 = vld [vmem:[#allocation11 + $0x2d4] sm:$0xf0]  ;;  %v6539_v61 = vor.u32 %v8296_v56, %v6538_v25  ;;  %v6324_v35 = vld [vmem:[#allocation11 + $0x250] sm:$0xf0] }
 0x29c   : > { %v8292_v22 = vld [vmem:[#allocation11 + $0x3d4] sm:$0xf0]  ;;  %v6395_v23 = vor.u32 %v8260_v43, %v6394_v48  ;;  %v6378_v14 = vld [vmem:[#allocation11 + $0x2a8] sm:$0xf]  ;;  %v8273_v46 = vld [vmem:[#allocation11 + $0x344] sm:$0xf] }
 0x29d   : > { %2244 = vmatpush.bf16.msra.mxu0 %v6339_v16  ;;  %v8256_v59 = vld [vmem:[#allocation11 + $0x2b4] sm:$0xf0]  ;;  %v6506_v45 = vld [vmem:[#allocation11 + $0x3a8] sm:$0xf]  ;;  %v6308_v21 = vld [vmem:[#allocation11 + $0x230] sm:$0xf0] }
 0x29e   : > { %1839 = vmatpush.bf16.msra.mxu3 %v9809_v13  ;;  %v8288_v20 = vld [vmem:[#allocation11 + $0x3b4] sm:$0xf0]  ;;  %v6362_v50 = vld [vmem:[#allocation11 + $0x288] sm:$0xf]  ;;  %v8269_v51 = vld [vmem:[#allocation11 + $0x324] sm:$0xf] }
 0x29f   : > { %1693 = vmatpush.bf16.msrb.mxu1 %v9815_v27  ;;  %1820 = vmatpush.bf16.msra.mxu2 %v9815_v27  ;;  %v8252_v19 = vld [vmem:[#allocation11 + $0x294] sm:$0xf0]  ;;  %v6436_v30 = vld [vmem:[#allocation11 + $0x330] sm:$0xf0]  ;;  %v6346_v37 = vld [vmem:[#allocation11 + $0x268] sm:$0xf] }
 0x2a0   : > { %v6363_v16 = vor.u32 %v8252_v19, %v6362_v50  ;;  %v8248_v42 = vld [vmem:[#allocation11 + $0x274] sm:$0xf0]  ;;  %v6439_v2 = vor.u32 %v8269_v51, %v6436_v30  ;;  %v6420_v4 = vld [vmem:[#allocation11 + $0x310] sm:$0xf0]  ;;  %v6330_v63 = vld [vmem:[#allocation11 + $0x248] sm:$0xf] }
 0x2a1   : > { %6286 = vmatmul.msk.bf16.vlgmr.msra.gmra.mxu3 %vm1679_vm2, %v8231_v39  ;;  %v6442_v38 = vld [vmem:[#allocation11 + $0x328] sm:$0xf]  ;;  %v8250_v19 = vld [vmem:[#allocation11 + $0x28c] sm:$0xf]  ;;  %v6476_v30 = vld [vmem:[#allocation11 + $0x378] sm:$0xf0] }
 0x2a2   : > { %6284 = vmatmul.msk.bf16.vlgmr.msra.gmra.mxu2 %vm1679_vm2, %v8231_v39  ;;  %6272 = vmatmul.msk.bf16.vlgmr.msrb.gmra.mxu1 %vm1679_vm2, %v9841_v26  ;;  %v6323_v39 = vor.u32 %v8243_v60, %v6322_v55  ;;  %v6490_v55 = vld [vmem:[#allocation11 + $0x388] sm:$0xf]  ;;  %v8278_v51 = vld [vmem:[#allocation11 + $0x36c] sm:$0xf] }
 0x2a3   : > { %1711 = vmatpush.bf16.msra.mxu1 %v9833_v47  ;;  %2278 = vmatpush.bf16.msrb.mxu2 %v6407_v15  ;;  %v6419_v15 = vor.u32 %v8267_v53, %v6418_v49  ;;  %v8272_v49 = vld [vmem:[#allocation11 + $0x334] sm:$0xf0]  ;;  %v8262_v53 = vld [vmem:[#allocation11 + $0x2ec] sm:$0xf]  ;;  %v6298_v43 = vld [vmem:[#allocation11 + $0x208] sm:$0xf] }
 0x2a4   : > { %2297 = vmatpush.bf16.msrb.mxu3 %v6535_v36  ;;  %2245 = vmatpush.bf16.msra.mxu0 %v6323_v39  ;;  %v6522_v36 = vld [vmem:[#allocation11 + $0x3c8] sm:$0xf]  ;;  %v6347_v39 = vor.u32 %v8248_v42, %v6346_v37  ;;  %v6443_v25 = vor.u32 %v8272_v49, %v6442_v38  ;;  %v6479_v37 = vor.u32 %v8278_v51, %v6476_v30  ;;  %v8242_v42 = vld [vmem:[#allocation11 + $0x24c] sm:$0xf]  ;;  %v6428_v49 = vld [vmem:[#allocation11 + $0x318] sm:$0xf0] }
 0x2a5   : > { %v6523_v7 = vor.u32 %v8292_v22, %v6522_v36  ;;  %v6426_v36 = vld [vmem:[#allocation11 + $0x308] sm:$0xf] }
 0x2a7   : > { %1712 = vmatpush.bf16.msra.mxu1 %v9809_v13  ;;  %2279 = vmatpush.bf16.msrb.mxu2 %v6391_v0  ;;  %v6379_v0 = vor.u32 %v8256_v59, %v6378_v14  ;;  %v8258_v14 = vld [vmem:[#allocation11 + $0x2cc] sm:$0xf]  ;;  %v6396_v59 = vld [vmem:[#allocation11 + $0x2d8] sm:$0xf0] }
 0x2a8   : > { %2298 = vmatpush.bf16.msrb.mxu3 %v6519_v3  ;;  %v6507_v3 = vor.u32 %v8288_v20, %v6506_v45  ;;  %v6399_v45 = vor.u32 %v8258_v14, %v6396_v59  ;;  %v8290_v20 = vld [vmem:[#allocation11 + $0x3cc] sm:$0xf]  ;;  %v6660_v14 = vld [vmem:[#allocation11 + $0xf0] sm:$0xf0]  ;;  %v8227_v59 = vld [vmem:[#allocation11 + $0x1e4] sm:$0xf] }
 0x2ab   : > { %2259 = vmatpush.bf16.msrb.mxu1 %v6531_v1  ;;  %2280 = vmatpush.bf16.msrb.mxu2 %v6375_v40  ;;  %v6434_v1 = vld [vmem:[#allocation11 + $0x320] sm:$0xf]  ;;  %v8284_v40 = vld [vmem:[#allocation11 + $0x394] sm:$0xf0] }
 0x2ac   : > { %2299 = vmatpush.bf16.msrb.mxu3 %v6503_v41  ;;  %v6435_v8 = vor.u32 %v8271_v54, %v6434_v1  ;;  %v6491_v60 = vor.u32 %v8284_v40, %v6490_v55  ;;  %v8237_v41 = vld [vmem:[#allocation11 + $0x224] sm:$0xf]  ;;  %v8244_v1 = vld [vmem:[#allocation11 + $0x254] sm:$0xf0]  ;;  %v6492_v40 = vld [vmem:[#allocation11 + $0x398] sm:$0xf0] }
 0x2af   : > { %2260 = vmatpush.bf16.msrb.mxu1 %v6515_v57  ;;  %2281 = vmatpush.bf16.msrb.mxu2 %v6359_v11  ;;  %v6290_v57 = vld [vmem:[#allocation11 + $0x200] sm:$0xf]  ;;  %v8280_v11 = vld [vmem:[#allocation11 + $0x374] sm:$0xf0] }
 0x2b0   : > { %2300 = vmatpush.bf16.msrb.mxu3 %v6487_v12  ;;  %v8233_v12 = vld [vmem:[#allocation11 + $0x204] sm:$0xf] }
 0x2b1   : > { %6287 = vmatmul.msk.bf16.gmra.mxu3 %vm1679_vm2, %v8232_v33 }
 0x2b2   : > { %6285 = vmatmul.msk.bf16.gmra.mxu2 %vm1679_vm2, %v8232_v33  ;;  %6273 = vmatmul.msk.bf16.gmra.mxu1 %vm1679_vm2, %v9851_v9  ;;  %v6306_v33 = vld [vmem:[#allocation11 + $0x220] sm:$0xf] }
 0x2b3   : > { %2261 = vmatpush.bf16.msrb.mxu1 %v6499_v17  ;;  %v6307_v29 = vor.u32 %v8239_v10, %v6306_v33  ;;  %v6291_v17 = vor.u32 %v8235_v44, %v6290_v57  ;;  %v6474_v33 = vld [vmem:[#allocation11 + $0x368] sm:$0xf]  ;;  %v8276_v57 = vld [vmem:[#allocation11 + $0x354] sm:$0xf0] }
 0x2b4   : > { %2301 = vmatpush.bf16.msrb.mxu3 %v6471_v34  ;;  %v6475_v10 = vor.u32 %v8280_v11, %v6474_v33  ;;  %v6314_v34 = vld [vmem:[#allocation11 + $0x228] sm:$0xf]  ;;  %v6460_v33 = vld [vmem:[#allocation11 + $0x358] sm:$0xf0] }
 0x2b5   : > { %2246 = vmatpush.bf16.msra.mxu0 %v6307_v29  ;;  %v6331_v29 = vor.u32 %v8244_v1, %v6330_v63 }
 0x2b7   : > { %2262 = vmatpush.bf16.msrb.mxu1 %v6483_v31  ;;  %v8241_v31 = vld [vmem:[#allocation11 + $0x244] sm:$0xf] }
 0x2b8   : > { %v6327_v32 = vor.u32 %v8241_v31, %v6324_v35  ;;  %v8254_v31 = vld [vmem:[#allocation11 + $0x2ac] sm:$0xf]  ;;  %v6380_v35 = vld [vmem:[#allocation11 + $0x2b8] sm:$0xf0] }
 0x2b9   : > { %2247 = vmatpush.bf16.msra.mxu0 %v6291_v17  ;;  %v6412_v17 = vld [vmem:[#allocation11 + $0x2f8] sm:$0xf0] }
 0x2ba   : > { %v6415_v56 = vor.u32 %v8262_v53, %v6412_v17  ;;  %v6642_v17 = vld [vmem:[#allocation11 + $0xc0] sm:$0xf] }
 0x2bb   : > { %2263 = vmatpush.bf16.msrb.mxu1 %v6467_v52  ;;  %v6311_v52 = vor.u32 %v8237_v41, %v6308_v21  ;;  %v8246_v41 = vld [vmem:[#allocation11 + $0x26c] sm:$0xf]  ;;  %v6348_v21 = vld [vmem:[#allocation11 + $0x278] sm:$0xf0] }
 0x2bd   : > { %2316 = vmatpush.bf16.msrb.mxu0 %v6411_v58  ;;  %v8294_v58 = vld [vmem:[#allocation11 + $0x3ec] sm:$0xf] }
 0x2bf   : > { %2264 = vmatpush.bf16.msrb.mxu1 %v6451_v28 }
 0x2c1   : > { %2317 = vmatpush.bf16.msrb.mxu0 %v6395_v23  ;;  %v8268_v23 = vld [vmem:[#allocation11 + $0x314] sm:$0xf0] }
 0x2c2   : > { %6274 = vmatmul.msk.bf16.vlgmr.msra.gmra.mxu1 %vm1679_vm2, %v9841_v26  ;;  %v8245_v26 = vld [vmem:[#allocation11 + $0x264] sm:$0xf] }
 0x2c3   : > { %v6343_v5 = vor.u32 %v8245_v26, %v6340_v18  ;;  %2265 = vmatpush.bf16.msrb.mxu1 %v6435_v8  ;;  %v6292_v26 = vld [vmem:[#allocation11 + $0x210] sm:$0xf0]  ;;  %v8265_v18 = vld [vmem:[#allocation11 + $0x304] sm:$0xf]  ;;  %v8240_v8 = vld [vmem:[#allocation11 + $0x234] sm:$0xf0] }
 0x2c4   : > { %v6295_v28 = vor.u32 %v8233_v12, %v6292_v26  ;;  %v6423_v54 = vor.u32 %v8265_v18, %v6420_v4  ;;  %v6315_v62 = vor.u32 %v8240_v8, %v6314_v34  ;;  %v8238_v12 = vld [vmem:[#allocation11 + $0x22c] sm:$0xf]  ;;  %v6316_v26 = vld [vmem:[#allocation11 + $0x238] sm:$0xf0]  ;;  %v6786_v34 = vld [vmem:[#allocation11 + $0x1e0] sm:$0xf] }
 0x2c5   : > { %2282 = vmatpush.bf16.msrb.mxu2 %v6343_v5  ;;  %2318 = vmatpush.bf16.msrb.mxu0 %v6379_v0  ;;  %v6458_v5 = vld [vmem:[#allocation11 + $0x348] sm:$0xf]  ;;  %v6524_v0 = vld [vmem:[#allocation11 + $0x3d8] sm:$0xf0]  ;;  %v6319_v1 = vor.u32 %v8238_v12, %v6316_v26  ;;  %v8229_v8 = vld [vmem:[#allocation11 + $0x1ec] sm:$0xf0] }
 0x2c6   : > { %v6459_v44 = vor.u32 %v8276_v57, %v6458_v5  ;;  %v6444_v4 = vld [vmem:[#allocation11 + $0x338] sm:$0xf0]  ;;  %v6658_v57 = vld [vmem:[#allocation11 + $0xe0] sm:$0xf] }
 0x2c7   : > { %2266 = vmatpush.bf16.msrb.mxu1 %v6419_v15  ;;  %v6540_v15 = vld [vmem:[#allocation11 + $0x3f8] sm:$0xf0] }
 0x2c8   : > { %v6543_v48 = vor.u32 %v8294_v58, %v6540_v15  ;;  %v6300_v5 = vld [vmem:[#allocation11 + $0x218] sm:$0xf0]  ;;  %v6787_v15 = vor.u32 %v8229_v8, %v6786_v34 }
 0x2c9   : > { %2283 = vmatpush.bf16.msrb.mxu2 %v6327_v32  ;;  %2319 = vmatpush.bf16.msrb.mxu0 %v6363_v16  ;;  %v6383_v32 = vor.u32 %v8254_v31, %v6380_v35  ;;  %v8282_v16 = vld [vmem:[#allocation11 + $0x38c] sm:$0xf]  ;;  %v8189_v35 = vld [vmem:[#allocation11 + $0xac] sm:$0xf0] }
 0x2cb   : > { %2335 = vmatpush.bf16.msra.mxu1 %v6539_v61  ;;  %v8236_v61 = vld [vmem:[#allocation11 + $0x214] sm:$0xf0] }
 0x2cc   : > { %v6299_v22 = vor.u32 %v8236_v61, %v6298_v43  ;;  %v6770_v43 = vld [vmem:[#allocation11 + $0x1c0] sm:$0xf]  ;;  %v8225_v61 = vld [vmem:[#allocation11 + $0x1cc] sm:$0xf0] }
 0x2cd   : > { %2284 = vmatpush.bf16.msrb.mxu2 %v6311_v52  ;;  %2320 = vmatpush.bf16.msrb.mxu0 %v6347_v39  ;;  %v6351_v52 = vor.u32 %v8246_v41, %v6348_v21  ;;  %v8274_v39 = vld [vmem:[#allocation11 + $0x34c] sm:$0xf]  ;;  %v6771_v31 = vor.u32 %v8225_v61, %v6770_v43  ;;  %v8179_v61 = vld [vmem:[#allocation11 + $0x64] sm:$0xf] }
 0x2cf   : > { %2336 = vmatpush.bf16.msra.mxu1 %v6523_v7  ;;  %v6427_v7 = vor.u32 %v8268_v23, %v6426_v36  ;;  %v8195_v23 = vld [vmem:[#allocation11 + $0xe4] sm:$0xf] }
 0x2d1   : > { %2285 = vmatpush.bf16.msrb.mxu2 %v6295_v28  ;;  %2321 = vmatpush.bf16.msrb.mxu0 %v6331_v29  ;;  %v8270_v28 = vld [vmem:[#allocation11 + $0x32c] sm:$0xf] }
 0x2d2   : > { %6275 = vmatmul.msk.bf16.gmra.mxu1 %vm1679_vm2, %v9851_v9  ;;  %v6452_v9 = vld [vmem:[#allocation11 + $0x350] sm:$0xf0]  ;;  %v8234_v29 = vld [vmem:[#allocation11 + $0x20c] sm:$0xf] }
 0x2d3   : > { %2337 = vmatpush.bf16.msra.mxu1 %v6507_v3  ;;  %v6455_v24 = vor.u32 %v8273_v46, %v6452_v9  ;;  %v6527_v3 = vor.u32 %v8290_v20, %v6524_v0  ;;  %v8286_v46 = vld [vmem:[#allocation11 + $0x3ac] sm:$0xf]  ;;  %v6508_v9 = vld [vmem:[#allocation11 + $0x3b8] sm:$0xf0]  ;;  %v6303_v38 = vor.u32 %v8234_v29, %v6300_v5  ;;  %v6626_v20 = vld [vmem:[#allocation11 + $0xa0] sm:$0xf] }
 0x2d4   : > { %v6511_v50 = vor.u32 %v8286_v46, %v6508_v9  ;;  %v6754_v46 = vld [vmem:[#allocation11 + $0x1a0] sm:$0xf]  ;;  %v8191_v9 = vld [vmem:[#allocation11 + $0xc4] sm:$0xf]  ;;  %v8213_v29 = vld [vmem:[#allocation11 + $0x16c] sm:$0xf0] }
 0x2d5   : > { %2302 = vmatpush.bf16.msrb.mxu3 %v6455_v24  ;;  %2322 = vmatpush.bf16.msrb.mxu0 %v6315_v62  ;;  %v6364_v24 = vld [vmem:[#allocation11 + $0x298] sm:$0xf0]  ;;  %v8266_v62 = vld [vmem:[#allocation11 + $0x30c] sm:$0xf] }
 0x2d6   : > { %2354 = vmatpush.bf16.msra.mxu2 %v6415_v56  ;;  %v6367_v55 = vor.u32 %v8250_v19, %v6364_v24  ;;  %v8223_v19 = vld [vmem:[#allocation11 + $0x1c4] sm:$0xf] }
 0x2d7   : > { %2338 = vmatpush.bf16.msra.mxu1 %v6491_v60  ;;  %v6495_v60 = vor.u32 %v8282_v16, %v6492_v40  ;;  %v6772_v16 = vld [vmem:[#allocation11 + $0x1d0] sm:$0xf0]  ;;  %v6610_v40 = vld [vmem:[#allocation11 + $0x80] sm:$0xf] }
 0x2d8   : > { %v6775_v21 = vor.u32 %v8223_v19, %v6772_v16  ;;  %v6708_v19 = vld [vmem:[#allocation11 + $0x150] sm:$0xf0] }
 0x2d9   : > { %2303 = vmatpush.bf16.msrb.mxu3 %v6439_v2  ;;  %2323 = vmatpush.bf16.msrb.mxu0 %v6299_v22  ;;  %v6332_v2 = vld [vmem:[#allocation11 + $0x258] sm:$0xf0]  ;;  %v6431_v22 = vor.u32 %v8266_v62, %v6428_v49 }
 0x2da   : > { %2355 = vmatpush.bf16.msra.mxu2 %v6399_v45  ;;  %v6335_v11 = vor.u32 %v8242_v42, %v6332_v2  ;;  %v6788_v45 = vld [vmem:[#allocation11 + $0x1f0] sm:$0xf0]  ;;  %v8219_v2 = vld [vmem:[#allocation11 + $0x1a4] sm:$0xf] }
 0x2db   : > { %2339 = vmatpush.bf16.msra.mxu1 %v6475_v10  ;;  %v6463_v10 = vor.u32 %v8274_v39, %v6460_v33  ;;  %v6791_v0 = vor.u32 %v8227_v59, %v6788_v45  ;;  %v6628_v42 = vld [vmem:[#allocation11 + $0xb0] sm:$0xf0]  ;;  %v6738_v39 = vld [vmem:[#allocation11 + $0x180] sm:$0xf]  ;;  %v8217_v33 = vld [vmem:[#allocation11 + $0x18c] sm:$0xf0] }
 0x2dc   : > { %v6724_v59 = vld [vmem:[#allocation11 + $0x170] sm:$0xf0] }
 0x2dd   : > { %2304 = vmatpush.bf16.msrb.mxu3 %v6423_v54  ;;  %v6447_v54 = vor.u32 %v8270_v28, %v6444_v4  ;;  %v6594_v28 = vld [vmem:[#allocation11 + $0x60] sm:$0xf]  ;;  %v8183_v4 = vld [vmem:[#allocation11 + $0x84] sm:$0xf] }
 0x2de   : > { %2356 = vmatpush.bf16.msra.mxu2 %v6383_v32  ;;  %v8221_v32 = vld [vmem:[#allocation11 + $0x1ac] sm:$0xf0] }
 0x2df   : > { %2340 = vmatpush.bf16.msra.mxu1 %v6459_v44  ;;  %v8197_v44 = vld [vmem:[#allocation11 + $0xec] sm:$0xf0]  ;;  %v6755_v30 = vor.u32 %v8221_v32, %v6754_v46 }
 0x2e0   : > { %v6659_v58 = vor.u32 %v8197_v44, %v6658_v57  ;;  %v8215_v57 = vld [vmem:[#allocation11 + $0x184] sm:$0xf]  ;;  %v6740_v44 = vld [vmem:[#allocation11 + $0x190] sm:$0xf0]  ;;  %v8205_v46 = vld [vmem:[#allocation11 + $0x12c] sm:$0xf0] }
 0x2e1   : > { %2373 = vmatpush.bf16.msra.mxu3 %v6543_v48  ;;  %v8193_v48 = vld [vmem:[#allocation11 + $0xcc] sm:$0xf0]  ;;  %v6743_v43 = vor.u32 %v8215_v57, %v6740_v44  ;;  %v6650_v44 = vld [vmem:[#allocation11 + $0xc8] sm:$0xf] }
 0x2e2   : > { %2357 = vmatpush.bf16.msra.mxu2 %v6367_v55 }
 0x2e3   : > { %2341 = vmatpush.bf16.msra.mxu1 %v6443_v25 }
 0x2e5   : > { %2374 = vmatpush.bf16.msra.mxu3 %v6527_v3  ;;  %v6643_v3 = vor.u32 %v8193_v48, %v6642_v17  ;;  %v8177_v17 = vld [vmem:[#allocation11 + $0x4c] sm:$0xf0] }
 0x2e6   : > { %2358 = vmatpush.bf16.msra.mxu2 %v6351_v52  ;;  %v6627_v52 = vor.u32 %v8189_v35, %v6626_v20  ;;  %v6562_v20 = vld [vmem:[#allocation11 + $0x20] sm:$0xf] }
 0x2e7   : > { %2342 = vmatpush.bf16.msra.mxu1 %v6427_v7  ;;  %v6663_v7 = vor.u32 %v8195_v23, %v6660_v14  ;;  %v8211_v14 = vld [vmem:[#allocation11 + $0x164] sm:$0xf]  ;;  %v6690_v35 = vld [vmem:[#allocation11 + $0x120] sm:$0xf] }
 0x2e8   : > { %v6727_v32 = vor.u32 %v8211_v14, %v6724_v59  ;;  %v6691_v16 = vor.u32 %v8205_v46, %v6690_v35  ;;  %v8190_v59 = vld [vmem:[#allocation11 + $0xb4] sm:$0xf0]  ;;  %v6780_v46 = vld [vmem:[#allocation11 + $0x1d8] sm:$0xf0] }
 0x2e9   : > { %2375 = vmatpush.bf16.msra.mxu3 %v6511_v50  ;;  %v6644_v50 = vld [vmem:[#allocation11 + $0xd0] sm:$0xf0] }
 0x2ea   : > { %2359 = vmatpush.bf16.msra.mxu2 %v6335_v11  ;;  %v6647_v24 = vor.u32 %v8191_v9, %v6644_v50  ;;  %v8207_v50 = vld [vmem:[#allocation11 + $0x144] sm:$0xf] }
 0x2ed   : > { %2376 = vmatpush.bf16.msra.mxu3 %v6495_v60  ;;  %v8185_v60 = vld [vmem:[#allocation11 + $0x8c] sm:$0xf0] }
 0x2ee   : > { %2360 = vmatpush.bf16.msra.mxu2 %v6319_v1  ;;  %v6611_v26 = vor.u32 %v8185_v60, %v6610_v40  ;;  %v8181_v1 = vld [vmem:[#allocation11 + $0x6c] sm:$0xf0]  ;;  %v8171_v40 = vld [vmem:[#allocation11 + $0x24] sm:$0xf]  ;;  %v6564_v60 = vld [vmem:[#allocation11 + $0x30] sm:$0xf0] }
 0x2ef   : > { %v6595_v62 = vor.u32 %v8181_v1, %v6594_v28  ;;  %v6794_v28 = vld [vmem:[#allocation11 + $0x1e8] sm:$0xf] }
 0x2f1   : > { %2377 = vmatpush.bf16.msra.mxu3 %v6479_v37  ;;  %v8187_v37 = vld [vmem:[#allocation11 + $0xa4] sm:$0xf] }
 0x2f2   : > { %2361 = vmatpush.bf16.msra.mxu2 %v6303_v38  ;;  %v6631_v11 = vor.u32 %v8187_v37, %v6628_v42  ;;  %v6567_v37 = vor.u32 %v8171_v40, %v6564_v60  ;;  %v8203_v42 = vld [vmem:[#allocation11 + $0x124] sm:$0xf]  ;;  %v8218_v40 = vld [vmem:[#allocation11 + $0x194] sm:$0xf0] }
 0x2f5   : > { %2378 = vmatpush.bf16.msra.mxu3 %v6463_v10  ;;  %v6756_v10 = vld [vmem:[#allocation11 + $0x1b0] sm:$0xf0] }
 0x2f6   : > { %v6759_v12 = vor.u32 %v8219_v2, %v6756_v10  ;;  %v6692_v2 = vld [vmem:[#allocation11 + $0x130] sm:$0xf0]  ;;  %v6666_v10 = vld [vmem:[#allocation11 + $0xe8] sm:$0xf] }
 0x2f9   : > { %2379 = vmatpush.bf16.msra.mxu3 %v6447_v54  ;;  %v6722_v54 = vld [vmem:[#allocation11 + $0x160] sm:$0xf] }
 0x2fa   : > { %v6723_v49 = vor.u32 %v8213_v29, %v6722_v54  ;;  %v8199_v54 = vld [vmem:[#allocation11 + $0x104] sm:$0xf]  ;;  %v6676_v29 = vld [vmem:[#allocation11 + $0x110] sm:$0xf0] }
 0x2fd   : > { %2380 = vmatpush.bf16.msra.mxu3 %v6431_v22  ;;  %v6596_v22 = vld [vmem:[#allocation11 + $0x70] sm:$0xf0] }
 0x2fe   : > { %v6599_v23 = vor.u32 %v8179_v61, %v6596_v22 }
 0x31f   : > { %v9869_v41 = vpop.f32.mrf.mxu1 }
 0x324   : > { %v1841_v18 = vpop.f32.mrf.mxu3 }
 0x325   : > { %v1822_v63 = vpop.f32.mrf.mxu2 }
 0x327   : > { %v9875_v48 = vpop.f32.mrf.mxu1 }
 0x32c   : > { %v1843_v53 = vpop.f32.mrf.mxu3 }
 0x32d   : > { %v1824_v25 = vpop.f32.mrf.mxu2  ;;  %v9861_v56 = vpack.c.bf16 %v1843_v53, %v1841_v18  ;;  %v6739_v18 = vor.u32 %v8217_v33, %v6738_v39  ;;  %v6578_v53 = vld [vmem:[#allocation11 + $0x40] sm:$0xf] }
 0x32e   : > { %v9863_v36 = vpack.c.bf16 %v1824_v25, %v1822_v63  ;;  %v6612_v63 = vld [vmem:[#allocation11 + $0x90] sm:$0xf0]  ;;  %v6706_v25 = vld [vmem:[#allocation11 + $0x140] sm:$0xf] }
 0x32f   : > { %2267 = vmatmul.bf16.vlgmr.msrb.gmra.mxu1 %v9861_v56  ;;  %2305 = vmatmul.bf16.vlgmr.msrb.gmra.mxu3 %v9861_v56  ;;  %v6615_v5 = vor.u32 %v8183_v4, %v6612_v63  ;;  %v9881_v39 = vpop.f32.mrf.mxu1  ;;  %v8230_v4 = vld [vmem:[#allocation11 + $0x1f4] sm:$0xf0]  ;;  %v6695_v63 = vor.u32 %v8203_v42, %v6692_v2  ;;  %v6602_v2 = vld [vmem:[#allocation11 + $0x68] sm:$0xf] }
 0x330   : > { %2248 = vmatmul.bf16.vlgmr.msra.gmra.mxu0 %v9863_v36  ;;  %2286 = vmatmul.bf16.vlgmr.msrb.gmra.mxu2 %v9863_v36  ;;  %v6795_v57 = vor.u32 %v8230_v4, %v6794_v28 }
 0x331   : > { %2712 = vmatpush.bf16.msra.mxu0 %v6659_v58  ;;  %2731 = vmatpush.bf16.msrb.mxu1 %v6787_v15  ;;  %v8209_v15 = vld [vmem:[#allocation11 + $0x14c] sm:$0xf0] }
 0x332   : > { %2750 = vmatpush.bf16.msrb.mxu2 %v6663_v7  ;;  %2769 = vmatpush.bf16.msrb.mxu3 %v6791_v0  ;;  %v6579_v7 = vor.u32 %v8177_v17, %v6578_v53  ;;  %v6707_v45 = vor.u32 %v8209_v15, %v6706_v25  ;;  %v8175_v0 = vld [vmem:[#allocation11 + $0x44] sm:$0xf]  ;;  %v8196_v53 = vld [vmem:[#allocation11 + $0xec] sm:$0xf]  ;;  %v6668_v17 = vld [vmem:[#allocation11 + $0xf8] sm:$0xf0] }
 0x333   : > { %v8228_v25 = vld [vmem:[#allocation11 + $0x1ec] sm:$0xf]  ;;  %v6671_v15 = vor.u32 %v8196_v53, %v6668_v17  ;;  %v6588_v17 = vld [vmem:[#allocation11 + $0x58] sm:$0xf0] }
 0x334   : > { %v1846_v55 = vpop.f32.mrf.mxu3  ;;  %v8176_v53 = vld [vmem:[#allocation11 + $0x4c] sm:$0xf] }
 0x335   : > { %v1827_v51 = vpop.f32.mrf.mxu2  ;;  %2713 = vmatpush.bf16.msra.mxu0 %v6643_v3  ;;  %2732 = vmatpush.bf16.msrb.mxu1 %v6771_v31  ;;  %v6580_v3 = vld [vmem:[#allocation11 + $0x50] sm:$0xf0]  ;;  %v8173_v31 = vld [vmem:[#allocation11 + $0x2c] sm:$0xf0] }
 0x336   : > { %2751 = vmatpush.bf16.msrb.mxu2 %v6647_v24  ;;  %2770 = vmatpush.bf16.msrb.mxu3 %v6775_v21  ;;  %v6583_v9 = vor.u32 %v8175_v0, %v6580_v3  ;;  %v6563_v24 = vor.u32 %v8173_v31, %v6562_v20  ;;  %v8169_v21 = vld [vmem:[#allocation11 + $0xc] sm:$0xf0]  ;;  %v6652_v0 = vld [vmem:[#allocation11 + $0xd8] sm:$0xf0]  ;;  %v8224_v3 = vld [vmem:[#allocation11 + $0x1cc] sm:$0xf] }
 0x337   : > { %v9887_v20 = vpop.f32.mrf.mxu1  ;;  %v8186_v31 = vld [vmem:[#allocation11 + $0x94] sm:$0xf0] }
 0x339   : > { %2714 = vmatpush.bf16.msra.mxu0 %v6627_v52  ;;  %2733 = vmatpush.bf16.msrb.mxu1 %v6755_v30  ;;  %v8201_v52 = vld [vmem:[#allocation11 + $0x10c] sm:$0xf0]  ;;  %v6711_v30 = vor.u32 %v8207_v50, %v6708_v19  ;;  %v6783_v50 = vor.u32 %v8224_v3, %v6780_v46  ;;  %v8188_v19 = vld [vmem:[#allocation11 + $0xac] sm:$0xf]  ;;  %v6554_v3 = vld [vmem:[#allocation11 + $0x8] sm:$0xf] }
 0x33a   : > { %2752 = vmatpush.bf16.msrb.mxu2 %v6631_v11  ;;  %2771 = vmatpush.bf16.msrb.mxu3 %v6759_v12  ;;  %v8167_v12 = vld [vmem:[#allocation11 + $0x4] sm:$0xf]  ;;  %v8202_v46 = vld [vmem:[#allocation11 + $0x114] sm:$0xf0] }
 0x33c   : > { %v1848_v34 = vpop.f32.mrf.mxu3 }
 0x33d   : > { %v1829_v8 = vpop.f32.mrf.mxu2  ;;  %v9871_v38 = vpack.c.bf16 %v1848_v34, %v1846_v55  ;;  %2715 = vmatpush.bf16.msra.mxu0 %v6611_v26  ;;  %2734 = vmatpush.bf16.msrb.mxu1 %v6739_v18  ;;  %v6546_v55 = vld [vmem:[#allocation11] sm:$0xf]  ;;  %v6548_v26 = vld [vmem:[#allocation11 + $0x10] sm:$0xf0]  ;;  %v8198_v18 = vld [vmem:[#allocation11 + $0xf4] sm:$0xf0] }
 0x33e   : > { %v9873_v58 = vpack.c.bf16 %v1829_v8, %v1827_v51  ;;  %2753 = vmatpush.bf16.msrb.mxu2 %v6615_v5  ;;  %2772 = vmatpush.bf16.msrb.mxu3 %v6743_v43  ;;  %v6674_v51 = vld [vmem:[#allocation11 + $0x100] sm:$0xf]  ;;  %v6547_v33 = vor.u32 %v8169_v21, %v6546_v55  ;;  %v6551_v1 = vor.u32 %v8167_v12, %v6548_v26  ;;  %v8194_v34 = vld [vmem:[#allocation11 + $0xd4] sm:$0xf0]  ;;  %v6778_v8 = vld [vmem:[#allocation11 + $0x1c8] sm:$0xf] }
 0x33f   : > { %2272 = vmatmul.bf16.gmra.mxu1 %v9871_v38  ;;  %2310 = vmatmul.bf16.gmra.mxu3 %v9871_v38  ;;  %v6675_v11 = vor.u32 %v8201_v52, %v6674_v51  ;;  %v6667_v5 = vor.u32 %v8198_v18, %v6666_v10  ;;  %v6796_v43 = vld [vmem:[#allocation11 + $0x1f8] sm:$0xf0]  ;;  %v6651_v61 = vor.u32 %v8194_v34, %v6650_v44  ;;  %v6746_v55 = vld [vmem:[#allocation11 + $0x188] sm:$0xf]  ;;  %v8184_v52 = vld [vmem:[#allocation11 + $0x8c] sm:$0xf]  ;;  %v9889_v28 = vpop.f32.mrf.mxu1 }
 0x340   : > { %2253 = vmatmul.bf16.gmra.mxu0 %v9873_v58  ;;  %2291 = vmatmul.bf16.gmra.mxu2 %v9873_v58  ;;  %v6799_v14 = vor.u32 %v8228_v25, %v6796_v43  ;;  %v6764_v21 = vld [vmem:[#allocation11 + $0x1b8] sm:$0xf0]  ;;  %v6747_v42 = vor.u32 %v8218_v40, %v6746_v55  ;;  %v8214_v10 = vld [vmem:[#allocation11 + $0x174] sm:$0xf0]  ;;  %v8216_v26 = vld [vmem:[#allocation11 + $0x18c] sm:$0xf] }
 0x341   : > { %2716 = vmatpush.bf16.msra.mxu0 %v6595_v62  ;;  %2735 = vmatpush.bf16.msrb.mxu1 %v6723_v49  ;;  %v8226_v62 = vld [vmem:[#allocation11 + $0x1d4] sm:$0xf0]  ;;  %v6679_v49 = vor.u32 %v8199_v54, %v6676_v29  ;;  %v6748_v18 = vld [vmem:[#allocation11 + $0x198] sm:$0xf0]  ;;  %v6714_v29 = vld [vmem:[#allocation11 + $0x148] sm:$0xf] }
 0x342   : > { %2754 = vmatpush.bf16.msrb.mxu2 %v6599_v23  ;;  %2773 = vmatpush.bf16.msrb.mxu3 %v6727_v32  ;;  %v6779_v22 = vor.u32 %v8226_v62, %v6778_v8  ;;  %v6634_v23 = vld [vmem:[#allocation11 + $0xa8] sm:$0xf]  ;;  %v8178_v54 = vld [vmem:[#allocation11 + $0x54] sm:$0xf0]  ;;  %v8180_v44 = vld [vmem:[#allocation11 + $0x6c] sm:$0xf] }
 0x343   : > { %v6635_v32 = vor.u32 %v8190_v59, %v6634_v23  ;;  %v6604_v34 = vld [vmem:[#allocation11 + $0x78] sm:$0xf0]  ;;  %v8212_v8 = vld [vmem:[#allocation11 + $0x16c] sm:$0xf]  ;;  %v6570_v43 = vld [vmem:[#allocation11 + $0x28] sm:$0xf] }
 0x344   : > { %v6607_v62 = vor.u32 %v8180_v44, %v6604_v34  ;;  %v8206_v23 = vld [vmem:[#allocation11 + $0x134] sm:$0xf0]  ;;  %v8208_v59 = vld [vmem:[#allocation11 + $0x14c] sm:$0xf] }
 0x345   : > { %2717 = vmatpush.bf16.msra.mxu0 %v6579_v7  ;;  %2736 = vmatpush.bf16.msrb.mxu1 %v6707_v45  ;;  %v6762_v7 = vld [vmem:[#allocation11 + $0x1a8] sm:$0xf]  ;;  %v8222_v45 = vld [vmem:[#allocation11 + $0x1b4] sm:$0xf0] }
 0x346   : > { %2755 = vmatpush.bf16.msrb.mxu2 %v6583_v9  ;;  %2774 = vmatpush.bf16.msrb.mxu3 %v6711_v30  ;;  %v6763_v9 = vor.u32 %v8222_v45, %v6762_v7  ;;  %v6620_v30 = vld [vmem:[#allocation11 + $0x98] sm:$0xf0]  ;;  %v8172_v45 = vld [vmem:[#allocation11 + $0x2c] sm:$0xf] }
 0x347   : > { %v6623_v12 = vor.u32 %v8184_v52, %v6620_v30  ;;  %v6716_v7 = vld [vmem:[#allocation11 + $0x158] sm:$0xf0] }
 0x348   : > { %v6684_v52 = vld [vmem:[#allocation11 + $0x118] sm:$0xf0] }
 0x349   : > { %2718 = vmatpush.bf16.msra.mxu0 %v6563_v24  ;;  %2737 = vmatpush.bf16.msrb.mxu1 %v6691_v16  ;;  %v6636_v24 = vld [vmem:[#allocation11 + $0xb8] sm:$0xf0]  ;;  %v8220_v16 = vld [vmem:[#allocation11 + $0x1ac] sm:$0xf] }
 0x34a   : > { %2756 = vmatpush.bf16.msrb.mxu2 %v6567_v37  ;;  %2775 = vmatpush.bf16.msrb.mxu3 %v6695_v63  ;;  %v6639_v60 = vor.u32 %v8188_v19, %v6636_v24  ;;  %v6767_v51 = vor.u32 %v8220_v16, %v6764_v21  ;;  %v6700_v19 = vld [vmem:[#allocation11 + $0x138] sm:$0xf0]  ;;  %v8168_v24 = vld [vmem:[#allocation11 + $0xc] sm:$0xf] }
 0x34b   : > { %v6556_v16 = vld [vmem:[#allocation11 + $0x18] sm:$0xf0] }
 0x34c   : > { %v6559_v21 = vor.u32 %v8168_v24, %v6556_v16 }
 0x34d   : > { %2719 = vmatpush.bf16.msra.mxu0 %v6547_v33  ;;  %2738 = vmatpush.bf16.msrb.mxu1 %v6675_v11  ;;  %v8182_v33 = vld [vmem:[#allocation11 + $0x74] sm:$0xf0]  ;;  %v6730_v11 = vld [vmem:[#allocation11 + $0x168] sm:$0xf] }
 0x34e   : > { %2757 = vmatpush.bf16.msrb.mxu2 %v6551_v1  ;;  %2776 = vmatpush.bf16.msrb.mxu3 %v6679_v49  ;;  %v6603_v4 = vor.u32 %v8182_v33, %v6602_v2  ;;  %v6731_v63 = vor.u32 %v8214_v10, %v6730_v11  ;;  %v6586_v1 = vld [vmem:[#allocation11 + $0x48] sm:$0xf]  ;;  %v6732_v49 = vld [vmem:[#allocation11 + $0x178] sm:$0xf0] }
 0x34f   : > { %2343 = vmatmul.bf16.vlgmr.msra.gmra.mxu1 %v9861_v56  ;;  %2381 = vmatmul.bf16.vlgmr.msra.gmra.mxu3 %v9861_v56  ;;  %v8192_v56 = vld [vmem:[#allocation11 + $0xcc] sm:$0xf]  ;;  %v6587_v25 = vor.u32 %v8178_v54, %v6586_v1 }
 0x350   : > { %2324 = vmatmul.bf16.vlgmr.msrb.gmra.mxu0 %v9863_v36  ;;  %2362 = vmatmul.bf16.vlgmr.msra.gmra.mxu2 %v9863_v36  ;;  %v6618_v36 = vld [vmem:[#allocation11 + $0x88] sm:$0xf]  ;;  %v6655_v35 = vor.u32 %v8192_v56, %v6652_v0 }
 0x351   : > { %2788 = vmatpush.bf16.msrb.mxu0 %v6667_v5  ;;  %2807 = vmatpush.bf16.msra.mxu1 %v6795_v57  ;;  %v6619_v37 = vor.u32 %v8186_v31, %v6618_v36  ;;  %v8210_v5 = vld [vmem:[#allocation11 + $0x154] sm:$0xf0]  ;;  %v6751_v57 = vor.u32 %v8216_v26, %v6748_v18  ;;  %v1716_v31 = vpop.f32.mrf.mxu1 }
 0x352   : > { %2826 = vmatpush.bf16.msra.mxu2 %v6671_v15  ;;  %2845 = vmatpush.bf16.msra.mxu3 %v6799_v14  ;;  %v6715_v15 = vor.u32 %v8210_v5, %v6714_v29  ;;  %v6591_v14 = vor.u32 %v8176_v53, %v6588_v17  ;;  %v8170_v36 = vld [vmem:[#allocation11 + $0x14] sm:$0xf0]  ;;  %v1725_v30 = vpack.c.bf16 %v1716_v31, %v9889_v28 }
 0x353   : > { %v6555_v55 = vor.u32 %v8170_v36, %v6554_v3  ;;  %v8298_v28 = vld [vmem:[#allocation10 + $0x28] sm:$0xff] }
 0x355   : > { %2789 = vmatpush.bf16.msrb.mxu0 %v6651_v61  ;;  %2808 = vmatpush.bf16.msra.mxu1 %v6779_v22  ;;  %v8174_v61 = vld [vmem:[#allocation11 + $0x34] sm:$0xf0]  ;;  %v6698_v22 = vld [vmem:[#allocation11 + $0x128] sm:$0xf] }
 0x356   : > { %2827 = vmatpush.bf16.msra.mxu2 %v6655_v35  ;;  %2846 = vmatpush.bf16.msra.mxu3 %v6783_v50  ;;  %v6571_v56 = vor.u32 %v8174_v61, %v6570_v43  ;;  %v6699_v0 = vor.u32 %v8206_v23, %v6698_v22  ;;  %v6682_v35 = vld [vmem:[#allocation11 + $0x108] sm:$0xf]  ;;  %v8204_v50 = vld [vmem:[#allocation11 + $0x12c] sm:$0xf] }
 0x357   : > { %v6683_v40 = vor.u32 %v8202_v46, %v6682_v35 }
 0x359   : > { %2790 = vmatpush.bf16.msrb.mxu0 %v6635_v32  ;;  %2809 = vmatpush.bf16.msra.mxu1 %v6763_v9  ;;  %v6719_v32 = vor.u32 %v8208_v59, %v6716_v7  ;;  %v1719_v2 = vpop.f32.mrf.mxu1 }
 0x35a   : > { %2828 = vmatpush.bf16.msra.mxu2 %v6639_v60  ;;  %2847 = vmatpush.bf16.msra.mxu3 %v6767_v51  ;;  %v6703_v60 = vor.u32 %v8204_v50, %v6700_v19  ;;  %v8200_v51 = vld [vmem:[#allocation11 + $0x10c] sm:$0xf] }
 0x35d   : > { %2791 = vmatpush.bf16.msrb.mxu0 %v6619_v37  ;;  %2810 = vmatpush.bf16.msra.mxu1 %v6747_v42  ;;  %v1724_v37 = vpack.c.bf16 %v9875_v48, %v9869_v41  ;;  %v6687_v42 = vor.u32 %v8200_v51, %v6684_v52  ;;  %v1726_v41 = vpack.c.bf16 %v9887_v20, %v9881_v39  ;;  %v8361_v52 = vld [vmem:[#allocation11 + $0x5ec] sm:$0xf0] }
 0x35e   : > { %2829 = vmatpush.bf16.msra.mxu2 %v6623_v12  ;;  %2848 = vmatpush.bf16.msra.mxu3 %v6751_v57 }
 0x35f   : > { %2348 = vmatmul.bf16.gmra.mxu1 %v9871_v38  ;;  %2386 = vmatmul.bf16.gmra.mxu3 %v9871_v38  ;;  %v6735_v38 = vor.u32 %v8212_v8, %v6732_v49 }
 0x360   : > { %2329 = vmatmul.bf16.gmra.mxu0 %v9873_v58  ;;  %2367 = vmatmul.bf16.gmra.mxu2 %v9873_v58  ;;  %v6572_v58 = vld [vmem:[#allocation11 + $0x38] sm:$0xf0] }
 0x361   : > { %2792 = vmatpush.bf16.msrb.mxu0 %v6603_v4  ;;  %2811 = vmatpush.bf16.msra.mxu1 %v6731_v63  ;;  %v6575_v9 = vor.u32 %v8172_v45, %v6572_v58  ;;  %v1721_v33 = vpop.f32.mrf.mxu1 }
 0x362   : > { %2830 = vmatpush.bf16.msra.mxu2 %v6607_v62  ;;  %2849 = vmatpush.bf16.msra.mxu3 %v6735_v38  ;;  %v1727_v11 = vpack.c.bf16 %v1721_v33, %v1719_v2  ;;  %v8359_v33 = vld [vmem:[#allocation11 + $0x5e4] sm:$0xf] }
 0x365   : > { %2793 = vmatpush.bf16.msrb.mxu0 %v6587_v25  ;;  %2812 = vmatpush.bf16.msra.mxu1 %v6715_v15 }
 0x366   : > { %2831 = vmatpush.bf16.msra.mxu2 %v6591_v14  ;;  %2850 = vmatpush.bf16.msra.mxu3 %v6719_v32 }
 0x369   : > { %2794 = vmatpush.bf16.msrb.mxu0 %v6571_v56  ;;  %2813 = vmatpush.bf16.msra.mxu1 %v6699_v0 }
 0x36a   : > { %2832 = vmatpush.bf16.msra.mxu2 %v6575_v9  ;;  %2851 = vmatpush.bf16.msra.mxu3 %v6703_v60  ;;  %v8329_v60 = vld [vmem:[#allocation11 + $0x4ec] sm:$0xf0] }
 0x36d   : > { %2795 = vmatpush.bf16.msrb.mxu0 %v6555_v55  ;;  %2814 = vmatpush.bf16.msra.mxu1 %v6683_v40  ;;  %v6926_v40 = vld [vmem:[#allocation11 + $0x4e0] sm:$0xf] }
 0x36e   : > { %2833 = vmatpush.bf16.msra.mxu2 %v6559_v21  ;;  %2852 = vmatpush.bf16.msra.mxu3 %v6687_v42  ;;  %v7054_v21 = vld [vmem:[#allocation11 + $0x5e0] sm:$0xf]  ;;  %v6927_v51 = vor.u32 %v8329_v60, %v6926_v40  ;;  %v8351_v60 = vld [vmem:[#allocation11 + $0x5a4] sm:$0xf] }
 0x36f   : > { %2739 = vmatmul.bf16.vlgmr.msrb.gmra.mxu1 %v1725_v30  ;;  %2777 = vmatmul.bf16.vlgmr.msrb.gmra.mxu3 %v1725_v30  ;;  %v7055_v42 = vor.u32 %v8361_v52, %v7054_v21  ;;  %v7024_v21 = vld [vmem:[#allocation11 + $0x5b0] sm:$0xf0] }
 0x370   : > { %2720 = vmatmul.bf16.vlgmr.msra.gmra.mxu0 %v1724_v37  ;;  %2758 = vmatmul.bf16.vlgmr.msrb.gmra.mxu2 %v1724_v37 }
 0x371   : > { %2891 = vmatpush.bf16.msra.mxu0 %v9835_v6  ;;  %2910 = vmatpush.bf16.msrb.mxu1 %v9833_v47 }
 0x372   : > { %3312 = vmatpush.bf16.msrb.mxu2 %v6927_v51  ;;  %3331 = vmatpush.bf16.msrb.mxu3 %v7055_v42  ;;  %v7006_v42 = vld [vmem:[#allocation11 + $0x580] sm:$0xf] }
 0x375   : > { %2892 = vmatpush.bf16.msra.mxu0 %v9815_v27  ;;  %2911 = vmatpush.bf16.msrb.mxu1 %v9809_v13  ;;  %v8297_v27 = vld [vmem:[#allocation10 + $0x20] sm:$0xff] }
 0x37f   : > { %2744 = vmatmul.bf16.gmra.mxu1 %v1727_v11  ;;  %2782 = vmatmul.bf16.gmra.mxu3 %v1727_v11 }
 0x380   : > { %2725 = vmatmul.bf16.gmra.mxu0 %v1726_v41  ;;  %2763 = vmatmul.bf16.gmra.mxu2 %v1726_v41 }
 0x38f   : > { %2815 = vmatmul.bf16.vlgmr.msra.gmra.mxu1 %v1725_v30  ;;  %2853 = vmatmul.bf16.vlgmr.msra.gmra.mxu3 %v1725_v30  ;;  %v8327_v30 = vld [vmem:[#allocation11 + $0x4e4] sm:$0xf] }
 0x390   : > { %2796 = vmatmul.bf16.vlgmr.msrb.gmra.mxu0 %v1724_v37  ;;  %2834 = vmatmul.bf16.vlgmr.msra.gmra.mxu2 %v1724_v37  ;;  %v6928_v37 = vld [vmem:[#allocation11 + $0x4f0] sm:$0xf0] }
 0x391   : > { %v6931_v2 = vor.u32 %v8327_v30, %v6928_v37  ;;  %v6878_v30 = vld [vmem:[#allocation11 + $0x480] sm:$0xf]  ;;  %v8317_v37 = vld [vmem:[#allocation11 + $0x48c] sm:$0xf0] }
 0x393   : > { %3350 = vmatpush.bf16.msrb.mxu0 %v6931_v2 }
 0x39f   : > { %2820 = vmatmul.bf16.gmra.mxu1 %v1727_v11  ;;  %2858 = vmatmul.bf16.gmra.mxu3 %v1727_v11  ;;  %v7056_v11 = vld [vmem:[#allocation11 + $0x5f0] sm:$0xf0] }
 0x3a0   : > { %2801 = vmatmul.bf16.gmra.mxu0 %v1726_v41  ;;  %2839 = vmatmul.bf16.gmra.mxu2 %v1726_v41 }
 0x3ac   : > { %v2268_v47 = vpop.f32.mrf.mxu1 }
 0x3ad   : > { %v2249_v13 = vpop.f32.mrf.mxu0 }
 0x3ae   : > { %v2269_v6 = vadd.f32 %v2268_v47, %v2249_v13  ;;  %v6910_v13 = vld [vmem:[#allocation11 + $0x4c0] sm:$0xf] }
 0x3af   : > { %6810 = vmatmul.msk.bf16.vlgmr.msrb.gmra.mxu1 %vm1679_vm2, %v8297_v27 }
 0x3b0   : > { %6808 = vmatmul.msk.bf16.vlgmr.msra.gmra.mxu0 %vm1679_vm2, %v8297_v27  ;;  %v7059_v27 = vor.u32 %v8359_v33, %v7056_v11  ;;  %v6879_v11 = vor.u32 %v8317_v37, %v6878_v30  ;;  %v6848_v30 = vld [vmem:[#allocation11 + $0x450] sm:$0xf0] }
 0x3b2   : > { %v2306_v48 = vpop.f32.mrf.mxu3  ;;  %3369 = vmatpush.bf16.msra.mxu1 %v7059_v27  ;;  %v8349_v27 = vld [vmem:[#allocation11 + $0x58c] sm:$0xf0] }
 0x3b3   : > { %v2287_v39 = vpop.f32.mrf.mxu2 }
 0x3b4   : > { %v2307_v20 = vadd.f32 %v2306_v48, %v2287_v39  ;;  %v9906_v10 = vpop.f32.mrf.mxu1  ;;  %v7038_v48 = vld [vmem:[#allocation11 + $0x5c0] sm:$0xf] }
 0x3b5   : > { %v9908_v12 = vpop.f32.mrf.mxu0 }
 0x3ba   : > { %v9910_v26 = vpop.f32.mrf.mxu3 }
 0x3bb   : > { %v9912_v18 = vpop.f32.mrf.mxu2 }
 0x3bc   : > { %v2273_v4 = vpop.f32.mrf.mxu1 }
 0x3bd   : > { %v2254_v63 = vpop.f32.mrf.mxu0 }
 0x3be   : > { %v9914_v1 = vadd.f32 %v2273_v4, %v2254_v63  ;;  %v8323_v4 = vld [vmem:[#allocation11 + $0x4c4] sm:$0xf]  ;;  %v6912_v63 = vld [vmem:[#allocation11 + $0x4d0] sm:$0xf0] }
 0x3bf   : > { %6811 = vmatmul.msk.bf16.gmra.mxu1 %vm1679_vm2, %v8298_v28 }
 0x3c0   : > { %6809 = vmatmul.msk.bf16.gmra.mxu0 %vm1679_vm2, %v8298_v28  ;;  %v8357_v28 = vld [vmem:[#allocation11 + $0x5cc] sm:$0xf0] }
 0x3c2   : > { %v2311_v54 = vpop.f32.mrf.mxu3 }
 0x3c3   : > { %v2292_v29 = vpop.f32.mrf.mxu2 }
 0x3c4   : > { %v9918_v5 = vadd.f32 %v2311_v54, %v2292_v29  ;;  %v9920_v57 = vpop.f32.mrf.mxu1  ;;  %v7039_v29 = vor.u32 %v8357_v28, %v7038_v48  ;;  %v8347_v28 = vld [vmem:[#allocation11 + $0x584] sm:$0xf] }
 0x3c5   : > { %v9922_v44 = vpop.f32.mrf.mxu0 }
 0x3c6   : > { %3332 = vmatpush.bf16.msrb.mxu3 %v7039_v29  ;;  %v8313_v29 = vld [vmem:[#allocation11 + $0x46c] sm:$0xf0] }
 0x3ca   : > { %v9924_v34 = vpop.f32.mrf.mxu3 }
 0x3cb   : > { %v9926_v8 = vpop.f32.mrf.mxu2 }
 0x3cc   : > { %v2344_v62 = vpop.f32.mrf.mxu1 }
 0x3cd   : > { %v2325_v49 = vpop.f32.mrf.mxu0 }
 0x3ce   : > { %v9928_v53 = vadd.f32 %v2344_v62, %v2325_v49  ;;  %v6915_v62 = vor.u32 %v8323_v4, %v6912_v63  ;;  %v8355_v49 = vld [vmem:[#allocation11 + $0x5c4] sm:$0xf]  ;;  %v7008_v4 = vld [vmem:[#allocation11 + $0x590] sm:$0xf0] }
 0x3d0   : > { %3351 = vmatpush.bf16.msrb.mxu0 %v6915_v62  ;;  %v6990_v62 = vld [vmem:[#allocation11 + $0x560] sm:$0xf] }
 0x3d2   : > { %v2382_v17 = vpop.f32.mrf.mxu3 }
 0x3d3   : > { %v2363_v25 = vpop.f32.mrf.mxu2 }
 0x3d4   : > { %v9930_v15 = vadd.f32 %v2382_v17, %v2363_v25  ;;  %v9932_v43 = vpop.f32.mrf.mxu1  ;;  %v7040_v17 = vld [vmem:[#allocation11 + $0x5d0] sm:$0xf0] }
 0x3d5   : > { %v9934_v61 = vpop.f32.mrf.mxu0 }
 0x3da   : > { %v9936_v22 = vpop.f32.mrf.mxu3 }
 0x3db   : > { %v9938_v23 = vpop.f32.mrf.mxu2 }
 0x3dc   : > { %v2349_v38 = vpop.f32.mrf.mxu1 }
 0x3dd   : > { %v2330_v14 = vpop.f32.mrf.mxu0 }
 0x3de   : > { %v9940_v59 = vadd.f32 %v2349_v38, %v2330_v14  ;;  %v7043_v38 = vor.u32 %v8355_v49, %v7040_v17  ;;  %v6894_v14 = vld [vmem:[#allocation11 + $0x4a0] sm:$0xf]  ;;  %v8345_v17 = vld [vmem:[#allocation11 + $0x56c] sm:$0xf0] }
 0x3e0   : > { %3370 = vmatpush.bf16.msra.mxu1 %v7043_v38  ;;  %v6864_v38 = vld [vmem:[#allocation11 + $0x470] sm:$0xf0] }
 0x3e2   : > { %v2387_v7 = vpop.f32.mrf.mxu3 }
 0x3e3   : > { %v2368_v45 = vpop.f32.mrf.mxu2 }
 0x3e4   : > { %v9942_v58 = vadd.f32 %v2387_v7, %v2368_v45  ;;  %v9944_v56 = vpop.f32.mrf.mxu1  ;;  %v8321_v7 = vld [vmem:[#allocation11 + $0x4ac] sm:$0xf0]  ;;  %v7022_v45 = vld [vmem:[#allocation11 + $0x5a0] sm:$0xf] }
 0x3e5   : > { %v9946_v0 = vpop.f32.mrf.mxu0 }
 0x3ea   : > { %v9948_v3 = vpop.f32.mrf.mxu3 }
 0x3eb   : > { %v9950_v36 = vpop.f32.mrf.mxu2 }
 0x3ec   : > { %v2740_v31 = vpop.f32.mrf.mxu1 }
 0x3ed   : > { %v2721_v35 = vpop.f32.mrf.mxu0 }
 0x3ee   : > { %v2722_v46 = vadd.f32 %v2721_v35, %v2269_v6  ;;  %v8325_v6 = vld [vmem:[#allocation11 + $0x4cc] sm:$0xf0]  ;;  %v6895_v35 = vor.u32 %v8321_v7, %v6894_v14  ;;  %v6991_v14 = vor.u32 %v8345_v17, %v6990_v62 }
 0x3f0   : > { %v9952_v32 = vadd.f32 %v2740_v31, %v2722_v46  ;;  %v8353_v46 = vld [vmem:[#allocation11 + $0x5ac] sm:$0xf0] }
 0x3f2   : > { %v2778_v9 = vpop.f32.mrf.mxu3 }
 0x3f3   : > { %v2759_v50 = vpop.f32.mrf.mxu2 }
 0x3f4   : > { %v2760_v19 = vadd.f32 %v2759_v50, %v2307_v20  ;;  %v9954_v24 = vpop.f32.mrf.mxu1  ;;  %v6911_v20 = vor.u32 %v8325_v6, %v6910_v13  ;;  %v6896_v50 = vld [vmem:[#allocation11 + $0x4b0] sm:$0xf0]  ;;  %v8315_v13 = vld [vmem:[#allocation11 + $0x484] sm:$0xf] }
 0x3f5   : > { %v9956_v16 = vpop.f32.mrf.mxu0  ;;  %v6880_v6 = vld [vmem:[#allocation11 + $0x490] sm:$0xf0] }
 0x3f6   : > { %v9958_v55 = vadd.f32 %v2778_v9, %v2760_v19  ;;  %3313 = vmatpush.bf16.msrb.mxu2 %v6911_v20  ;;  %v8319_v9 = vld [vmem:[#allocation11 + $0x4a4] sm:$0xf]  ;;  %v7023_v19 = vor.u32 %v8353_v46, %v7022_v45  ;;  %v6883_v20 = vor.u32 %v8315_v13, %v6880_v6 }
 0x3f7   : > { %v6899_v40 = vor.u32 %v8319_v9, %v6896_v50  ;;  %v8343_v45 = vld [vmem:[#allocation11 + $0x564] sm:$0xf] }
 0x3f8   : > { %3333 = vmatpush.bf16.msrb.mxu3 %v7023_v19  ;;  %v6846_v19 = vld [vmem:[#allocation11 + $0x440] sm:$0xf] }
 0x3f9   : > { %3352 = vmatpush.bf16.msrb.mxu0 %v6899_v40  ;;  %v8309_v40 = vld [vmem:[#allocation11 + $0x44c] sm:$0xf0] }
 0x3fa   : > { %v9960_v41 = vpop.f32.mrf.mxu3  ;;  %3314 = vmatpush.bf16.msrb.mxu2 %v6895_v35  ;;  %v6992_v35 = vld [vmem:[#allocation11 + $0x570] sm:$0xf0] }
 0x3fb   : > { %v9962_v47 = vpop.f32.mrf.mxu2  ;;  %v6995_v9 = vor.u32 %v8343_v45, %v6992_v35  ;;  %v6814_v45 = vld [vmem:[#allocation11 + $0x400] sm:$0xf]  ;;  %v8301_v35 = vld [vmem:[#allocation11 + $0x40c] sm:$0xf0] }
 0x3fc   : > { %v2745_v39 = vpop.f32.mrf.mxu1 }
 0x3fd   : > { %v2726_v54 = vpop.f32.mrf.mxu0  ;;  %3353 = vmatpush.bf16.msrb.mxu0 %v6883_v20  ;;  %v8305_v20 = vld [vmem:[#allocation11 + $0x42c] sm:$0xf0] }
 0x3fe   : > { %v2727_v25 = vadd.f32 %v2726_v54, %v9914_v1  ;;  %v7027_v1 = vor.u32 %v8351_v60, %v7024_v21  ;;  %3315 = vmatpush.bf16.msrb.mxu2 %v6879_v11  ;;  %v7011_v54 = vor.u32 %v8347_v28, %v7008_v4  ;;  %v6974_v60 = vld [vmem:[#allocation11 + $0x540] sm:$0xf]  ;;  %v8339_v11 = vld [vmem:[#allocation11 + $0x544] sm:$0xf] }
 0x3ff   : > { %v6958_v28 = vld [vmem:[#allocation11 + $0x520] sm:$0xf] }
 0x400   : > { %v9965_v31 = vadd.f32 %v2745_v39, %v2727_v25  ;;  %3371 = vmatpush.bf16.msra.mxu1 %v7027_v1  ;;  %v7007_v39 = vor.u32 %v8349_v27, %v7006_v42  ;;  %v8311_v25 = vld [vmem:[#allocation11 + $0x464] sm:$0xf]  ;;  %v8341_v1 = vld [vmem:[#allocation11 + $0x54c] sm:$0xf0]  ;;  %v6976_v27 = vld [vmem:[#allocation11 + $0x550] sm:$0xf0] }
 0x401   : > { %v6867_v7 = vor.u32 %v8311_v25, %v6864_v38  ;;  %v6975_v42 = vor.u32 %v8341_v1, %v6974_v60  ;;  %v6979_v6 = vor.u32 %v8339_v11, %v6976_v27  ;;  %v8335_v25 = vld [vmem:[#allocation11 + $0x524] sm:$0xf]  ;;  %v6960_v38 = vld [vmem:[#allocation11 + $0x530] sm:$0xf0]  ;;  %v6815_v60 = vor.u32 %v8301_v35, %v6814_v45 }
 0x402   : > { %v2783_v51 = vpop.f32.mrf.mxu3  ;;  %3334 = vmatpush.bf16.msrb.mxu3 %v7007_v39  ;;  %v6830_v39 = vld [vmem:[#allocation11 + $0x420] sm:$0xf]  ;;  %v6816_v1 = vld [vmem:[#allocation11 + $0x410] sm:$0xf0] }
 0x403   : > { %v2764_v52 = vpop.f32.mrf.mxu2  ;;  %3354 = vmatpush.bf16.msrb.mxu0 %v6867_v7  ;;  %v6831_v4 = vor.u32 %v8305_v20, %v6830_v39  ;;  %v8362_v20 = vld [vmem:[#allocation11 + $0x5f4] sm:$0xf0] }
 0x404   : > { %v2765_v2 = vadd.f32 %v2764_v52, %v9918_v5  ;;  %v9968_v33 = vpop.f32.mrf.mxu1  ;;  %v6862_v5 = vld [vmem:[#allocation11 + $0x460] sm:$0xf]  ;;  %3372 = vmatpush.bf16.msra.mxu1 %v7011_v54  ;;  %v8307_v52 = vld [vmem:[#allocation11 + $0x444] sm:$0xf]  ;;  %v8337_v54 = vld [vmem:[#allocation11 + $0x52c] sm:$0xf0] }
 0x405   : > { %10293 = vst [vmem:[#allocation32_spill] sm:$0xff] %v9968_v33  ;;  %v9970_v48 = vpop.f32.mrf.mxu0  ;;  %v6863_v49 = vor.u32 %v8313_v29, %v6862_v5  ;;  %v8303_v5 = vld [vmem:[#allocation11 + $0x424] sm:$0xf]  ;;  %v6832_v29 = vld [vmem:[#allocation11 + $0x430] sm:$0xf0] }
 0x406   : > { %v9972_v63 = vadd.f32 %v2783_v51, %v2765_v2  ;;  %3335 = vmatpush.bf16.msrb.mxu3 %v6991_v14  ;;  %v6847_v51 = vor.u32 %v8309_v40, %v6846_v19  ;;  %v6851_v2 = vor.u32 %v8307_v52, %v6848_v30  ;;  %v6835_v17 = vor.u32 %v8303_v5, %v6832_v29  ;;  %v8360_v29 = vld [vmem:[#allocation11 + $0x5ec] sm:$0xf] }
 0x407   : > { %3316 = vmatpush.bf16.msrb.mxu2 %v6863_v49  ;;  %v6959_v49 = vor.u32 %v8337_v54, %v6958_v28  ;;  %v6963_v14 = vor.u32 %v8335_v25, %v6960_v38  ;;  %v8328_v28 = vld [vmem:[#allocation11 + $0x4ec] sm:$0xf] }
 0x408   : > { %3373 = vmatpush.bf16.msra.mxu1 %v6995_v9  ;;  %3355 = vmatpush.bf16.msrb.mxu0 %v6851_v2  ;;  %v6942_v9 = vld [vmem:[#allocation11 + $0x500] sm:$0xf]  ;;  %v6944_v2 = vld [vmem:[#allocation11 + $0x510] sm:$0xf0] }
 0x40a   : > { %v9974_v46 = vpop.f32.mrf.mxu3  ;;  %3336 = vmatpush.bf16.msrb.mxu3 %v6975_v42  ;;  %v8331_v42 = vld [vmem:[#allocation11 + $0x504] sm:$0xf] }
 0x40b   : > { %v9976_v50 = vpop.f32.mrf.mxu2  ;;  %3317 = vmatpush.bf16.msrb.mxu2 %v6847_v51  ;;  %v8299_v51 = vld [vmem:[#allocation11 + $0x404] sm:$0xf]  ;;  %v6947_v27 = vor.u32 %v8331_v42, %v6944_v2  ;;  %v6902_v42 = vld [vmem:[#allocation11 + $0x4a8] sm:$0xf] }
 0x40c   : > { %v2816_v21 = vpop.f32.mrf.mxu1  ;;  %3374 = vmatpush.bf16.msra.mxu1 %v6979_v6  ;;  %3356 = vmatpush.bf16.msrb.mxu0 %v6835_v17  ;;  %v7062_v6 = vld [vmem:[#allocation11 + $0x5e8] sm:$0xf] }
 0x40d   : > { %v2797_v37 = vpop.f32.mrf.mxu0  ;;  %v7063_v54 = vor.u32 %v8362_v20, %v7062_v6  ;;  %v8354_v6 = vld [vmem:[#allocation11 + $0x5b4] sm:$0xf0] }
 0x40e   : > { %v2798_v13 = vadd.f32 %v2797_v37, %v9928_v53  ;;  %3337 = vmatpush.bf16.msrb.mxu3 %v6959_v49  ;;  %v6819_v37 = vor.u32 %v8299_v51, %v6816_v1  ;;  %v7064_v49 = vld [vmem:[#allocation11 + $0x5f8] sm:$0xf0] }
 0x40f   : > { %3318 = vmatpush.bf16.msrb.mxu2 %v6831_v4  ;;  %v6936_v4 = vld [vmem:[#allocation11 + $0x4f8] sm:$0xf0]  ;;  %v7067_v17 = vor.u32 %v8360_v29, %v7064_v49 }
 0x410   : > { %v9979_v62 = vadd.f32 %v2816_v21, %v2798_v13  ;;  %3375 = vmatpush.bf16.msra.mxu1 %v6963_v14  ;;  %v8333_v21 = vld [vmem:[#allocation11 + $0x50c] sm:$0xf0]  ;;  %3357 = vmatpush.bf16.msrb.mxu0 %v6819_v37  ;;  %v8330_v13 = vld [vmem:[#allocation11 + $0x4f4] sm:$0xf0]  ;;  %v6939_v5 = vor.u32 %v8328_v28, %v6936_v4  ;;  %v6918_v14 = vld [vmem:[#allocation11 + $0x4c8] sm:$0xf] }
 0x411   : > { %v6943_v30 = vor.u32 %v8333_v21, %v6942_v9  ;;  %v8358_v9 = vld [vmem:[#allocation11 + $0x5d4] sm:$0xf0]  ;;  %v7048_v37 = vld [vmem:[#allocation11 + $0x5d8] sm:$0xf0]  ;;  %v8320_v28 = vld [vmem:[#allocation11 + $0x4ac] sm:$0xf] }
 0x412   : > { %v2854_v53 = vpop.f32.mrf.mxu3  ;;  %v6904_v4 = vld [vmem:[#allocation11 + $0x4b8] sm:$0xf0] }
 0x413   : > { %v2835_v7 = vpop.f32.mrf.mxu2  ;;  %3319 = vmatpush.bf16.msrb.mxu2 %v6815_v60  ;;  %3338 = vmatpush.bf16.msrb.mxu3 %v6943_v30  ;;  %v6920_v60 = vld [vmem:[#allocation11 + $0x4d8] sm:$0xf0]  ;;  %v8356_v30 = vld [vmem:[#allocation11 + $0x5cc] sm:$0xf]  ;;  %v6907_v29 = vor.u32 %v8320_v28, %v6904_v4 }
 0x414   : > { %v2836_v19 = vadd.f32 %v2835_v7, %v9930_v15  ;;  %v9982_v40 = vpop.f32.mrf.mxu1  ;;  %v6934_v15 = vld [vmem:[#allocation11 + $0x4e8] sm:$0xf]  ;;  %3376 = vmatpush.bf16.msra.mxu1 %v6947_v27  ;;  %3426 = vmatpush.bf16.msra.mxu0 %v6939_v5  ;;  %v7051_v27 = vor.u32 %v8356_v30, %v7048_v37  ;;  %v7032_v49 = vld [vmem:[#allocation11 + $0x5b8] sm:$0xf0]  ;;  %v8312_v28 = vld [vmem:[#allocation11 + $0x46c] sm:$0xf] }
 0x415   : > { %v9984_v52 = vpop.f32.mrf.mxu0  ;;  %v6935_v39 = vor.u32 %v8330_v13, %v6934_v15  ;;  %v7046_v7 = vld [vmem:[#allocation11 + $0x5c8] sm:$0xf]  ;;  %v8322_v15 = vld [vmem:[#allocation11 + $0x4b4] sm:$0xf0]  ;;  %v6872_v4 = vld [vmem:[#allocation11 + $0x478] sm:$0xf0] }
 0x416   : > { %v9986_v11 = vadd.f32 %v2854_v53, %v2836_v19  ;;  %v8326_v53 = vld [vmem:[#allocation11 + $0x4d4] sm:$0xf0]  ;;  %v8324_v19 = vld [vmem:[#allocation11 + $0x4cc] sm:$0xf]  ;;  %v7047_v51 = vor.u32 %v8358_v9, %v7046_v7  ;;  %v7030_v13 = vld [vmem:[#allocation11 + $0x5a8] sm:$0xf] }
 0x417   : > { %3388 = vmatpush.bf16.msra.mxu2 %v6935_v39  ;;  %3407 = vmatpush.bf16.msra.mxu3 %v7063_v54  ;;  %v6919_v35 = vor.u32 %v8326_v53, %v6918_v14  ;;  %v6923_v1 = vor.u32 %v8324_v19, %v6920_v60  ;;  %v6903_v39 = vor.u32 %v8322_v15, %v6902_v42  ;;  %v8352_v54 = vld [vmem:[#allocation11 + $0x5ac] sm:$0xf]  ;;  %v6886_v14 = vld [vmem:[#allocation11 + $0x488] sm:$0xf]  ;;  %v8318_v53 = vld [vmem:[#allocation11 + $0x494] sm:$0xf0] }
 0x418   : > { %3445 = vmatpush.bf16.msrb.mxu1 %v7067_v17  ;;  %v7031_v20 = vor.u32 %v8354_v6, %v7030_v13  ;;  %v7035_v17 = vor.u32 %v8352_v54, %v7032_v49  ;;  %v7014_v7 = vld [vmem:[#allocation11 + $0x588] sm:$0xf]  ;;  %v6887_v19 = vor.u32 %v8318_v53, %v6886_v14  ;;  %v8350_v60 = vld [vmem:[#allocation11 + $0x594] sm:$0xf0]  ;;  %v8348_v42 = vld [vmem:[#allocation11 + $0x58c] sm:$0xf] }
 0x419   : > { %3427 = vmatpush.bf16.msra.mxu0 %v6923_v1  ;;  %v7015_v30 = vor.u32 %v8350_v60, %v7014_v7  ;;  %v8314_v13 = vld [vmem:[#allocation11 + $0x474] sm:$0xf0]  ;;  %v6998_v6 = vld [vmem:[#allocation11 + $0x568] sm:$0xf]  ;;  %v8344_v49 = vld [vmem:[#allocation11 + $0x56c] sm:$0xf] }
 0x41a   : > { %v9990_v38 = vpop.f32.mrf.mxu3  ;;  %v8310_v53 = vld [vmem:[#allocation11 + $0x454] sm:$0xf0]  ;;  %v6982_v7 = vld [vmem:[#allocation11 + $0x548] sm:$0xf] }
 0x41b   : > { %v9988_v25 = vpop.f32.mrf.mxu2  ;;  %3389 = vmatpush.bf16.msra.mxu2 %v6919_v35  ;;  %3408 = vmatpush.bf16.msra.mxu3 %v7047_v51 }
 0x41c   : > { %v2821_v45 = vpop.f32.mrf.mxu1  ;;  %3446 = vmatpush.bf16.msrb.mxu1 %v7051_v27 }
 0x41d   : > { %v2802_v21 = vpop.f32.mrf.mxu0  ;;  %3428 = vmatpush.bf16.msra.mxu0 %v6907_v29  ;;  %v6875_v29 = vor.u32 %v8312_v28, %v6872_v4  ;;  %v6840_v4 = vld [vmem:[#allocation11 + $0x438] sm:$0xf0] }
 0x41e   : > { %v2803_v2 = vadd.f32 %v2802_v21, %v9940_v59  ;;  %v6888_v21 = vld [vmem:[#allocation11 + $0x498] sm:$0xf0] }
 0x41f   : > { %3390 = vmatpush.bf16.msra.mxu2 %v6903_v39  ;;  %3409 = vmatpush.bf16.msra.mxu3 %v7031_v20  ;;  %v8346_v20 = vld [vmem:[#allocation11 + $0x574] sm:$0xf0] }
 0x420   : > { %v9993_v5 = vadd.f32 %v2821_v45, %v2803_v2  ;;  %3447 = vmatpush.bf16.msrb.mxu1 %v7035_v17  ;;  %v8316_v45 = vld [vmem:[#allocation11 + $0x48c] sm:$0xf]  ;;  %v7016_v2 = vld [vmem:[#allocation11 + $0x598] sm:$0xf0]  ;;  %v6999_v54 = vor.u32 %v8346_v20, %v6998_v6  ;;  %v6966_v6 = vld [vmem:[#allocation11 + $0x528] sm:$0xf] }
 0x421   : > { %v6891_v37 = vor.u32 %v8316_v45, %v6888_v21  ;;  %v7019_v15 = vor.u32 %v8348_v42, %v7016_v2  ;;  %v7000_v17 = vld [vmem:[#allocation11 + $0x578] sm:$0xf0]  ;;  %v8308_v45 = vld [vmem:[#allocation11 + $0x44c] sm:$0xf]  ;;  %v6838_v2 = vld [vmem:[#allocation11 + $0x428] sm:$0xf] }
 0x422   : > { %10294 = vst [vmem:[#allocation37_spill] sm:$0xff] %v9993_v5  ;;  %v2859_v51 = vpop.f32.mrf.mxu3  ;;  %v7003_v14 = vor.u32 %v8344_v49, %v7000_v17  ;;  %v6856_v21 = vld [vmem:[#allocation11 + $0x458] sm:$0xf0]  ;;  %v8304_v20 = vld [vmem:[#allocation11 + $0x42c] sm:$0xf] }
 0x423   : > { %v2840_v59 = vpop.f32.mrf.mxu2  ;;  %3391 = vmatpush.bf16.msra.mxu2 %v6887_v19  ;;  %3410 = vmatpush.bf16.msra.mxu3 %v7015_v30  ;;  %v6984_v42 = vld [vmem:[#allocation11 + $0x558] sm:$0xf0]  ;;  %v6843_v17 = vor.u32 %v8304_v20, %v6840_v4 }
 0x424   : > { %v2841_v35 = vadd.f32 %v2840_v59, %v9942_v58  ;;  %v9996_v9 = vpop.f32.mrf.mxu1  ;;  %3429 = vmatpush.bf16.msra.mxu0 %v6891_v37  ;;  %v6870_v58 = vld [vmem:[#allocation11 + $0x468] sm:$0xf]  ;;  %3448 = vmatpush.bf16.msrb.mxu1 %v7019_v15  ;;  %v6859_v37 = vor.u32 %v8308_v45, %v6856_v21  ;;  %v8306_v15 = vld [vmem:[#allocation11 + $0x434] sm:$0xf0]  ;;  %v8300_v21 = vld [vmem:[#allocation11 + $0x40c] sm:$0xf] }
 0x425   : > { %10295 = vst [vmem:[#allocation33_spill] sm:$0xff] %v9996_v9  ;;  %v9998_v1 = vpop.f32.mrf.mxu0  ;;  %v6871_v39 = vor.u32 %v8314_v13, %v6870_v58  ;;  %v6854_v59 = vld [vmem:[#allocation11 + $0x448] sm:$0xf]  ;;  %v6839_v28 = vor.u32 %v8306_v15, %v6838_v2  ;;  %v8334_v45 = vld [vmem:[#allocation11 + $0x514] sm:$0xf0] }
 0x426   : > { %10296 = vst [vmem:[#allocation35_spill] sm:$0xff] %v9998_v1  ;;  %v10000_v27 = vadd.f32 %v2859_v51, %v2841_v35  ;;  %v8342_v35 = vld [vmem:[#allocation11 + $0x554] sm:$0xf0]  ;;  %v6855_v19 = vor.u32 %v8310_v53, %v6854_v59  ;;  %v8340_v51 = vld [vmem:[#allocation11 + $0x54c] sm:$0xf] }
 0x427   : > { %3392 = vmatpush.bf16.msra.mxu2 %v6871_v39  ;;  %3411 = vmatpush.bf16.msra.mxu3 %v6999_v54  ;;  %v6983_v60 = vor.u32 %v8342_v35, %v6982_v7  ;;  %v6987_v13 = vor.u32 %v8340_v51, %v6984_v42  ;;  %v8338_v39 = vld [vmem:[#allocation11 + $0x534] sm:$0xf0]  ;;  %v8336_v54 = vld [vmem:[#allocation11 + $0x52c] sm:$0xf]  ;;  %v6822_v59 = vld [vmem:[#allocation11 + $0x408] sm:$0xf] }
 0x428   : > { %3430 = vmatpush.bf16.msra.mxu0 %v6875_v29  ;;  %3449 = vmatpush.bf16.msrb.mxu1 %v7003_v14  ;;  %v6968_v29 = vld [vmem:[#allocation11 + $0x538] sm:$0xf0]  ;;  %v6967_v49 = vor.u32 %v8338_v39, %v6966_v6  ;;  %v8302_v14 = vld [vmem:[#allocation11 + $0x414] sm:$0xf0]  ;;  %v6950_v7 = vld [vmem:[#allocation11 + $0x508] sm:$0xf] }
 0x429   : > { %v6971_v53 = vor.u32 %v8336_v54, %v6968_v29  ;;  %v6823_v35 = vor.u32 %v8302_v14, %v6822_v59  ;;  %v6824_v51 = vld [vmem:[#allocation11 + $0x418] sm:$0xf0]  ;;  %v6951_v15 = vor.u32 %v8334_v45, %v6950_v7 }
 0x42a   : > { %v6952_v42 = vld [vmem:[#allocation11 + $0x518] sm:$0xf0]  ;;  %v6827_v6 = vor.u32 %v8300_v21, %v6824_v51 }
 0x42b   : > { %3393 = vmatpush.bf16.msra.mxu2 %v6855_v19  ;;  %3412 = vmatpush.bf16.msra.mxu3 %v6983_v60  ;;  %v8332_v19 = vld [vmem:[#allocation11 + $0x50c] sm:$0xf] }
 0x42c   : > { %v2913_v30 = vpop.f32.mrf.mxu1  ;;  %3431 = vmatpush.bf16.msra.mxu0 %v6859_v37  ;;  %3450 = vmatpush.bf16.msrb.mxu1 %v6987_v13  ;;  %v6955_v13 = vor.u32 %v8332_v19, %v6952_v42 }
 0x42d   : > { %v2894_v58 = vpop.f32.mrf.mxu0 }
 0x42f   : > { %3394 = vmatpush.bf16.msra.mxu2 %v6839_v28  ;;  %3413 = vmatpush.bf16.msra.mxu3 %v6967_v49 }
 0x430   : > { %3432 = vmatpush.bf16.msra.mxu0 %v6843_v17  ;;  %3451 = vmatpush.bf16.msrb.mxu1 %v6971_v53 }
 0x433   : > { %3395 = vmatpush.bf16.msra.mxu2 %v6823_v35  ;;  %3414 = vmatpush.bf16.msra.mxu3 %v6951_v15 }
 0x434   : > { %v2915_v2 = vpop.f32.mrf.mxu1  ;;  %3433 = vmatpush.bf16.msra.mxu0 %v6827_v6  ;;  %3452 = vmatpush.bf16.msrb.mxu1 %v6955_v13  ;;  %v3480_v6 = vld [vmem:[%s10299_s24] sm:$0xf]  ;;  %s5802_s24 = sshll.u32 %s691_s1, 4  ;;  %s5803_s24 = int_to_ptr.vmem [resolvable:$true] %s5802_s24 }
 0x435   : > { %v2896_v60 = vpop.f32.mrf.mxu0  ;;  %v2924_v37 = vpack.c.bf16 %v2915_v2, %v2913_v30  ;;  %v10002_v30 = vpop.f32.mrf.mxu3  ;;  %v10020_v9 = vperm.slane %v3480_v6, 3  ;;  %v10025_v33 = vperm.slane %v3480_v6, 0 }
 0x436   : > { %v2923_v39 = vpack.c.bf16 %v2896_v60, %v2894_v58  ;;  %v10004_v58 = vpop.f32.mrf.mxu2 }
 0x437   : > { %3339 = vmatmul.bf16.vlgmr.msrb.gmra.mxu3 %v2924_v37  ;;  %3377 = vmatmul.bf16.vlgmr.msra.gmra.mxu1 %v2924_v37 }
 0x438   : > { %3320 = vmatmul.bf16.vlgmr.msrb.gmra.mxu2 %v2923_v39  ;;  %3358 = vmatmul.bf16.vlgmr.msrb.gmra.mxu0 %v2923_v39 }
 0x43c   : > { %v2918_v20 = vpop.f32.mrf.mxu1 }
 0x43d   : > { %v2899_v28 = vpop.f32.mrf.mxu0 }
 0x444   : > { %v2920_v4 = vpop.f32.mrf.mxu1 }
 0x445   : > { %v2901_v54 = vpop.f32.mrf.mxu0  ;;  %v2926_v29 = vpack.c.bf16 %v2920_v4, %v2918_v20 }
 0x446   : > { %v2925_v49 = vpack.c.bf16 %v2901_v54, %v2899_v28  ;;  %v10018_v28 = vperm.slane %v3480_v6, 1 }
 0x447   : > { %3344 = vmatmul.bf16.gmra.mxu3 %v2926_v29  ;;  %3382 = vmatmul.bf16.gmra.mxu1 %v2926_v29 }
 0x448   : > { %3325 = vmatmul.bf16.gmra.mxu2 %v2925_v49  ;;  %3363 = vmatmul.bf16.gmra.mxu0 %v2925_v49 }
 0x457   : > { %3415 = vmatmul.bf16.vlgmr.msra.gmra.mxu3 %v2924_v37  ;;  %3453 = vmatmul.bf16.vlgmr.msrb.gmra.mxu1 %v2924_v37 }
 0x458   : > { %3396 = vmatmul.bf16.vlgmr.msra.gmra.mxu2 %v2923_v39  ;;  %3434 = vmatmul.bf16.vlgmr.msra.gmra.mxu0 %v2923_v39 }
 0x467   : > { %3420 = vmatmul.bf16.gmra.mxu3 %v2926_v29  ;;  %3458 = vmatmul.bf16.gmra.mxu1 %v2926_v29 }
 0x468   : > { %3401 = vmatmul.bf16.gmra.mxu2 %v2925_v49  ;;  %3439 = vmatmul.bf16.gmra.mxu0 %v2925_v49 }
 0x4b4   : > { %v3378_v17 = vpop.f32.mrf.mxu1 }
 0x4b5   : > { %v3359_v59 = vpop.f32.mrf.mxu0 }
 0x4b6   : > { %v3379_v15 = vadd.f32 %v3378_v17, %v3359_v59 }
 0x4b8   : > { %v3465_v20 = vadd.f32 %v3379_v15, %v9958_v55 }
 0x4ba   : > { %v3340_v14 = vpop.f32.mrf.mxu3  ;;  %v3491_v17 = vadd.f32 %v10018_v28, %v3465_v20 }
 0x4bb   : > { %v3321_v53 = vpop.f32.mrf.mxu2 }
 0x4bc   : > { %v3380_v7 = vpop.f32.mrf.mxu1  ;;  %v3341_v29 = vadd.f32 %v3340_v14, %v3321_v53  ;;  %v3507_v15 = vmax.f32 %v3491_v17, 0.0 }
 0x4bd   : > { %v3361_v35 = vpop.f32.mrf.mxu0 }
 0x4be   : > { %v3464_v1 = vadd.f32 %v3341_v29, %v9952_v32  ;;  %v2385_v29 = vadd.f32 %v9936_v22, %v9938_v23  ;;  %v2347_v23 = vadd.f32 %v9932_v43, %v9934_v61  ;;  %v2276_v43 = vadd.f32 %v9920_v57, %v9922_v44 }
 0x4c2   : > { %v10006_v45 = vpop.f32.mrf.mxu3 }
 0x4c3   : > { %10297 = vst [vmem:[#allocation34_spill] sm:$0xff] %v10006_v45  ;;  %v10008_v21 = vpop.f32.mrf.mxu2 }
 0x4c4   : > { %10298 = vst [vmem:[#allocation36_spill] sm:$0xff] %v10008_v21  ;;  %v3383_v51 = vpop.f32.mrf.mxu1  ;;  %v10028_v21 = vperm.slane %v3480_v6, 2  ;;  %v2309_v6 = vadd.f32 %v9910_v26, %v9912_v18 }
 0x4c5   : > { %v3364_v19 = vpop.f32.mrf.mxu0 }
 0x4c6   : > { %v3384_v32 = vadd.f32 %v3383_v51, %v3364_v19  ;;  %v2762_v19 = vadd.f32 %v9962_v47, %v2309_v6 }
 0x4ca   : > { %v3345_v42 = vpop.f32.mrf.mxu3 }
 0x4cb   : > { %v3326_v2 = vpop.f32.mrf.mxu2 }
 0x4cc   : > { %v3385_v60 = vpop.f32.mrf.mxu1  ;;  %v3346_v18 = vadd.f32 %v3345_v42, %v3326_v2 }
 0x4cd   : > { %v3366_v37 = vpop.f32.mrf.mxu0 }
 0x4d2   : > { %v10013_v39 = vpop.f32.mrf.mxu3 }
 0x4d3   : > { %10300 = vst [vmem:[#allocation38_spill] sm:$0xff] %v10013_v39  ;;  %v10015_v13 = vpop.f32.mrf.mxu2 }
 0x4d4   : > { %10301 = vst [vmem:[#allocation39_spill] sm:$0xff] %v10015_v13  ;;  %v3454_v4 = vpop.f32.mrf.mxu1 }
 0x4d5   : > { %v3435_v54 = vpop.f32.mrf.mxu0 }
 0x4d6   : > { %v3455_v49 = vadd.f32 %v3454_v4, %v3435_v54  ;;  %v3490_v4 = vadd.f32 %v10025_v33, %v3464_v1 }
 0x4d8   : > { %v3467_v59 = vadd.f32 %v3455_v49, %v9986_v11  ;;  %v3506_v49 = vmax.f32 %v3490_v4, 0.0 }
 0x4da   : > { %v3493_v5 = vadd.f32 %v10020_v9, %v3467_v59  ;;  %v3416_v39 = vpop.f32.mrf.mxu3 }
 0x4db   : > { %v3397_v55 = vpop.f32.mrf.mxu2  ;;  %v10304_v4 = vld [vmem:[#allocation39_spill] sm:$0xff] }
 0x4dc   : > { %v3509_v13 = vmax.f32 %v3493_v5, 0.0  ;;  %v3417_v45 = vadd.f32 %v3416_v39, %v3397_v55  ;;  %v3456_v14 = vpop.f32.mrf.mxu1  ;;  %v2314_v39 = vadd.f32 %v9924_v34, %v9926_v8  ;;  %v3386_v55 = vadd.f32 %v3385_v60, %v3366_v37 }
 0x4dd   : > { %v3437_v53 = vpop.f32.mrf.mxu0 }
 0x4de   : > { %v10031_v20 = vmax.f32 %v3507_v15, %v3509_v13  ;;  %v3466_v11 = vadd.f32 %v3417_v45, %v9979_v62  ;;  %v2271_v13 = vadd.f32 %v9906_v10, %v9908_v12  ;;  %v2838_v62 = vadd.f32 %v9988_v25, %v2385_v29  ;;  %v10306_v29 = vld [vmem:[#allocation37_spill] sm:$0xff] }
 0x4df   : > { %v3473_v45 = vadd.f32 %v3384_v32, %v9972_v63  ;;  %v2767_v26 = vadd.f32 %v9976_v50, %v2314_v39  ;;  %v3457_v59 = vadd.f32 %v3456_v14, %v3437_v53  ;;  %v2390_v12 = vadd.f32 %v9948_v3, %v9950_v36  ;;  %v10308_v39 = vld [vmem:[#allocation35_spill] sm:$0xff] }
 0x4e0   : > { %v3492_v54 = vadd.f32 %v10028_v21, %v3466_v11  ;;  %v2724_v8 = vadd.f32 %v9956_v16, %v2271_v13  ;;  %v2800_v63 = vadd.f32 %v9984_v52, %v2347_v23  ;;  %v3381_v25 = vadd.f32 %v3380_v7, %v3361_v35  ;;  %v10305_v11 = vld [vmem:[#allocation38_spill] sm:$0xff] }
 0x4e1   : > { %v2857_v61 = vadd.f32 %v9990_v38, %v2838_v62  ;;  %v3499_v47 = vadd.f32 %v10018_v28, %v3473_v45  ;;  %v2781_v16 = vadd.f32 %v9960_v41, %v2762_v19  ;;  %v2786_v42 = vadd.f32 %v9974_v46, %v2767_v26 }
 0x4e2   : > { %v3508_v17 = vmax.f32 %v3492_v54, 0.0  ;;  %v3418_v5 = vpop.f32.mrf.mxu3  ;;  %v2843_v2 = vadd.f32 %v10004_v58, %v2390_v12  ;;  %v3472_v3 = vadd.f32 %v3346_v18, %v9965_v31  ;;  %v2352_v36 = vadd.f32 %v9944_v56, %v9946_v0  ;;  %v10302_v0 = vld [vmem:[#allocation36_spill] sm:$0xff]  ;;  %v10309_v12 = vld [vmem:[#allocation33_spill] sm:$0xff] }
 0x4e3   : > { %v3399_v1 = vpop.f32.mrf.mxu2  ;;  %v2743_v52 = vadd.f32 %v9954_v24, %v2724_v8  ;;  %v3471_v57 = vadd.f32 %v3457_v59, %v2857_v61  ;;  %v2729_v7 = vadd.f32 %v9970_v48, %v2276_v43  ;;  %v3469_v41 = vadd.f32 %v3381_v25, %v2781_v16  ;;  %v10303_v24 = vld [vmem:[#allocation34_spill] sm:$0xff] }
 0x4e4   : > { %v10045_v51 = vmax.f32 %v3506_v49, %v3508_v17  ;;  %v3459_v22 = vpop.f32.mrf.mxu1  ;;  %v3477_v35 = vadd.f32 %v3386_v55, %v2786_v42  ;;  %v3515_v60 = vmax.f32 %v3499_v47, 0.0  ;;  %v3419_v58 = vadd.f32 %v3418_v5, %v3399_v1  ;;  %v10307_v5 = vld [vmem:[#allocation32_spill] sm:$0xff]  ;;  %v7322_v42 = vld [vmem:[#allocation14 + $0x3e0] sm:$0xf] }
 0x4e5   : > { %v3440_v34 = vpop.f32.mrf.mxu0  ;;  %v2862_v56 = vadd.f32 %v10002_v30, %v2843_v2  ;;  %v3343_v14 = vadd.f32 %v10303_v24, %v10302_v0  ;;  %v3498_v53 = vadd.f32 %v10025_v33, %v3472_v3  ;;  %v3348_v48 = vadd.f32 %v10305_v11, %v10304_v4  ;;  %v8363_v0 = vld [vmem:[#allocation13] sm:$0xff]  ;;  %v7194_v24 = vld [vmem:[#allocation14 + $0x2e0] sm:$0xf]  ;;  %v8457_v4 = vld [vmem:[#allocation14 + $0x2e4] sm:$0xf] }
 0x4e6   : > { %v3460_v10 = vadd.f32 %v3459_v22, %v3440_v34  ;;  %v2748_v6 = vadd.f32 %v10307_v5, %v2729_v7  ;;  %v2805_v1 = vadd.f32 %v10308_v39, %v2352_v36  ;;  %v3495_v30 = vadd.f32 %v10018_v28, %v3469_v41  ;;  %v7196_v11 = vld [vmem:[#allocation14 + $0x2f0] sm:$0xf0]  ;;  %v7178_v5 = vld [vmem:[#allocation14 + $0x2c0] sm:$0xf] }
 0x4e7   : > { %v3503_v13 = vadd.f32 %v10018_v28, %v3477_v35  ;;  %v3468_v19 = vadd.f32 %v3343_v14, %v2743_v52  ;;  %v3514_v18 = vmax.f32 %v3498_v53, 0.0  ;;  %v8491_v52 = vld [vmem:[#allocation14 + $0x3ec] sm:$0xf0]  ;;  %v7292_v39 = vld [vmem:[#allocation14 + $0x3b0] sm:$0xf0] }
 0x4e8   : > { %v3475_v50 = vadd.f32 %v3460_v10, %v10000_v27  ;;  %v2819_v27 = vadd.f32 %v9982_v40, %v2800_v63  ;;  %v3497_v40 = vadd.f32 %v10020_v9, %v3471_v57  ;;  %v3476_v26 = vadd.f32 %v3348_v48, %v2748_v6  ;;  %v8489_v57 = vld [vmem:[#allocation14 + $0x3e4] sm:$0xf] }
 0x4e9   : > { %v2824_v63 = vadd.f32 %v10309_v12, %v2805_v1  ;;  %v3511_v25 = vmax.f32 %v3495_v30, 0.0  ;;  %v3519_v55 = vmax.f32 %v3503_v13, 0.0  ;;  %v7323_v35 = vor.u32 %v8491_v52, %v7322_v42  ;;  %v8481_v6 = vld [vmem:[#allocation14 + $0x3a4] sm:$0xf]  ;;  %v8455_v30 = vld [vmem:[#allocation14 + $0x2cc] sm:$0xf0] }
 0x4ea   : > { %v3501_v44 = vadd.f32 %v10020_v9, %v3475_v50  ;;  %v3421_v38 = vpop.f32.mrf.mxu3  ;;  %v3470_v62 = vadd.f32 %v3419_v58, %v2819_v27  ;;  %v3513_v34 = vmax.f32 %v3497_v40, 0.0  ;;  %v3494_v50 = vadd.f32 %v10025_v33, %v3468_v19  ;;  %v8453_v13 = vld [vmem:[#allocation14 + $0x2c4] sm:$0xf]  ;;  %v8447_v42 = vld [vmem:[#allocation14 + $0x28c] sm:$0xf0] }
 0x4eb   : > { %v3402_v46 = vpop.f32.mrf.mxu2  ;;  %v3502_v16 = vadd.f32 %v10025_v33, %v3476_v26  ;;  %v7295_v19 = vor.u32 %v8481_v6, %v7292_v39  ;;  %v7179_v26 = vor.u32 %v8455_v30, %v7178_v5  ;;  %v8449_v12 = vld [vmem:[#allocation14 + $0x2a4] sm:$0xf]  ;;  %v8471_v52 = vld [vmem:[#allocation14 + $0x34c] sm:$0xf0]  ;;  %v7212_v6 = vld [vmem:[#allocation14 + $0x310] sm:$0xf0] }
 0x4ec   : > { %v3517_v37 = vmax.f32 %v3501_v44, 0.0  ;;  %v3422_v31 = vadd.f32 %v3421_v38, %v3402_v46  ;;  %v3461_v15 = vpop.f32.mrf.mxu1  ;;  %v3496_v28 = vadd.f32 %v10028_v21, %v3470_v62  ;;  %v3525_v2 = vmax.f32 %v3511_v25, %v3513_v34  ;;  %v7324_v44 = vld [vmem:[#allocation14 + $0x3f0] sm:$0xf0]  ;;  %v7306_v46 = vld [vmem:[#allocation14 + $0x3c0] sm:$0xf] }
 0x4ed   : > { %v3442_v32 = vpop.f32.mrf.mxu0  ;;  %v3510_v41 = vmax.f32 %v3494_v50, 0.0  ;;  %v7327_v58 = vor.u32 %v8489_v57, %v7324_v44  ;;  %v7180_v62 = vld [vmem:[#allocation14 + $0x2d0] sm:$0xf0]  ;;  %v7162_v34 = vld [vmem:[#allocation14 + $0x2a0] sm:$0xf] }
 0x4ee   : > { %v3527_v54 = vmax.f32 %v3515_v60, %v3517_v37  ;;  %v3474_v49 = vadd.f32 %v3422_v31, %v10306_v29  ;;  %v3462_v17 = vadd.f32 %v3461_v15, %v3442_v32  ;;  %v3512_v38 = vmax.f32 %v3496_v28, 0.0  ;;  %v8487_v60 = vld [vmem:[#allocation14 + $0x3cc] sm:$0xf0]  ;;  %v8485_v15 = vld [vmem:[#allocation14 + $0x3c4] sm:$0xf] }
 0x4ef   : > { %v3518_v37 = vmax.f32 %v3502_v16, 0.0  ;;  %v7307_v48 = vor.u32 %v8487_v60, %v7306_v46  ;;  %v8483_v29 = vld [vmem:[#allocation14 + $0x3ac] sm:$0xf0]  ;;  %v8473_v50 = vld [vmem:[#allocation14 + $0x364] sm:$0xf] }
 0x4f0   : > { %v3531_v45 = vmax.f32 %v10031_v20, %v3527_v54  ;;  %v3500_v22 = vadd.f32 %v10028_v21, %v3474_v49  ;;  %v3479_v23 = vadd.f32 %v3462_v17, %v2862_v56  ;;  %v8428_v56 = vld [vmem:[#allocation13 + $0x8] sm:$0xff]  ;;  %v3524_v14 = vmax.f32 %v3510_v41, %v3512_v38  ;;  %v7290_v54 = vld [vmem:[#allocation14 + $0x3a0] sm:$0xf]  ;;  %v8441_v46 = vld [vmem:[#allocation14 + $0x264] sm:$0xf] }
 0x4f1   : > { %v7199_v17 = vor.u32 %v8457_v4, %v7196_v11  ;;  %v7260_v16 = vld [vmem:[#allocation14 + $0x370] sm:$0xf0]  ;;  %v8461_v5 = vld [vmem:[#allocation14 + $0x304] sm:$0xf]  ;;  %v7098_v39 = vld [vmem:[#allocation14 + $0x220] sm:$0xf] }
 0x4f2   : > { %v3516_v8 = vmax.f32 %v3500_v22, 0.0  ;;  %v3505_v59 = vadd.f32 %v10020_v9, %v3479_v23  ;;  %v3423_v10 = vpop.f32.mrf.mxu3  ;;  %v7274_v22 = vld [vmem:[#allocation14 + $0x380] sm:$0xf]  ;;  %v8479_v23 = vld [vmem:[#allocation14 + $0x38c] sm:$0xf0]  ;;  %v7263_v57 = vor.u32 %v8473_v50, %v7260_v16 }
 0x4f3   : > { %v3404_v43 = vpop.f32.mrf.mxu2  ;;  %v7275_v25 = vor.u32 %v8479_v23, %v7274_v22  ;;  %v7244_v41 = vld [vmem:[#allocation14 + $0x350] sm:$0xf0]  ;;  %v8435_v30 = vld [vmem:[#allocation14 + $0x22c] sm:$0xf0]  ;;  %v7332_v22 = vld [vmem:[#allocation14 + $0x3f8] sm:$0xf0] }
 0x4f4   : > { %v3526_v61 = vmax.f32 %v3514_v18, %v3516_v8  ;;  %v3521_v20 = vmax.f32 %v3505_v59, 0.0  ;;  %v3424_v47 = vadd.f32 %v3423_v10, %v3404_v43  ;;  %v7183_v18 = vor.u32 %v8453_v13, %v7180_v62  ;;  %v8477_v8 = vld [vmem:[#allocation14 + $0x384] sm:$0xf]  ;;  %v7276_v59 = vld [vmem:[#allocation14 + $0x390] sm:$0xf0] }
 0x4f5   : > { %v8451_v10 = vld [vmem:[#allocation14 + $0x2ac] sm:$0xf0]  ;;  %v7279_v28 = vor.u32 %v8477_v8, %v7276_v59  ;;  %v7132_v60 = vld [vmem:[#allocation14 + $0x270] sm:$0xf0]  ;;  %v8433_v13 = vld [vmem:[#allocation14 + $0x224] sm:$0xf] }
 0x4f6   : > { %v3530_v3 = vmax.f32 %v10045_v51, %v3526_v61  ;;  %v3529_v9 = vmax.f32 %v3519_v55, %v3521_v20  ;;  %v3478_v36 = vadd.f32 %v3424_v47, %v2824_v63  ;;  %v7308_v51 = vld [vmem:[#allocation14 + $0x3d0] sm:$0xf0]  ;;  %v7258_v55 = vld [vmem:[#allocation14 + $0x360] sm:$0xf]  ;;  %v8475_v43 = vld [vmem:[#allocation14 + $0x36c] sm:$0xf0]  ;;  %v7163_v61 = vor.u32 %v8451_v10, %v7162_v34 }
 0x4f7   : > { %v7311_v32 = vor.u32 %v8485_v15, %v7308_v51  ;;  %v7164_v63 = vld [vmem:[#allocation14 + $0x2b0] sm:$0xf0]  ;;  %v7146_v47 = vld [vmem:[#allocation14 + $0x280] sm:$0xf]  ;;  %v7314_v34 = vld [vmem:[#allocation14 + $0x3c8] sm:$0xf] }
 0x4f8   : > { %v3533_v7 = vmax.f32 %v3525_v2, %v3529_v9  ;;  %v3504_v27 = vadd.f32 %v10028_v21, %v3478_v36  ;;  %v8459_v21 = vld [vmem:[#allocation14 + $0x2ec] sm:$0xf0]  ;;  %v7167_v20 = vor.u32 %v8449_v12, %v7164_v63  ;;  %v8445_v2 = vld [vmem:[#allocation14 + $0x284] sm:$0xf]  ;;  %v7259_v9 = vor.u32 %v8475_v43, %v7258_v55  ;;  %v7242_v36 = vld [vmem:[#allocation14 + $0x340] sm:$0xf] }
 0x4f9   : > { %v7195_v49 = vor.u32 %v8459_v21, %v7194_v24  ;;  %v7147_v44 = vor.u32 %v8447_v42, %v7146_v47  ;;  %v8465_v24 = vld [vmem:[#allocation14 + $0x324] sm:$0xf]  ;;  %v7116_v4 = vld [vmem:[#allocation14 + $0x250] sm:$0xf0]  ;;  %v8488_v8 = vld [vmem:[#allocation14 + $0x3d4] sm:$0xf0] }
 0x4fa   : > { %v3520_v33 = vmax.f32 %v3504_v27, 0.0  ;;  %v10091_v31 = vpack.c.bf16 %v3533_v7, %v3531_v45  ;;  %v7291_v45 = vor.u32 %v8483_v29, %v7290_v54  ;;  %v7130_v7 = vld [vmem:[#allocation14 + $0x260] sm:$0xf]  ;;  %v8469_v27 = vld [vmem:[#allocation14 + $0x344] sm:$0xf]  ;;  %v7315_v16 = vor.u32 %v8488_v8, %v7314_v34 }
 0x4fb   : > { %v7247_v15 = vor.u32 %v8469_v27, %v7244_v41  ;;  %v8437_v21 = vld [vmem:[#allocation14 + $0x244] sm:$0xf]  ;;  %v7100_v62 = vld [vmem:[#allocation14 + $0x230] sm:$0xf0]  ;;  %v7082_v59 = vld [vmem:[#allocation14 + $0x200] sm:$0xf] }
 0x4fc   : > { %v3528_v53 = vmax.f32 %v3518_v37, %v3520_v33  ;;  %3568 = vmatpush.bf16.msrb.mxu3 %v10091_v31  ;;  %3673 = vmatpush.bf16.msra.mxu1 %v10091_v31  ;;  %v7226_v37 = vld [vmem:[#allocation14 + $0x320] sm:$0xf]  ;;  %v8467_v33 = vld [vmem:[#allocation14 + $0x32c] sm:$0xf0]  ;;  %v7103_v10 = vor.u32 %v8433_v13, %v7100_v62  ;;  %v8429_v63 = vld [vmem:[#allocation14 + $0x204] sm:$0xf] }
 0x4fd   : > { %v7227_v11 = vor.u32 %v8467_v33, %v7226_v37  ;;  %v8431_v12 = vld [vmem:[#allocation14 + $0x20c] sm:$0xf0]  ;;  %v7202_v43 = vld [vmem:[#allocation14 + $0x2e8] sm:$0xf]  ;;  %v8486_v47 = vld [vmem:[#allocation14 + $0x3cc] sm:$0xf] }
 0x4fe   : > { %v3532_v40 = vmax.f32 %v3524_v14, %v3528_v53  ;;  %v7228_v14 = vld [vmem:[#allocation14 + $0x330] sm:$0xf0]  ;;  %v8439_v53 = vld [vmem:[#allocation14 + $0x24c] sm:$0xf0]  ;;  %v7316_v50 = vld [vmem:[#allocation14 + $0x3d8] sm:$0xf0]  ;;  %v7083_v42 = vor.u32 %v8431_v12, %v7082_v59 }
 0x4ff   : > { %7079 = vmatmul.msk.bf16.vlgmr.msra.gmra.mxu1 %vm3543_vm3, %v8428_v56  ;;  %7073 = vmatmul.msk.bf16.vlgmr.msrb.gmra.mxu3 %vm3543_vm3, %v8363_v0  ;;  %v7231_v54 = vor.u32 %v8465_v24, %v7228_v14  ;;  %v7188_v27 = vld [vmem:[#allocation14 + $0x2d8] sm:$0xf0]  ;;  %v8482_v41 = vld [vmem:[#allocation14 + $0x3ac] sm:$0xf]  ;;  %v8480_v37 = vld [vmem:[#allocation14 + $0x394] sm:$0xf0] }
 0x500   : > { %4081 = vmatpush.bf16.msra.mxu3 %v7323_v35  ;;  %4109 = vmatpush.bf16.msrb.mxu1 %v7327_v58  ;;  %v10097_v1 = vpack.c.bf16 %v3532_v40, %v3530_v3  ;;  %v7148_v3 = vld [vmem:[#allocation14 + $0x290] sm:$0xf0]  ;;  %v8443_v35 = vld [vmem:[#allocation14 + $0x26c] sm:$0xf0]  ;;  %v7243_v58 = vor.u32 %v8471_v52, %v7242_v36  ;;  %v7330_v40 = vld [vmem:[#allocation14 + $0x3e8] sm:$0xf] }
 0x501   : > { %v7151_v38 = vor.u32 %v8445_v2, %v7148_v3  ;;  %v7131_v51 = vor.u32 %v8443_v35, %v7130_v7  ;;  %v8484_v36 = vld [vmem:[#allocation14 + $0x3b4] sm:$0xf0]  ;;  %v7319_v7 = vor.u32 %v8486_v47, %v7316_v50  ;;  %v7300_v35 = vld [vmem:[#allocation14 + $0x3b8] sm:$0xf0]  ;;  %v8438_v50 = vld [vmem:[#allocation14 + $0x24c] sm:$0xf] }
 0x502   : > { %3554 = vmatpush.bf16.msrb.mxu2 %v10097_v1  ;;  %3659 = vmatpush.bf16.msrb.mxu0 %v10097_v1  ;;  %v7172_v24 = vld [vmem:[#allocation14 + $0x2b8] sm:$0xf0]  ;;  %v8440_v47 = vld [vmem:[#allocation14 + $0x254] sm:$0xf0] }
 0x503   : > { %v7156_v13 = vld [vmem:[#allocation14 + $0x298] sm:$0xf0] }
 0x504   : > { %4082 = vmatpush.bf16.msra.mxu3 %v7307_v48  ;;  %4110 = vmatpush.bf16.msrb.mxu1 %v7311_v32  ;;  %v7210_v48 = vld [vmem:[#allocation14 + $0x300] sm:$0xf]  ;;  %v8463_v32 = vld [vmem:[#allocation14 + $0x30c] sm:$0xf0]  ;;  %v7140_v34 = vld [vmem:[#allocation14 + $0x278] sm:$0xf0] }
 0x505   : > { %7078 = vmatmul.msk.bf16.vlgmr.msrb.gmra.mxu0 %vm3543_vm3, %v8428_v56  ;;  %7072 = vmatmul.msk.bf16.vlgmr.msrb.gmra.mxu2 %vm3543_vm3, %v8363_v0  ;;  %v7135_v56 = vor.u32 %v8441_v46, %v7132_v60  ;;  %v7114_v0 = vld [vmem:[#allocation14 + $0x240] sm:$0xf]  ;;  %v7211_v23 = vor.u32 %v8463_v32, %v7210_v48  ;;  %v8478_v32 = vld [vmem:[#allocation14 + $0x38c] sm:$0xf]  ;;  %v7252_v12 = vld [vmem:[#allocation14 + $0x358] sm:$0xf0] }
 0x506   : > { %4067 = vmatpush.bf16.msra.mxu2 %v7195_v49  ;;  %4095 = vmatpush.bf16.msra.mxu0 %v7199_v17  ;;  %v7115_v29 = vor.u32 %v8439_v53, %v7114_v0  ;;  %v7119_v49 = vor.u32 %v8437_v21, %v7116_v4  ;;  %v8492_v17 = vld [vmem:[#allocation14 + $0x3f4] sm:$0xf0]  ;;  %v8450_v0 = vld [vmem:[#allocation14 + $0x2ac] sm:$0xf]  ;;  %v7266_v21 = vld [vmem:[#allocation14 + $0x368] sm:$0xf] }
 0x507   : > { %v8476_v4 = vld [vmem:[#allocation14 + $0x374] sm:$0xf0] }
 0x508   : > { %4083 = vmatpush.bf16.msra.mxu3 %v7291_v45  ;;  %4111 = vmatpush.bf16.msrb.mxu1 %v7295_v19  ;;  %v8490_v45 = vld [vmem:[#allocation14 + $0x3ec] sm:$0xf]  ;;  %v7215_v19 = vor.u32 %v8461_v5, %v7212_v6  ;;  %v7267_v48 = vor.u32 %v8476_v4, %v7266_v21  ;;  %v7154_v5 = vld [vmem:[#allocation14 + $0x288] sm:$0xf]  ;;  %v8448_v6 = vld [vmem:[#allocation14 + $0x294] sm:$0xf0] }
 0x509   : > { %v7335_v55 = vor.u32 %v8490_v45, %v7332_v22  ;;  %v7250_v45 = vld [vmem:[#allocation14 + $0x348] sm:$0xf]  ;;  %v8472_v22 = vld [vmem:[#allocation14 + $0x354] sm:$0xf0]  ;;  %v7580_v21 = vld [vmem:[#allocation14 + $0x1f0] sm:$0xf0] }
 0x50a   : > { %4068 = vmatpush.bf16.msra.mxu2 %v7179_v26  ;;  %4096 = vmatpush.bf16.msra.mxu0 %v7183_v18  ;;  %v7331_v26 = vor.u32 %v8492_v17, %v7330_v40  ;;  %v7099_v18 = vor.u32 %v8435_v30, %v7098_v39  ;;  %v7284_v40 = vld [vmem:[#allocation14 + $0x398] sm:$0xf0]  ;;  %v8446_v39 = vld [vmem:[#allocation14 + $0x28c] sm:$0xf]  ;;  %v7155_v30 = vor.u32 %v8448_v6, %v7154_v5  ;;  %v7450_v5 = vld [vmem:[#allocation14 + $0xe0] sm:$0xf] }
 0x50b   : > { %v7159_v62 = vor.u32 %v8446_v39, %v7156_v13  ;;  %v8394_v6 = vld [vmem:[#allocation14 + $0xec] sm:$0xf0]  ;;  %v8392_v39 = vld [vmem:[#allocation14 + $0xe4] sm:$0xf] }
 0x50c   : > { %4084 = vmatpush.bf16.msra.mxu3 %v7275_v25  ;;  %4112 = vmatpush.bf16.msrb.mxu1 %v7279_v28  ;;  %v7084_v25 = vld [vmem:[#allocation14 + $0x210] sm:$0xf0]  ;;  %v8460_v28 = vld [vmem:[#allocation14 + $0x2f4] sm:$0xf0] }
 0x50d   : > { %v7087_v2 = vor.u32 %v8429_v63, %v7084_v25  ;;  %v7203_v3 = vor.u32 %v8460_v28, %v7202_v43  ;;  %v7234_v25 = vld [vmem:[#allocation14 + $0x328] sm:$0xf]  ;;  %v8466_v43 = vld [vmem:[#allocation14 + $0x32c] sm:$0xf] }
 0x50e   : > { %4069 = vmatpush.bf16.msra.mxu2 %v7163_v61  ;;  %4097 = vmatpush.bf16.msra.mxu0 %v7167_v20  ;;  %v8458_v61 = vld [vmem:[#allocation14 + $0x2ec] sm:$0xf]  ;;  %v7204_v20 = vld [vmem:[#allocation14 + $0x2f8] sm:$0xf0] }
 0x50f   : > { %v7207_v52 = vor.u32 %v8458_v61, %v7204_v20  ;;  %v7236_v61 = vld [vmem:[#allocation14 + $0x338] sm:$0xf0]  ;;  %v7122_v20 = vld [vmem:[#allocation14 + $0x248] sm:$0xf] }
 0x510   : > { %4085 = vmatpush.bf16.msra.mxu3 %v7259_v9  ;;  %4113 = vmatpush.bf16.msrb.mxu1 %v7263_v57  ;;  %v7298_v9 = vld [vmem:[#allocation14 + $0x3a8] sm:$0xf] }
 0x511   : > { %v7186_v57 = vld [vmem:[#allocation14 + $0x2c8] sm:$0xf]  ;;  %v7299_v46 = vor.u32 %v8484_v36, %v7298_v9  ;;  %v8464_v36 = vld [vmem:[#allocation14 + $0x314] sm:$0xf0] }
 0x512   : > { %4070 = vmatpush.bf16.msra.mxu2 %v7147_v44  ;;  %4098 = vmatpush.bf16.msra.mxu0 %v7151_v38  ;;  %v8456_v44 = vld [vmem:[#allocation14 + $0x2d4] sm:$0xf0]  ;;  %v8454_v38 = vld [vmem:[#allocation14 + $0x2cc] sm:$0xf]  ;;  %v7218_v9 = vld [vmem:[#allocation14 + $0x308] sm:$0xf] }
 0x513   : > { %v7187_v60 = vor.u32 %v8456_v44, %v7186_v57  ;;  %v7191_v33 = vor.u32 %v8454_v38, %v7188_v27  ;;  %v7219_v57 = vor.u32 %v8464_v36, %v7218_v9  ;;  %v7220_v44 = vld [vmem:[#allocation14 + $0x318] sm:$0xf0]  ;;  %v7106_v38 = vld [vmem:[#allocation14 + $0x228] sm:$0xf]  ;;  %v8434_v27 = vld [vmem:[#allocation14 + $0x22c] sm:$0xf] }
 0x514   : > { %4086 = vmatpush.bf16.msra.mxu3 %v7243_v58  ;;  %4114 = vmatpush.bf16.msrb.mxu1 %v7247_v15  ;;  %v7282_v58 = vld [vmem:[#allocation14 + $0x388] sm:$0xf]  ;;  %v7514_v36 = vld [vmem:[#allocation14 + $0x160] sm:$0xf] }
 0x515   : > { %v7170_v15 = vld [vmem:[#allocation14 + $0x2a8] sm:$0xf]  ;;  %v7283_v14 = vor.u32 %v8480_v37, %v7282_v58  ;;  %v8432_v37 = vld [vmem:[#allocation14 + $0x214] sm:$0xf0] }
 0x516   : > { %4071 = vmatpush.bf16.msra.mxu2 %v7131_v51  ;;  %4099 = vmatpush.bf16.msra.mxu0 %v7135_v56  ;;  %v8452_v51 = vld [vmem:[#allocation14 + $0x2b4] sm:$0xf0]  ;;  %v7303_v56 = vor.u32 %v8482_v41, %v7300_v35  ;;  %v7090_v58 = vld [vmem:[#allocation14 + $0x208] sm:$0xf] }
 0x517   : > { %v7171_v53 = vor.u32 %v8452_v51, %v7170_v15  ;;  %v7091_v15 = vor.u32 %v8432_v37, %v7090_v58  ;;  %v7092_v51 = vld [vmem:[#allocation14 + $0x218] sm:$0xf0]  ;;  %v7498_v37 = vld [vmem:[#allocation14 + $0x140] sm:$0xf] }
 0x518   : > { %4087 = vmatpush.bf16.msra.mxu3 %v7227_v11  ;;  %4115 = vmatpush.bf16.msrb.mxu1 %v7231_v54  ;;  %v7175_v11 = vor.u32 %v8450_v0, %v7172_v24  ;;  %v7287_v54 = vor.u32 %v8478_v32, %v7284_v40  ;;  %v7578_v24 = vld [vmem:[#allocation14 + $0x1e0] sm:$0xf] }
 0x519   : > { %v7562_v32 = vld [vmem:[#allocation14 + $0x1c0] sm:$0xf] }
 0x51a   : > { %4072 = vmatpush.bf16.msra.mxu2 %v7115_v29  ;;  %4100 = vmatpush.bf16.msra.mxu0 %v7119_v49  ;;  %v8474_v29 = vld [vmem:[#allocation14 + $0x36c] sm:$0xf]  ;;  %v7268_v49 = vld [vmem:[#allocation14 + $0x378] sm:$0xf0] }
 0x51b   : > { %v7271_v17 = vor.u32 %v8474_v29, %v7268_v49  ;;  %v8422_v29 = vld [vmem:[#allocation14 + $0x1cc] sm:$0xf0]  ;;  %v8420_v49 = vld [vmem:[#allocation14 + $0x1c4] sm:$0xf] }
 0x51c   : > { %4088 = vmatpush.bf16.msra.mxu3 %v7211_v23  ;;  %4116 = vmatpush.bf16.msrb.mxu1 %v7215_v19  ;;  %v7138_v23 = vld [vmem:[#allocation14 + $0x268] sm:$0xf]  ;;  %v7251_v19 = vor.u32 %v8472_v22, %v7250_v45  ;;  %v7563_v13 = vor.u32 %v8422_v29, %v7562_v32  ;;  %v8418_v22 = vld [vmem:[#allocation14 + $0x1ac] sm:$0xf0]  ;;  %v7482_v32 = vld [vmem:[#allocation14 + $0x120] sm:$0xf] }
 0x51d   : > { %v8402_v29 = vld [vmem:[#allocation14 + $0x12c] sm:$0xf0] }
 0x51e   : > { %4073 = vmatpush.bf16.msra.mxu2 %v7099_v18  ;;  %4101 = vmatpush.bf16.msra.mxu0 %v7103_v10  ;;  %v8442_v18 = vld [vmem:[#allocation14 + $0x26c] sm:$0xf] }
 0x51f   : > { %v7143_v59 = vor.u32 %v8442_v18, %v7140_v34  ;;  %v8470_v10 = vld [vmem:[#allocation14 + $0x34c] sm:$0xf]  ;;  %v7451_v18 = vor.u32 %v8394_v6, %v7450_v5 }
 0x520   : > { %4137 = vmatpush.bf16.msrb.mxu3 %v7331_v26  ;;  %4165 = vmatpush.bf16.msra.mxu1 %v7335_v55  ;;  %v8444_v26 = vld [vmem:[#allocation14 + $0x274] sm:$0xf0]  ;;  %v7255_v63 = vor.u32 %v8470_v10, %v7252_v12  ;;  %v8390_v10 = vld [vmem:[#allocation14 + $0xcc] sm:$0xf0]  ;;  %v8388_v12 = vld [vmem:[#allocation14 + $0xc4] sm:$0xf] }
 0x521   : > { %v7139_v8 = vor.u32 %v8444_v26, %v7138_v23  ;;  %v8468_v55 = vld [vmem:[#allocation14 + $0x334] sm:$0xf0]  ;;  %v8416_v23 = vld [vmem:[#allocation14 + $0x1a4] sm:$0xf] }
 0x522   : > { %4074 = vmatpush.bf16.msra.mxu2 %v7083_v42  ;;  %4102 = vmatpush.bf16.msra.mxu0 %v7087_v2  ;;  %v7235_v28 = vor.u32 %v8468_v55, %v7234_v25  ;;  %v7123_v42 = vor.u32 %v8440_v47, %v7122_v20  ;;  %v7124_v2 = vld [vmem:[#allocation14 + $0x258] sm:$0xf0]  ;;  %v7530_v55 = vld [vmem:[#allocation14 + $0x180] sm:$0xf]  ;;  %v7532_v20 = vld [vmem:[#allocation14 + $0x190] sm:$0xf0] }
 0x524   : > { %4138 = vmatpush.bf16.msrb.mxu3 %v7315_v16  ;;  %4166 = vmatpush.bf16.msra.mxu1 %v7319_v7  ;;  %v7239_v16 = vor.u32 %v8466_v43, %v7236_v61  ;;  %v8436_v7 = vld [vmem:[#allocation14 + $0x234] sm:$0xf0]  ;;  %v8412_v61 = vld [vmem:[#allocation14 + $0x184] sm:$0xf] }
 0x525   : > { %v7107_v35 = vor.u32 %v8436_v7, %v7106_v38  ;;  %v7516_v38 = vld [vmem:[#allocation14 + $0x170] sm:$0xf0] }
 0x526   : > { %4123 = vmatpush.bf16.msrb.mxu2 %v7203_v3  ;;  %4151 = vmatpush.bf16.msrb.mxu0 %v7207_v52  ;;  %v7127_v3 = vor.u32 %v8438_v50, %v7124_v2  ;;  %v8462_v52 = vld [vmem:[#allocation14 + $0x30c] sm:$0xf]  ;;  %v8384_v2 = vld [vmem:[#allocation14 + $0xa4] sm:$0xf] }
 0x527   : > { %v7223_v41 = vor.u32 %v8462_v52, %v7220_v44  ;;  %v7535_v52 = vor.u32 %v8412_v61, %v7532_v20  ;;  %v8408_v44 = vld [vmem:[#allocation14 + $0x164] sm:$0xf]  ;;  %v7356_v61 = vld [vmem:[#allocation14 + $0x30] sm:$0xf0] }
 0x528   : > { %4139 = vmatpush.bf16.msrb.mxu3 %v7299_v46  ;;  %4167 = vmatpush.bf16.msra.mxu1 %v7303_v56  ;;  %v7108_v46 = vld [vmem:[#allocation14 + $0x238] sm:$0xf0] }
 0x52a   : > { %4124 = vmatpush.bf16.msrb.mxu2 %v7187_v60  ;;  %4152 = vmatpush.bf16.msrb.mxu0 %v7191_v33  ;;  %v7111_v60 = vor.u32 %v8434_v27, %v7108_v46  ;;  %v8430_v33 = vld [vmem:[#allocation14 + $0x20c] sm:$0xf]  ;;  %v8380_v46 = vld [vmem:[#allocation14 + $0x84] sm:$0xf] }
 0x52b   : > { %v7095_v56 = vor.u32 %v8430_v33, %v7092_v51  ;;  %v7519_v33 = vor.u32 %v8408_v44, %v7516_v38  ;;  %v8404_v51 = vld [vmem:[#allocation14 + $0x144] sm:$0xf]  ;;  %v7572_v44 = vld [vmem:[#allocation14 + $0x1d8] sm:$0xf0] }
 0x52c   : > { %4140 = vmatpush.bf16.msrb.mxu3 %v7283_v14  ;;  %4168 = vmatpush.bf16.msra.mxu1 %v7287_v54  ;;  %v8426_v14 = vld [vmem:[#allocation14 + $0x1ec] sm:$0xf0]  ;;  %v8364_v38 = vld [vmem:[#allocation14 + $0x4] sm:$0xf] }
 0x52e   : > { %4125 = vmatpush.bf16.msrb.mxu2 %v7171_v53  ;;  %4153 = vmatpush.bf16.msrb.mxu0 %v7175_v11  ;;  %v8424_v53 = vld [vmem:[#allocation14 + $0x1e4] sm:$0xf] }
 0x52f   : > { %v7583_v40 = vor.u32 %v8424_v53, %v7580_v21  ;;  %v8378_v21 = vld [vmem:[#allocation14 + $0x6c] sm:$0xf0] }
 0x530   : > { %4141 = vmatpush.bf16.msrb.mxu3 %v7267_v48  ;;  %4169 = vmatpush.bf16.msra.mxu1 %v7271_v17  ;;  %v7579_v48 = vor.u32 %v8426_v14, %v7578_v24  ;;  %v7564_v17 = vld [vmem:[#allocation14 + $0x1d0] sm:$0xf0]  ;;  %v7386_v14 = vld [vmem:[#allocation14 + $0x60] sm:$0xf] }
 0x531   : > { %v7567_v45 = vor.u32 %v8420_v49, %v7564_v17  ;;  %v8400_v49 = vld [vmem:[#allocation14 + $0x124] sm:$0xf]  ;;  %v7484_v17 = vld [vmem:[#allocation14 + $0x130] sm:$0xf0]  ;;  %v7387_v5 = vor.u32 %v8378_v21, %v7386_v14  ;;  %v8417_v21 = vld [vmem:[#allocation14 + $0x1ac] sm:$0xf] }
 0x532   : > { %4126 = vmatpush.bf16.msrb.mxu2 %v7155_v30  ;;  %4154 = vmatpush.bf16.msrb.mxu0 %v7159_v62  ;;  %v7452_v30 = vld [vmem:[#allocation14 + $0xf0] sm:$0xf0]  ;;  %v7546_v62 = vld [vmem:[#allocation14 + $0x1a0] sm:$0xf] }
 0x533   : > { %v7455_v34 = vor.u32 %v8392_v39, %v7452_v30  ;;  %v7547_v25 = vor.u32 %v8418_v22, %v7546_v62  ;;  %v7370_v39 = vld [vmem:[#allocation14 + $0x40] sm:$0xf]  ;;  %v8374_v30 = vld [vmem:[#allocation14 + $0x4c] sm:$0xf0]  ;;  %v7372_v62 = vld [vmem:[#allocation14 + $0x50] sm:$0xf0] }
 0x534   : > { %4142 = vmatpush.bf16.msrb.mxu3 %v7251_v19  ;;  %4170 = vmatpush.bf16.msra.mxu1 %v7255_v63  ;;  %v7548_v19 = vld [vmem:[#allocation14 + $0x1b0] sm:$0xf0]  ;;  %v7466_v22 = vld [vmem:[#allocation14 + $0x100] sm:$0xf] }
 0x535   : > { %v7436_v63 = vld [vmem:[#allocation14 + $0xd0] sm:$0xf0]  ;;  %v7551_v43 = vor.u32 %v8416_v23, %v7548_v19  ;;  %v8398_v23 = vld [vmem:[#allocation14 + $0x10c] sm:$0xf0]  ;;  %v7487_v19 = vor.u32 %v8400_v49, %v7484_v17  ;;  %v7538_v49 = vld [vmem:[#allocation14 + $0x188] sm:$0xf] }
 0x536   : > { %4127 = vmatpush.bf16.msrb.mxu2 %v7139_v8  ;;  %4155 = vmatpush.bf16.msrb.mxu0 %v7143_v59  ;;  %v7434_v8 = vld [vmem:[#allocation14 + $0xc0] sm:$0xf]  ;;  %v7439_v50 = vor.u32 %v8388_v12, %v7436_v63  ;;  %v7467_v20 = vor.u32 %v8398_v23, %v7466_v22  ;;  %v8415_v17 = vld [vmem:[#allocation14 + $0x194] sm:$0xf0]  ;;  %v8385_v22 = vld [vmem:[#allocation14 + $0xac] sm:$0xf] }
 0x537   : > { %v7435_v47 = vor.u32 %v8390_v10, %v7434_v8  ;;  %v7468_v8 = vld [vmem:[#allocation14 + $0x110] sm:$0xf0]  ;;  %v7371_v10 = vor.u32 %v8374_v30, %v7370_v39  ;;  %v7354_v63 = vld [vmem:[#allocation14 + $0x20] sm:$0xf]  ;;  %v7426_v30 = vld [vmem:[#allocation14 + $0xa8] sm:$0xf] }
 0x538   : > { %4143 = vmatpush.bf16.msrb.mxu3 %v7235_v28  ;;  %4171 = vmatpush.bf16.msra.mxu1 %v7239_v16  ;;  %v8414_v28 = vld [vmem:[#allocation14 + $0x18c] sm:$0xf0]  ;;  %v7418_v16 = vld [vmem:[#allocation14 + $0xa0] sm:$0xf]  ;;  %v7428_v23 = vld [vmem:[#allocation14 + $0xb8] sm:$0xf0] }
 0x539   : > { %v7531_v9 = vor.u32 %v8414_v28, %v7530_v55  ;;  %v7588_v55 = vld [vmem:[#allocation14 + $0x1f8] sm:$0xf0]  ;;  %v8368_v28 = vld [vmem:[#allocation14 + $0x24] sm:$0xf] }
 0x53a   : > { %4128 = vmatpush.bf16.msrb.mxu2 %v7123_v42  ;;  %4156 = vmatpush.bf16.msrb.mxu0 %v7127_v3  ;;  %v8386_v42 = vld [vmem:[#allocation14 + $0xac] sm:$0xf0]  ;;  %v7420_v3 = vld [vmem:[#allocation14 + $0xb0] sm:$0xf0] }
 0x53b   : > { %v7419_v7 = vor.u32 %v8386_v42, %v7418_v16  ;;  %v7423_v27 = vor.u32 %v8384_v2, %v7420_v3  ;;  %v8423_v42 = vld [vmem:[#allocation14 + $0x1d4] sm:$0xf0]  ;;  %v8421_v3 = vld [vmem:[#allocation14 + $0x1cc] sm:$0xf] }
 0x53c   : > { %4144 = vmatpush.bf16.msrb.mxu3 %v7219_v57  ;;  %4172 = vmatpush.bf16.msra.mxu1 %v7223_v41  ;;  %v8410_v57 = vld [vmem:[#allocation14 + $0x16c] sm:$0xf0]  ;;  %v7402_v41 = vld [vmem:[#allocation14 + $0x80] sm:$0xf] }
 0x53d   : > { %v7515_v58 = vor.u32 %v8410_v57, %v7514_v36  ;;  %v7359_v36 = vor.u32 %v8368_v28, %v7356_v61  ;;  %v8366_v57 = vld [vmem:[#allocation14 + $0xc] sm:$0xf0]  ;;  %v7506_v61 = vld [vmem:[#allocation14 + $0x148] sm:$0xf] }
 0x53e   : > { %4129 = vmatpush.bf16.msrb.mxu2 %v7107_v35  ;;  %4157 = vmatpush.bf16.msrb.mxu0 %v7111_v60  ;;  %v8382_v35 = vld [vmem:[#allocation14 + $0x8c] sm:$0xf0]  ;;  %v7404_v60 = vld [vmem:[#allocation14 + $0x90] sm:$0xf0] }
 0x53f   : > { %v7407_v24 = vor.u32 %v8380_v46, %v7404_v60  ;;  %v8393_v46 = vld [vmem:[#allocation14 + $0xec] sm:$0xf]  ;;  %v7460_v60 = vld [vmem:[#allocation14 + $0xf8] sm:$0xf0] }
 0x540   : > { %v7463_v14 = vor.u32 %v8393_v46, %v7460_v60  ;;  %v8401_v46 = vld [vmem:[#allocation14 + $0x12c] sm:$0xf]  ;;  %v7492_v60 = vld [vmem:[#allocation14 + $0x138] sm:$0xf0] }
 0x542   : > { %4130 = vmatpush.bf16.msrb.mxu2 %v7091_v15  ;;  %4158 = vmatpush.bf16.msrb.mxu0 %v7095_v56  ;;  %v8406_v15 = vld [vmem:[#allocation14 + $0x14c] sm:$0xf0]  ;;  %v7500_v56 = vld [vmem:[#allocation14 + $0x150] sm:$0xf0] }
 0x57c   : > { %v3675_v0 = vpop.f32.mrf.mxu1 }
 0x582   : > { %v3661_v4 = vpop.f32.mrf.mxu0  ;;  %v10111_v53 = vpop.f32.mrf.mxu3 }
 0x584   : > { %v3677_v11 = vpop.f32.mrf.mxu1 }
 0x585   : > { %v10103_v54 = vpack.c.bf16 %v3677_v11, %v3675_v0  ;;  %v7403_v0 = vor.u32 %v8382_v35, %v7402_v41  ;;  %v7388_v11 = vld [vmem:[#allocation14 + $0x70] sm:$0xf0]  ;;  %v8395_v35 = vld [vmem:[#allocation14 + $0xf4] sm:$0xf0] }
 0x587   : > { %4089 = vmatmul.bf16.vlgmr.msra.gmra.mxu3 %v10103_v54  ;;  %4117 = vmatmul.bf16.vlgmr.msrb.gmra.mxu1 %v10103_v54 }
 0x588   : > { %4513 = vmatpush.bf16.msra.mxu3 %v7579_v48  ;;  %4541 = vmatpush.bf16.msrb.mxu1 %v7583_v40  ;;  %v7499_v48 = vor.u32 %v8406_v15, %v7498_v37  ;;  %v7503_v40 = vor.u32 %v8404_v51, %v7500_v56  ;;  %v7575_v37 = vor.u32 %v8421_v3, %v7572_v44  ;;  %v7554_v56 = vld [vmem:[#allocation14 + $0x1a8] sm:$0xf]  ;;  %v8379_v3 = vld [vmem:[#allocation14 + $0x74] sm:$0xf0] }
 0x589   : > { %v8403_v44 = vld [vmem:[#allocation14 + $0x134] sm:$0xf0] }
 0x58a   : > { %v3663_v26 = vpop.f32.mrf.mxu0 }
 0x58b   : > { %v10107_v59 = vpack.c.bf16 %v3663_v26, %v3661_v4  ;;  %v8376_v4 = vld [vmem:[#allocation14 + $0x64] sm:$0xf] }
 0x58c   : > { %4514 = vmatpush.bf16.msra.mxu3 %v7563_v13  ;;  %4542 = vmatpush.bf16.msrb.mxu1 %v7567_v45  ;;  %v7391_v6 = vor.u32 %v8376_v4, %v7388_v11  ;;  %v8372_v13 = vld [vmem:[#allocation14 + $0x44] sm:$0xf]  ;;  %v10115_v45 = vpop.f32.mrf.mxu2  ;;  %v7556_v4 = vld [vmem:[#allocation14 + $0x1b8] sm:$0xf0]  ;;  %v8391_v11 = vld [vmem:[#allocation14 + $0xd4] sm:$0xf0] }
 0x58d   : > { %4075 = vmatmul.bf16.vlgmr.msra.gmra.mxu2 %v10107_v59  ;;  %4103 = vmatmul.bf16.vlgmr.msra.gmra.mxu0 %v10107_v59  ;;  %v8396_v26 = vld [vmem:[#allocation14 + $0x104] sm:$0xf]  ;;  %v7375_v12 = vor.u32 %v8372_v13, %v7372_v62  ;;  %v8413_v13 = vld [vmem:[#allocation14 + $0x18c] sm:$0xf]  ;;  %v7540_v62 = vld [vmem:[#allocation14 + $0x198] sm:$0xf0] }
 0x58e   : > { %4499 = vmatpush.bf16.msra.mxu2 %v7451_v18  ;;  %4527 = vmatpush.bf16.msra.mxu0 %v7455_v34  ;;  %v7586_v18 = vld [vmem:[#allocation14 + $0x1e8] sm:$0xf]  ;;  %v8427_v34 = vld [vmem:[#allocation14 + $0x1f4] sm:$0xf0] }
 0x58f   : > { %v7587_v16 = vor.u32 %v8427_v34, %v7586_v18  ;;  %v7543_v18 = vor.u32 %v8413_v13, %v7540_v62  ;;  %v7348_v13 = vld [vmem:[#allocation14 + $0x18] sm:$0xf0] }
 0x590   : > { %4515 = vmatpush.bf16.msra.mxu3 %v7547_v25  ;;  %4543 = vmatpush.bf16.msrb.mxu1 %v7551_v43  ;;  %v8425_v25 = vld [vmem:[#allocation14 + $0x1ec] sm:$0xf]  ;;  %v8370_v43 = vld [vmem:[#allocation14 + $0x2c] sm:$0xf0] }
 0x591   : > { %v7591_v2 = vor.u32 %v8425_v25, %v7588_v55  ;;  %v8383_v25 = vld [vmem:[#allocation14 + $0x94] sm:$0xf0]  ;;  %v8381_v55 = vld [vmem:[#allocation14 + $0x8c] sm:$0xf] }
 0x592   : > { %4500 = vmatpush.bf16.msra.mxu2 %v7435_v47  ;;  %4528 = vmatpush.bf16.msra.mxu0 %v7439_v50  ;;  %v7471_v47 = vor.u32 %v8396_v26, %v7468_v8  ;;  %v3572_v50 = vpop.f32.mrf.mxu3  ;;  %v8411_v26 = vld [vmem:[#allocation14 + $0x174] sm:$0xf0]  ;;  %v7431_v8 = vor.u32 %v8385_v22, %v7428_v23 }
 0x593   : > { %v10120_v41 = vpack.c.bf16 %v3572_v50, %v10111_v53  ;;  %v7442_v53 = vld [vmem:[#allocation14 + $0xc8] sm:$0xf]  ;;  %v8493_v22 = vld [vmem:[#allocation13 + $0x10] sm:$0xff] }
 0x594   : > { %4516 = vmatpush.bf16.msra.mxu3 %v7531_v9  ;;  %4544 = vmatpush.bf16.msrb.mxu1 %v7535_v52  ;;  %v7355_v9 = vor.u32 %v8370_v43, %v7354_v63  ;;  %v7338_v52 = vld [vmem:[#allocation14] sm:$0xf]  ;;  %v3558_v51 = vpop.f32.mrf.mxu2  ;;  %v7524_v63 = vld [vmem:[#allocation14 + $0x178] sm:$0xf0] }
 0x595   : > { %v7412_v43 = vld [vmem:[#allocation14 + $0x98] sm:$0xf0] }
 0x596   : > { %4501 = vmatpush.bf16.msra.mxu2 %v7419_v7  ;;  %4529 = vmatpush.bf16.msra.mxu0 %v7423_v27  ;;  %v7340_v7 = vld [vmem:[#allocation14 + $0x10] sm:$0xf0]  ;;  %v7458_v27 = vld [vmem:[#allocation14 + $0xe8] sm:$0xf] }
 0x597   : > { %4145 = vmatmul.bf16.vlgmr.msrb.gmra.mxu3 %v10103_v54  ;;  %4173 = vmatmul.bf16.vlgmr.msra.gmra.mxu1 %v10103_v54  ;;  %v7483_v54 = vor.u32 %v8402_v29, %v7482_v32  ;;  %v7343_v15 = vor.u32 %v8364_v38, %v7340_v7  ;;  %v7444_v32 = vld [vmem:[#allocation14 + $0xd8] sm:$0xf0] }
 0x598   : > { %4517 = vmatpush.bf16.msra.mxu3 %v7515_v58  ;;  %4545 = vmatpush.bf16.msrb.mxu1 %v7519_v33  ;;  %v7339_v33 = vor.u32 %v8366_v57, %v7338_v52  ;;  %v7490_v57 = vld [vmem:[#allocation14 + $0x128] sm:$0xf] }
 0x59a   : > { %4502 = vmatpush.bf16.msra.mxu2 %v7403_v0  ;;  %4530 = vmatpush.bf16.msra.mxu0 %v7407_v24  ;;  %v8419_v0 = vld [vmem:[#allocation14 + $0x1b4] sm:$0xf0]  ;;  %v7459_v24 = vor.u32 %v8395_v35, %v7458_v27  ;;  %v7378_v35 = vld [vmem:[#allocation14 + $0x48] sm:$0xf] }
 0x59b   : > { %v7555_v29 = vor.u32 %v8419_v0, %v7554_v56  ;;  %v8399_v56 = vld [vmem:[#allocation14 + $0x114] sm:$0xf0]  ;;  %v7495_v0 = vor.u32 %v8401_v46, %v7492_v60  ;;  %v7698_v46 = vld [vmem:[#allocation14 + $0x4d0] sm:$0xf0] }
 0x59c   : > { %4518 = vmatpush.bf16.msra.mxu3 %v7499_v48  ;;  %4546 = vmatpush.bf16.msrb.mxu1 %v7503_v40  ;;  %v8389_v48 = vld [vmem:[#allocation14 + $0xcc] sm:$0xf]  ;;  %v10125_v40 = vpack.c.bf16 %v3558_v51, %v10115_v45  ;;  %v7539_v45 = vor.u32 %v8415_v17, %v7538_v49  ;;  %v7474_v51 = vld [vmem:[#allocation14 + $0x108] sm:$0xf] }
 0x59d   : > { %4131 = vmatmul.bf16.vlgmr.msrb.gmra.mxu2 %v10107_v59  ;;  %4159 = vmatmul.bf16.vlgmr.msrb.gmra.mxu0 %v10107_v59  ;;  %v7570_v59 = vld [vmem:[#allocation14 + $0x1c8] sm:$0xf]  ;;  %v7447_v39 = vor.u32 %v8389_v48, %v7444_v32  ;;  %v8369_v48 = vld [vmem:[#allocation14 + $0x2c] sm:$0xf]  ;;  %v7364_v32 = vld [vmem:[#allocation14 + $0x38] sm:$0xf0] }
 0x59e   : > { %4503 = vmatpush.bf16.msra.mxu2 %v7387_v5  ;;  %4531 = vmatpush.bf16.msra.mxu0 %v7391_v6  ;;  %v7571_v58 = vor.u32 %v8423_v42, %v7570_v59  ;;  %v7559_v5 = vor.u32 %v8417_v21, %v7556_v4  ;;  %v7443_v6 = vor.u32 %v8391_v11, %v7442_v53  ;;  %v7394_v59 = vld [vmem:[#allocation14 + $0x68] sm:$0xf]  ;;  %v8405_v42 = vld [vmem:[#allocation14 + $0x14c] sm:$0xf]  ;;  %v7476_v4 = vld [vmem:[#allocation14 + $0x118] sm:$0xf0] }
 0x59f   : > { %v7395_v7 = vor.u32 %v8379_v3, %v7394_v59  ;;  %v7362_v53 = vld [vmem:[#allocation14 + $0x28] sm:$0xf]  ;;  %v8397_v21 = vld [vmem:[#allocation14 + $0x10c] sm:$0xf]  ;;  %v8371_v11 = vld [vmem:[#allocation14 + $0x34] sm:$0xf0] }
 0x5a0   : > { %4519 = vmatpush.bf16.msra.mxu3 %v7483_v54  ;;  %4547 = vmatpush.bf16.msrb.mxu1 %v7487_v19  ;;  %v8387_v54 = vld [vmem:[#allocation14 + $0xb4] sm:$0xf0]  ;;  %v7522_v19 = vld [vmem:[#allocation14 + $0x168] sm:$0xf]  ;;  %v7479_v49 = vor.u32 %v8397_v21, %v7476_v4  ;;  %v7363_v17 = vor.u32 %v8371_v11, %v7362_v53  ;;  %v8524_v3 = vld [vmem:[#allocation14 + $0x4ec] sm:$0xf0] }
 0x5a1   : > { %v7427_v34 = vor.u32 %v8387_v54, %v7426_v30  ;;  %v7523_v28 = vor.u32 %v8411_v26, %v7522_v19  ;;  %v8365_v30 = vld [vmem:[#allocation14 + $0xc] sm:$0xf]  ;;  %v7682_v53 = vld [vmem:[#allocation14 + $0x4b0] sm:$0xf0] }
 0x5a2   : > { %4504 = vmatpush.bf16.msra.mxu2 %v7371_v10  ;;  %4532 = vmatpush.bf16.msra.mxu0 %v7375_v12  ;;  %v7410_v10 = vld [vmem:[#allocation14 + $0x88] sm:$0xf]  ;;  %v8409_v12 = vld [vmem:[#allocation14 + $0x16c] sm:$0xf]  ;;  %v7351_v54 = vor.u32 %v8365_v30, %v7348_v13  ;;  %v7810_v21 = vld [vmem:[#allocation14 + $0x5b0] sm:$0xf0] }
 0x5a3   : > { %v7411_v50 = vor.u32 %v8383_v25, %v7410_v10  ;;  %v7840_v10 = vld [vmem:[#allocation14 + $0x5e0] sm:$0xf]  ;;  %v7842_v25 = vld [vmem:[#allocation14 + $0x5f0] sm:$0xf0] }
 0x5a4   : > { %4520 = vmatpush.bf16.msra.mxu3 %v7467_v20  ;;  %4548 = vmatpush.bf16.msrb.mxu1 %v7471_v47  ;;  %v8407_v20 = vld [vmem:[#allocation14 + $0x154] sm:$0xf0]  ;;  %v7527_v47 = vor.u32 %v8409_v12, %v7524_v63  ;;  %v8554_v12 = vld [vmem:[#allocation14 + $0x5e4] sm:$0xf]  ;;  %v7776_v13 = vld [vmem:[#allocation14 + $0x560] sm:$0xf] }
 0x5a5   : > { %v7507_v52 = vor.u32 %v8407_v20, %v7506_v61  ;;  %v8552_v61 = vld [vmem:[#allocation14 + $0x5cc] sm:$0xf0]  ;;  %v8550_v20 = vld [vmem:[#allocation14 + $0x5c4] sm:$0xf] }
 0x5a6   : > { %4505 = vmatpush.bf16.msra.mxu2 %v7355_v9  ;;  %4533 = vmatpush.bf16.msra.mxu0 %v7359_v36  ;;  %v8377_v9 = vld [vmem:[#allocation14 + $0x6c] sm:$0xf]  ;;  %v7396_v36 = vld [vmem:[#allocation14 + $0x78] sm:$0xf0] }
 0x5a7   : > { %4521 = vmatmul.bf16.vlgmr.msra.gmra.mxu3 %v10120_v41  ;;  %4549 = vmatmul.bf16.vlgmr.msrb.gmra.mxu1 %v10120_v41  ;;  %v7399_v27 = vor.u32 %v8377_v9, %v7396_v36  ;;  %v8522_v9 = vld [vmem:[#allocation14 + $0x4e4] sm:$0xf] }
 0x5a8   : > { %4569 = vmatpush.bf16.msrb.mxu3 %v7587_v16  ;;  %4597 = vmatpush.bf16.msra.mxu1 %v7591_v2  ;;  %v7415_v16 = vor.u32 %v8381_v55, %v7412_v43  ;;  %v7508_v2 = vld [vmem:[#allocation14 + $0x158] sm:$0xf0]  ;;  %v7845_v55 = vor.u32 %v8554_v12, %v7842_v25  ;;  %v8536_v25 = vld [vmem:[#allocation14 + $0x54c] sm:$0xf0] }
 0x5a9   : > { %v7511_v38 = vor.u32 %v8405_v42, %v7508_v2  ;;  %v7712_v2 = vld [vmem:[#allocation14 + $0x4e0] sm:$0xf] }
 0x5aa   : > { %4506 = vmatpush.bf16.msra.mxu2 %v7339_v33  ;;  %4534 = vmatpush.bf16.msra.mxu0 %v7343_v15  ;;  %v7380_v33 = vld [vmem:[#allocation14 + $0x58] sm:$0xf0]  ;;  %v7491_v15 = vor.u32 %v8403_v44, %v7490_v57  ;;  %v7713_v57 = vor.u32 %v8524_v3, %v7712_v2  ;;  %v7714_v44 = vld [vmem:[#allocation14 + $0x4f0] sm:$0xf0] }
 0x5ab   : > { %v7650_v2 = vld [vmem:[#allocation14 + $0x470] sm:$0xf0] }
 0x5ac   : > { %4570 = vmatpush.bf16.msrb.mxu3 %v7571_v58  ;;  %4598 = vmatpush.bf16.msra.mxu1 %v7575_v37  ;;  %v8375_v58 = vld [vmem:[#allocation14 + $0x54] sm:$0xf0]  ;;  %v8373_v37 = vld [vmem:[#allocation14 + $0x4c] sm:$0xf] }
 0x5ad   : > { %4507 = vmatmul.bf16.vlgmr.msra.gmra.mxu2 %v10125_v40  ;;  %4535 = vmatmul.bf16.vlgmr.msra.gmra.mxu0 %v10125_v40 }
 0x5ae   : > { %4555 = vmatpush.bf16.msrb.mxu2 %v7459_v24  ;;  %4583 = vmatpush.bf16.msrb.mxu0 %v7463_v14  ;;  %v7379_v24 = vor.u32 %v8375_v58, %v7378_v35  ;;  %v7383_v14 = vor.u32 %v8373_v37, %v7380_v33  ;;  %v8518_v35 = vld [vmem:[#allocation14 + $0x4c4] sm:$0xf]  ;;  %v7808_v58 = vld [vmem:[#allocation14 + $0x5a0] sm:$0xf]  ;;  %v8548_v37 = vld [vmem:[#allocation14 + $0x5ac] sm:$0xf0] }
 0x5b0   : > { %4571 = vmatpush.bf16.msrb.mxu3 %v7555_v29  ;;  %4599 = vmatpush.bf16.msra.mxu1 %v7559_v5  ;;  %v7475_v29 = vor.u32 %v8399_v56, %v7474_v51  ;;  %v7367_v5 = vor.u32 %v8369_v48, %v7364_v32  ;;  %v7680_v51 = vld [vmem:[#allocation14 + $0x4a0] sm:$0xf]  ;;  %v8516_v56 = vld [vmem:[#allocation14 + $0x4ac] sm:$0xf0] }
 0x5b1   : > { %v7792_v48 = vld [vmem:[#allocation14 + $0x580] sm:$0xf]  ;;  %v8544_v32 = vld [vmem:[#allocation14 + $0x58c] sm:$0xf0] }
 0x5b2   : > { %4556 = vmatpush.bf16.msrb.mxu2 %v7443_v6  ;;  %4584 = vmatpush.bf16.msrb.mxu0 %v7447_v39  ;;  %v7346_v6 = vld [vmem:[#allocation14 + $0x8] sm:$0xf]  ;;  %v8367_v39 = vld [vmem:[#allocation14 + $0x14] sm:$0xf0] }
 0x5b3   : > { %v7347_v62 = vor.u32 %v8367_v39, %v7346_v6  ;;  %v7794_v6 = vld [vmem:[#allocation14 + $0x590] sm:$0xf0] }
 0x5b4   : > { %4572 = vmatpush.bf16.msrb.mxu3 %v7539_v45  ;;  %4600 = vmatpush.bf16.msra.mxu1 %v7543_v18 }
 0x5b6   : > { %4557 = vmatpush.bf16.msrb.mxu2 %v7427_v34  ;;  %4585 = vmatpush.bf16.msrb.mxu0 %v7431_v8 }
 0x5b8   : > { %4573 = vmatpush.bf16.msrb.mxu3 %v7523_v28  ;;  %4601 = vmatpush.bf16.msra.mxu1 %v7527_v47  ;;  %v7824_v28 = vld [vmem:[#allocation14 + $0x5c0] sm:$0xf] }
 0x5ba   : > { %4558 = vmatpush.bf16.msrb.mxu2 %v7411_v50  ;;  %4586 = vmatpush.bf16.msrb.mxu0 %v7415_v16  ;;  %v7825_v50 = vor.u32 %v8552_v61, %v7824_v28  ;;  %v7826_v16 = vld [vmem:[#allocation14 + $0x5d0] sm:$0xf0] }
 0x5bb   : > { %v7829_v36 = vor.u32 %v8550_v20, %v7826_v16  ;;  %v7762_v61 = vld [vmem:[#allocation14 + $0x550] sm:$0xf0]  ;;  %v7648_v20 = vld [vmem:[#allocation14 + $0x460] sm:$0xf]  ;;  %v8506_v16 = vld [vmem:[#allocation14 + $0x464] sm:$0xf] }
 0x5bc   : > { %4574 = vmatpush.bf16.msrb.mxu3 %v7507_v52  ;;  %4602 = vmatpush.bf16.msra.mxu1 %v7511_v38  ;;  %v7696_v38 = vld [vmem:[#allocation14 + $0x4c0] sm:$0xf]  ;;  %v7653_v3 = vor.u32 %v8506_v16, %v7650_v2  ;;  %v8547_v2 = vld [vmem:[#allocation14 + $0x5ac] sm:$0xf] }
 0x5be   : > { %4559 = vmatpush.bf16.msrb.mxu2 %v7395_v7  ;;  %4587 = vmatpush.bf16.msrb.mxu0 %v7399_v27  ;;  %v8520_v7 = vld [vmem:[#allocation14 + $0x4cc] sm:$0xf0]  ;;  %v7717_v27 = vor.u32 %v8522_v9, %v7714_v44  ;;  %v7744_v9 = vld [vmem:[#allocation14 + $0x520] sm:$0xf] }
 0x5bf   : > { %v7697_v60 = vor.u32 %v8520_v7, %v7696_v38  ;;  %v7746_v38 = vld [vmem:[#allocation14 + $0x530] sm:$0xf0]  ;;  %v7632_v7 = vld [vmem:[#allocation14 + $0x440] sm:$0xf] }
 0x5c0   : > { %4575 = vmatpush.bf16.msrb.mxu3 %v7491_v15  ;;  %4603 = vmatpush.bf16.msra.mxu1 %v7495_v0  ;;  %v7701_v15 = vor.u32 %v8518_v35, %v7698_v46  ;;  %v7809_v0 = vor.u32 %v8548_v37, %v7808_v58  ;;  %v8502_v35 = vld [vmem:[#allocation14 + $0x444] sm:$0xf]  ;;  %v7634_v58 = vld [vmem:[#allocation14 + $0x450] sm:$0xf0] }
 0x5c2   : > { %4560 = vmatpush.bf16.msrb.mxu2 %v7379_v24  ;;  %4588 = vmatpush.bf16.msrb.mxu0 %v7383_v14  ;;  %v8546_v24 = vld [vmem:[#allocation14 + $0x5a4] sm:$0xf] }
 0x5c3   : > { %v8514_v14 = vld [vmem:[#allocation14 + $0x4a4] sm:$0xf]  ;;  %v7813_v11 = vor.u32 %v8546_v24, %v7810_v21  ;;  %v7848_v21 = vld [vmem:[#allocation14 + $0x5e8] sm:$0xf] }
 0x5c4   : > { %4576 = vmatpush.bf16.msrb.mxu3 %v7475_v29  ;;  %4604 = vmatpush.bf16.msra.mxu1 %v7479_v49  ;;  %v8542_v29 = vld [vmem:[#allocation14 + $0x584] sm:$0xf]  ;;  %v7685_v39 = vor.u32 %v8514_v14, %v7682_v53  ;;  %v7730_v53 = vld [vmem:[#allocation14 + $0x510] sm:$0xf0] }
 0x5c5   : > { %v7797_v30 = vor.u32 %v8542_v29, %v7794_v6 }
 0x5c6   : > { %4561 = vmatpush.bf16.msrb.mxu2 %v7363_v17  ;;  %4589 = vmatpush.bf16.msrb.mxu0 %v7367_v5  ;;  %v7681_v17 = vor.u32 %v8516_v56, %v7680_v51  ;;  %v7793_v5 = vor.u32 %v8544_v32, %v7792_v48  ;;  %v7728_v51 = vld [vmem:[#allocation14 + $0x500] sm:$0xf]  ;;  %v8528_v56 = vld [vmem:[#allocation14 + $0x50c] sm:$0xf0]  ;;  %v8498_v32 = vld [vmem:[#allocation14 + $0x424] sm:$0xf] }
 0x5c7   : > { %4577 = vmatmul.bf16.vlgmr.msrb.gmra.mxu3 %v10120_v41  ;;  %4605 = vmatmul.bf16.vlgmr.msra.gmra.mxu1 %v10120_v41  ;;  %v7729_v14 = vor.u32 %v8528_v56, %v7728_v51  ;;  %v8500_v48 = vld [vmem:[#allocation14 + $0x42c] sm:$0xf0]  ;;  %v7800_v51 = vld [vmem:[#allocation14 + $0x588] sm:$0xf]  ;;  %v8545_v56 = vld [vmem:[#allocation14 + $0x594] sm:$0xf0] }
 0x5c8   : > { %4643 = vmatpush.bf16.msra.mxu3 %v10091_v31 }
 0x5ca   : > { %4562 = vmatpush.bf16.msrb.mxu2 %v7347_v62  ;;  %4590 = vmatpush.bf16.msrb.mxu0 %v7351_v54  ;;  %v8540_v62 = vld [vmem:[#allocation14 + $0x56c] sm:$0xf0]  ;;  %v8538_v54 = vld [vmem:[#allocation14 + $0x564] sm:$0xf] }
 0x5cc   : > { %5079 = vmatpush.bf16.msrb.mxu3 %v7845_v55  ;;  %v8534_v55 = vld [vmem:[#allocation14 + $0x544] sm:$0xf] }
 0x5cd   : > { %4563 = vmatmul.bf16.vlgmr.msrb.gmra.mxu2 %v10125_v40  ;;  %4591 = vmatmul.bf16.vlgmr.msrb.gmra.mxu0 %v10125_v40  ;;  %v8556_v40 = vld [vmem:[#allocation14 + $0x5ec] sm:$0xf0] }
 0x5ce   : > { %4629 = vmatpush.bf16.msra.mxu2 %v10097_v1  ;;  %v7841_v63 = vor.u32 %v8556_v40, %v7840_v10  ;;  %5037 = vmatpush.bf16.msra.mxu0 %v7713_v57  ;;  %v8530_v57 = vld [vmem:[#allocation14 + $0x524] sm:$0xf] }
 0x5cf   : > { %v7749_v46 = vor.u32 %v8530_v57, %v7746_v38  ;;  %v8521_v38 = vld [vmem:[#allocation14 + $0x4d4] sm:$0xf0] }
 0x5d0   : > { %5051 = vmatpush.bf16.msrb.mxu1 %v7841_v63  ;;  %5080 = vmatpush.bf16.msrb.mxu3 %v7829_v36  ;;  %v7760_v63 = vld [vmem:[#allocation14 + $0x540] sm:$0xf]  ;;  %v8532_v36 = vld [vmem:[#allocation14 + $0x52c] sm:$0xf0] }
 0x5d1   : > { %v7761_v28 = vor.u32 %v8536_v25, %v7760_v63  ;;  %v7745_v44 = vor.u32 %v8532_v36, %v7744_v9  ;;  %v7818_v36 = vld [vmem:[#allocation14 + $0x5b8] sm:$0xf0] }
 0x5d2   : > { %5065 = vmatpush.bf16.msrb.mxu2 %v7717_v27  ;;  %5038 = vmatpush.bf16.msra.mxu0 %v7697_v60  ;;  %v8504_v27 = vld [vmem:[#allocation14 + $0x44c] sm:$0xf0] }
 0x5d3   : > { %v7633_v60 = vor.u32 %v8504_v27, %v7632_v7  ;;  %v8519_v7 = vld [vmem:[#allocation14 + $0x4cc] sm:$0xf] }
 0x5d4   : > { %5052 = vmatpush.bf16.msrb.mxu1 %v7825_v50  ;;  %5081 = vmatpush.bf16.msrb.mxu3 %v7813_v11  ;;  %v8508_v50 = vld [vmem:[#allocation14 + $0x46c] sm:$0xf0]  ;;  %v7616_v11 = vld [vmem:[#allocation14 + $0x420] sm:$0xf] }
 0x5d5   : > { %v7617_v6 = vor.u32 %v8500_v48, %v7616_v11  ;;  %v8541_v11 = vld [vmem:[#allocation14 + $0x574] sm:$0xf0]  ;;  %v8539_v48 = vld [vmem:[#allocation14 + $0x56c] sm:$0xf] }
 0x5d6   : > { %5066 = vmatpush.bf16.msrb.mxu2 %v7701_v15  ;;  %5039 = vmatpush.bf16.msra.mxu0 %v7681_v17  ;;  %v7637_v15 = vor.u32 %v8502_v35, %v7634_v58  ;;  %v7706_v35 = vld [vmem:[#allocation14 + $0x4d8] sm:$0xf0]  ;;  %v8517_v58 = vld [vmem:[#allocation14 + $0x4b4] sm:$0xf0] }
 0x5d7   : > { %7597 = vmatmul.msk.bf16.vlgmr.msra.gmra.mxu3 %vm3543_vm3, %v8493_v22 }
 0x5d8   : > { %5053 = vmatpush.bf16.msrb.mxu1 %v7809_v0  ;;  %5082 = vmatpush.bf16.msrb.mxu3 %v7797_v30  ;;  %v8526_v0 = vld [vmem:[#allocation14 + $0x504] sm:$0xf]  ;;  %v8555_v30 = vld [vmem:[#allocation14 + $0x5ec] sm:$0xf] }
 0x5d9   : > { %v7733_v29 = vor.u32 %v8526_v0, %v7730_v53  ;;  %v7802_v53 = vld [vmem:[#allocation14 + $0x598] sm:$0xf0] }
 0x5da   : > { %5067 = vmatpush.bf16.msrb.mxu2 %v7685_v39  ;;  %v7618_v39 = vld [vmem:[#allocation14 + $0x430] sm:$0xf0] }
 0x5dc   : > { %5054 = vmatpush.bf16.msrb.mxu1 %v7793_v5 }
 0x5dd   : > { %7596 = vmatmul.msk.bf16.vlgmr.msra.gmra.mxu2 %vm3543_vm3, %v8493_v22  ;;  %v7777_v22 = vor.u32 %v8540_v62, %v7776_v13  ;;  %v7850_v13 = vld [vmem:[#allocation14 + $0x5f8] sm:$0xf0]  ;;  %v7621_v62 = vor.u32 %v8498_v32, %v7618_v39  ;;  %v8511_v39 = vld [vmem:[#allocation14 + $0x48c] sm:$0xf] }
 0x5e0   : > { %5055 = vmatpush.bf16.msrb.mxu1 %v7777_v22  ;;  %v8553_v22 = vld [vmem:[#allocation14 + $0x5d4] sm:$0xf0] }
 0x5e4   : > { %5056 = vmatpush.bf16.msrb.mxu1 %v7761_v28  ;;  %v7722_v28 = vld [vmem:[#allocation14 + $0x4f8] sm:$0xf0] }
 0x5e8   : > { %5057 = vmatpush.bf16.msrb.mxu1 %v7745_v44  ;;  %v7704_v44 = vld [vmem:[#allocation14 + $0x4c8] sm:$0xf] }
 0x5e9   : > { %v7705_v27 = vor.u32 %v8521_v38, %v7704_v44  ;;  %v7626_v44 = vld [vmem:[#allocation14 + $0x438] sm:$0xf0] }
 0x5ea   : > { %v7754_v38 = vld [vmem:[#allocation14 + $0x538] sm:$0xf0] }
 0x5ec   : > { %5058 = vmatpush.bf16.msrb.mxu1 %v7729_v14  ;;  %v8543_v14 = vld [vmem:[#allocation14 + $0x58c] sm:$0xf] }
 0x604   : > { %v4118_v31 = vpop.f32.mrf.mxu1 }
 0x60a   : > { %v4104_v23 = vpop.f32.mrf.mxu0  ;;  %v4090_v45 = vpop.f32.mrf.mxu3 }
 0x60b   : > { %v10137_v19 = vadd.f32 %v4118_v31, %v4104_v23  ;;  %v7778_v31 = vld [vmem:[#allocation14 + $0x570] sm:$0xf0]  ;;  %v7664_v23 = vld [vmem:[#allocation14 + $0x480] sm:$0xf] }
 0x60c   : > { %v4120_v41 = vpop.f32.mrf.mxu1 }
 0x610   : > { %v4076_v26 = vpop.f32.mrf.mxu2 }
 0x611   : > { %v10139_v18 = vadd.f32 %v4090_v45, %v4076_v26  ;;  %v8512_v45 = vld [vmem:[#allocation14 + $0x48c] sm:$0xf0]  ;;  %v8510_v26 = vld [vmem:[#allocation14 + $0x484] sm:$0xf] }
 0x612   : > { %v4106_v34 = vpop.f32.mrf.mxu0  ;;  %v4092_v8 = vpop.f32.mrf.mxu3 }
 0x613   : > { %v10141_v1 = vadd.f32 %v4120_v41, %v4106_v34  ;;  %v7781_v41 = vor.u32 %v8538_v54, %v7778_v31  ;;  %v7665_v34 = vor.u32 %v8512_v45, %v7664_v23  ;;  %v7832_v54 = vld [vmem:[#allocation14 + $0x5c8] sm:$0xf]  ;;  %v8551_v31 = vld [vmem:[#allocation14 + $0x5cc] sm:$0xf]  ;;  %v7600_v23 = vld [vmem:[#allocation14 + $0x400] sm:$0xf] }
 0x614   : > { %v4174_v42 = vpop.f32.mrf.mxu1  ;;  %v8496_v45 = vld [vmem:[#allocation14 + $0x40c] sm:$0xf0] }
 0x615   : > { %5040 = vmatpush.bf16.msra.mxu0 %v7665_v34  ;;  %5083 = vmatpush.bf16.msrb.mxu3 %v7781_v41  ;;  %v7833_v41 = vor.u32 %v8553_v22, %v7832_v54  ;;  %v7601_v34 = vor.u32 %v8496_v45, %v7600_v23  ;;  %v7768_v54 = vld [vmem:[#allocation14 + $0x548] sm:$0xf]  ;;  %v8537_v22 = vld [vmem:[#allocation14 + $0x554] sm:$0xf0]  ;;  %v7770_v45 = vld [vmem:[#allocation14 + $0x558] sm:$0xf0] }
 0x616   : > { %v7769_v23 = vor.u32 %v8537_v22, %v7768_v54 }
 0x618   : > { %v4078_v43 = vpop.f32.mrf.mxu2 }
 0x619   : > { %v10143_v47 = vadd.f32 %v4092_v8, %v4078_v43  ;;  %v7666_v8 = vld [vmem:[#allocation14 + $0x490] sm:$0xf0] }
 0x61a   : > { %v4160_v59 = vpop.f32.mrf.mxu0  ;;  %v4146_v33 = vpop.f32.mrf.mxu3  ;;  %v7669_v12 = vor.u32 %v8510_v26, %v7666_v8  ;;  %v8494_v26 = vld [vmem:[#allocation14 + $0x404] sm:$0xf]  ;;  %v7602_v8 = vld [vmem:[#allocation14 + $0x410] sm:$0xf0] }
 0x61b   : > { %v10145_v52 = vadd.f32 %v4174_v42, %v4160_v59  ;;  %v7765_v59 = vor.u32 %v8534_v55, %v7762_v61  ;;  %v7649_v42 = vor.u32 %v8508_v50, %v7648_v20  ;;  %v7605_v63 = vor.u32 %v8494_v26, %v7602_v8  ;;  %v8523_v55 = vld [vmem:[#allocation14 + $0x4ec] sm:$0xf]  ;;  %v7834_v61 = vld [vmem:[#allocation14 + $0x5d8] sm:$0xf0] }
 0x61c   : > { %5068 = vmatpush.bf16.msrb.mxu2 %v7669_v12  ;;  %v7725_v50 = vor.u32 %v8523_v55, %v7722_v28  ;;  %v7837_v16 = vor.u32 %v8551_v31, %v7834_v61  ;;  %v8535_v31 = vld [vmem:[#allocation14 + $0x54c] sm:$0xf]  ;;  %v7642_v61 = vld [vmem:[#allocation14 + $0x458] sm:$0xf0] }
 0x61d   : > { %5041 = vmatpush.bf16.msra.mxu0 %v7649_v42  ;;  %5084 = vmatpush.bf16.msrb.mxu3 %v7765_v59  ;;  %v7816_v59 = vld [vmem:[#allocation14 + $0x5a8] sm:$0xf]  ;;  %v8549_v42 = vld [vmem:[#allocation14 + $0x5b4] sm:$0xf0]  ;;  %v8507_v8 = vld [vmem:[#allocation14 + $0x46c] sm:$0xf] }
 0x61e   : > { %v7817_v9 = vor.u32 %v8549_v42, %v7816_v59  ;;  %v8503_v28 = vld [vmem:[#allocation14 + $0x44c] sm:$0xf]  ;;  %v7624_v42 = vld [vmem:[#allocation14 + $0x428] sm:$0xf] }
 0x61f   : > { %v7645_v59 = vor.u32 %v8503_v28, %v7642_v61  ;;  %v10168_v28 = vld [vmem:[%s10310_s9] sm:$0xf]  ;;  %s9162_s9 = scalar_lea.hbm %s9161_s16, 4 }
 0x620   : > { %v4132_v4 = vpop.f32.mrf.mxu2  ;;  %5069 = vmatpush.bf16.msrb.mxu2 %v7653_v3  ;;  %p9163_p1 = scmp.ne.s32.totalorder %s9161_s16, %s9162_s9 }
 0x621   : > { %v10147_v49 = vadd.f32 %v4146_v33, %v4132_v4  ;;  %5042 = vmatpush.bf16.msra.mxu0 %v7633_v60  ;;  %v8557_v4 = vld [vmem:[#allocation14 + $0x5f4] sm:$0xf0]  ;;  %5085 = vmatpush.bf16.msrb.mxu3 %v7749_v46  ;;  %v7709_v46 = vor.u32 %v8519_v7, %v7706_v35  ;;  %v7688_v60 = vld [vmem:[#allocation14 + $0x4a8] sm:$0xf] }
 0x622   : > { %v4148_v40 = vpop.f32.mrf.mxu3  ;;  %v7849_v17 = vor.u32 %v8557_v4, %v7848_v21  ;;  %v7805_v21 = vor.u32 %v8543_v14, %v7802_v53  ;;  %v7784_v4 = vld [vmem:[#allocation14 + $0x568] sm:$0xf]  ;;  %v8529_v35 = vld [vmem:[#allocation14 + $0x514] sm:$0xf0]  ;;  %v8495_v53 = vld [vmem:[#allocation14 + $0x40c] sm:$0xf]  ;;  %p9164_p3 = pnand %p9163_p1, %p9467_p0 }
 0x623   : > { %v7785_v32 = vor.u32 %v8541_v11, %v7784_v4 }
 0x624   : > { %5070 = vmatpush.bf16.msrb.mxu2 %v7637_v15  ;;  %5107 = vmatpush.bf16.msra.mxu1 %v7849_v17  ;;  %v7690_v15 = vld [vmem:[#allocation14 + $0x4b8] sm:$0xf0]  ;;  %v7672_v17 = vld [vmem:[#allocation14 + $0x488] sm:$0xf]  ;;  %p9165_p5 = pneg %p9164_p3 }
 0x625   : > { %5043 = vmatpush.bf16.msra.mxu0 %v7617_v6  ;;  %5086 = vmatpush.bf16.msrb.mxu3 %v7733_v29  ;;  %v7786_v29 = vld [vmem:[#allocation14 + $0x578] sm:$0xf0]  ;;  %v8513_v6 = vld [vmem:[#allocation14 + $0x494] sm:$0xf0] }
 0x628   : > { %v4134_v10 = vpop.f32.mrf.mxu2  ;;  %5071 = vmatpush.bf16.msrb.mxu2 %v7621_v62  ;;  %5108 = vmatpush.bf16.msra.mxu1 %v7833_v41  ;;  %v7674_v62 = vld [vmem:[#allocation14 + $0x498] sm:$0xf0]  ;;  %v7656_v41 = vld [vmem:[#allocation14 + $0x468] sm:$0xf] }
 0x629   : > { %v10149_v43 = vadd.f32 %v4148_v40, %v4134_v10  ;;  %v7720_v10 = vld [vmem:[#allocation14 + $0x4e8] sm:$0xf]  ;;  %v8525_v40 = vld [vmem:[#allocation14 + $0x4f4] sm:$0xf0]  ;;  %5044 = vmatpush.bf16.msra.mxu0 %v7601_v34 }
 0x62a   : > { %v4522_v33 = vpop.f32.mrf.mxu3  ;;  %v7721_v25 = vor.u32 %v8525_v40, %v7720_v10  ;;  %v8509_v34 = vld [vmem:[#allocation14 + $0x474] sm:$0xf0]  ;;  %v7773_v10 = vor.u32 %v8535_v31, %v7770_v45 }
 0x62b   : > { %v7657_v40 = vor.u32 %v8509_v34, %v7656_v41 }
 0x62c   : > { %5072 = vmatpush.bf16.msrb.mxu2 %v7605_v63  ;;  %5109 = vmatpush.bf16.msra.mxu1 %v7817_v9  ;;  %v7640_v63 = vld [vmem:[#allocation14 + $0x448] sm:$0xf]  ;;  %v8531_v9 = vld [vmem:[#allocation14 + $0x52c] sm:$0xf] }
 0x62d   : > { %5093 = vmatpush.bf16.msrb.mxu0 %v7721_v25  ;;  %v8505_v25 = vld [vmem:[#allocation14 + $0x454] sm:$0xf0] }
 0x630   : > { %v4508_v37 = vpop.f32.mrf.mxu2  ;;  %5121 = vmatpush.bf16.msra.mxu2 %v7725_v50  ;;  %v7752_v50 = vld [vmem:[#allocation14 + $0x528] sm:$0xf] }
 0x631   : > { %v4509_v24 = vadd.f32 %v4508_v37, %v10139_v18  ;;  %v7853_v18 = vor.u32 %v8555_v30, %v7850_v13  ;;  %v8515_v37 = vld [vmem:[#allocation14 + $0x4ac] sm:$0xf]  ;;  %5094 = vmatpush.bf16.msrb.mxu0 %v7705_v27  ;;  %v7789_v30 = vor.u32 %v8539_v48, %v7786_v29  ;;  %v7673_v13 = vor.u32 %v8513_v6, %v7672_v17  ;;  %v7736_v27 = vld [vmem:[#allocation14 + $0x508] sm:$0xf] }
 0x632   : > { %v4524_v3 = vpop.f32.mrf.mxu3  ;;  %v7693_v0 = vor.u32 %v8515_v37, %v7690_v15  ;;  %v8527_v37 = vld [vmem:[#allocation14 + $0x50c] sm:$0xf] }
 0x633   : > { %v10152_v5 = vadd.f32 %v4522_v33, %v4509_v24  ;;  %5135 = vmatpush.bf16.msra.mxu3 %v7853_v18  ;;  %v7689_v33 = vor.u32 %v8517_v58, %v7688_v60  ;;  %v7801_v24 = vor.u32 %v8545_v56, %v7800_v51  ;;  %v7677_v18 = vor.u32 %v8511_v39, %v7674_v62  ;;  %v7608_v56 = vld [vmem:[#allocation14 + $0x408] sm:$0xf]  ;;  %v4176_v62 = vpop.f32.mrf.mxu1 }
 0x634   : > { %5122 = vmatpush.bf16.msra.mxu2 %v7709_v46  ;;  %v7737_v58 = vor.u32 %v8529_v35, %v7736_v27  ;;  %v8586_v35 = vld [vmem:[#allocation17 + $0xe4] sm:$0xf] }
 0x635   : > { %5110 = vmatpush.bf16.msra.mxu1 %v7801_v24  ;;  %5095 = vmatpush.bf16.msrb.mxu0 %v7689_v33  ;;  %v7738_v33 = vld [vmem:[#allocation14 + $0x518] sm:$0xf0] }
 0x636   : > { %v7741_v24 = vor.u32 %v8527_v37, %v7738_v33 }
 0x637   : > { %5136 = vmatpush.bf16.msra.mxu3 %v7837_v16  ;;  %v8533_v16 = vld [vmem:[#allocation14 + $0x534] sm:$0xf0] }
 0x638   : > { %v4510_v12 = vpop.f32.mrf.mxu2  ;;  %5123 = vmatpush.bf16.msra.mxu2 %v7693_v0  ;;  %v8497_v0 = vld [vmem:[#allocation14 + $0x414] sm:$0xf0] }
 0x639   : > { %v4511_v20 = vadd.f32 %v4510_v12, %v10143_v47  ;;  %v7821_v47 = vor.u32 %v8547_v2, %v7818_v36  ;;  %5111 = vmatpush.bf16.msra.mxu1 %v7785_v32  ;;  %5096 = vmatpush.bf16.msrb.mxu0 %v7673_v13  ;;  %v7658_v12 = vld [vmem:[#allocation14 + $0x478] sm:$0xf0]  ;;  %v8501_v2 = vld [vmem:[#allocation14 + $0x434] sm:$0xf0]  ;;  %v8499_v36 = vld [vmem:[#allocation14 + $0x42c] sm:$0xf]  ;;  %v7609_v4 = vor.u32 %v8497_v0, %v7608_v56 }
 0x63a   : > { %v7661_v55 = vor.u32 %v8507_v8, %v7658_v12  ;;  %v7625_v60 = vor.u32 %v8501_v2, %v7624_v42  ;;  %v7629_v51 = vor.u32 %v8499_v36, %v7626_v44  ;;  %v5161_v44 = vperm.slane %v10168_v28, 2 }
 0x63b   : > { %v10155_v57 = vadd.f32 %v4524_v3, %v4511_v20  ;;  %5137 = vmatpush.bf16.msra.mxu3 %v7821_v47  ;;  %v7641_v20 = vor.u32 %v8505_v25, %v7640_v63  ;;  %v7753_v3 = vor.u32 %v8533_v16, %v7752_v50  ;;  %v7757_v47 = vor.u32 %v8531_v9, %v7754_v38 }
 0x63c   : > { %5124 = vmatpush.bf16.msra.mxu2 %v7677_v18  ;;  %v4550_v18 = vpop.f32.mrf.mxu1  ;;  %v5159_v50 = vperm.slane %v10168_v28, 0 }
 0x63d   : > { %5112 = vmatpush.bf16.msra.mxu1 %v7769_v23  ;;  %5097 = vmatpush.bf16.msrb.mxu0 %v7657_v40 }
 0x63f   : > { %5138 = vmatpush.bf16.msra.mxu3 %v7805_v21  ;;  %v7610_v21 = vld [vmem:[#allocation14 + $0x418] sm:$0xf0] }
 0x640   : > { %5125 = vmatpush.bf16.msra.mxu2 %v7661_v55 }
 0x641   : > { %5113 = vmatpush.bf16.msra.mxu1 %v7753_v3  ;;  %5098 = vmatpush.bf16.msrb.mxu0 %v7641_v20 }
 0x643   : > { %5139 = vmatpush.bf16.msra.mxu3 %v7789_v30 }
 0x644   : > { %5126 = vmatpush.bf16.msra.mxu2 %v7645_v59  ;;  %v10161_v22 = vpop.f32.mrf.mxu1 }
 0x645   : > { %5114 = vmatpush.bf16.msra.mxu1 %v7737_v58  ;;  %5099 = vmatpush.bf16.msrb.mxu0 %v7625_v60 }
 0x647   : > { %5140 = vmatpush.bf16.msra.mxu3 %v7773_v10 }
 0x648   : > { %5127 = vmatpush.bf16.msra.mxu2 %v7629_v51  ;;  %v8582_v51 = vld [vmem:[#allocation17 + $0xc4] sm:$0xf] }
 0x649   : > { %5100 = vmatpush.bf16.msrb.mxu0 %v7609_v4 }
 0x64a   : > { %v4578_v26 = vpop.f32.mrf.mxu3 }
 0x64b   : > { %5141 = vmatpush.bf16.msra.mxu3 %v7757_v47  ;;  %v5160_v47 = vperm.slane %v10168_v28, 1 }
 0x64c   : > { %v4606_v23 = vpop.f32.mrf.mxu1 }
 0x64f   : > { %5142 = vmatpush.bf16.msra.mxu3 %v7741_v24  ;;  %v5162_v24 = vperm.slane %v10168_v28, 3  ;;  %v7875_v28 = vld [vmem:[#allocation17 + $0x30] sm:$0xf0] }
 0x650   : > { %v4564_v7 = vpop.f32.mrf.mxu2 }
 0x651   : > { %v4565_v46 = vadd.f32 %v4564_v7, %v10147_v49  ;;  %v7613_v49 = vor.u32 %v8495_v53, %v7610_v21  ;;  %v7961_v21 = vld [vmem:[#allocation17 + $0xc8] sm:$0xf] }
 0x652   : > { %v4580_v15 = vpop.f32.mrf.mxu3 }
 0x653   : > { %v4579_v14 = vadd.f32 %v4578_v26, %v4565_v46  ;;  %5128 = vmatpush.bf16.msra.mxu2 %v7613_v49  ;;  %v7977_v46 = vld [vmem:[#allocation17 + $0xe8] sm:$0xf] }
 0x654   : > { %v10163_v26 = vpop.f32.mrf.mxu1 }
 0x658   : > { %v4566_v11 = vpop.f32.mrf.mxu2 }
 0x659   : > { %v4567_v48 = vadd.f32 %v4566_v11, %v10149_v43  ;;  %v4162_v43 = vpop.f32.mrf.mxu0 }
 0x65a   : > { %v4645_v32 = vpop.f32.mrf.mxu3  ;;  %v4177_v60 = vadd.f32 %v4176_v62, %v4162_v43  ;;  %v8578_v62 = vld [vmem:[#allocation17 + $0xa4] sm:$0xf]  ;;  %v7939_v43 = vld [vmem:[#allocation17 + $0xb0] sm:$0xf0] }
 0x65b   : > { %v10159_v29 = vadd.f32 %v4580_v15, %v4567_v48  ;;  %v8589_v15 = vld [vmem:[#allocation17 + $0xf4] sm:$0xf0] }
 0x65c   : > { %v7978_v53 = vor.u32 %v8589_v15, %v7977_v46 }
 0x660   : > { %v4631_v17 = vpop.f32.mrf.mxu2 }
 0x661   : > { %v4536_v54 = vpop.f32.mrf.mxu0 }
 0x662   : > { %v4647_v6 = vpop.f32.mrf.mxu3  ;;  %v4537_v61 = vadd.f32 %v4536_v54, %v10137_v19 }
 0x663   : > { %v4651_v39 = vpack.c.bf16 %v4647_v6, %v4645_v32  ;;  %v7969_v32 = vld [vmem:[#allocation17 + $0xe0] sm:$0xf] }
 0x664   : > { %v4551_v2 = vadd.f32 %v4550_v18, %v4537_v61  ;;  %v7942_v61 = vor.u32 %v8578_v62, %v7939_v43 }
 0x665   : > { %5059 = vmatmul.bf16.vlgmr.msrb.gmra.mxu1 %v4651_v39  ;;  %5087 = vmatmul.bf16.vlgmr.msrb.gmra.mxu3 %v4651_v39 }
 0x666   : > { %5442 = vmatpush.bf16.msrb.mxu3 %v7978_v53 }
 0x668   : > { %v4633_v30 = vpop.f32.mrf.mxu2 }
 0x669   : > { %v4650_v13 = vpack.c.bf16 %v4633_v30, %v4631_v17  ;;  %v4538_v31 = vpop.f32.mrf.mxu0  ;;  %v8588_v17 = vld [vmem:[#allocation17 + $0xec] sm:$0xf0] }
 0x66a   : > { %v4539_v58 = vadd.f32 %v4538_v31, %v10141_v1 }
 0x66b   : > { %5045 = vmatmul.bf16.vlgmr.msra.gmra.mxu0 %v4650_v13  ;;  %5073 = vmatmul.bf16.vlgmr.msrb.gmra.mxu2 %v4650_v13 }
 0x671   : > { %v4592_v45 = vpop.f32.mrf.mxu0 }
 0x672   : > { %v4593_v9 = vadd.f32 %v4592_v45, %v10145_v52  ;;  %v7955_v52 = vld [vmem:[#allocation17 + $0xd0] sm:$0xf0]  ;;  %v8581_v45 = vld [vmem:[#allocation17 + $0xb4] sm:$0xf0] }
 0x673   : > { %v7958_v48 = vor.u32 %v8582_v51, %v7955_v52  ;;  %v7907_v52 = vld [vmem:[#allocation17 + $0x70] sm:$0xf0] }
 0x674   : > { %v4607_v56 = vadd.f32 %v4606_v23, %v4593_v9  ;;  %v7945_v23 = vld [vmem:[#allocation17 + $0xa8] sm:$0xf] }
 0x675   : > { %5115 = vmatmul.bf16.vlgmr.msra.gmra.mxu1 %v4651_v39  ;;  %5143 = vmatmul.bf16.vlgmr.msra.gmra.mxu3 %v4651_v39  ;;  %v7929_v9 = vld [vmem:[#allocation17 + $0x88] sm:$0xf] }
 0x679   : > { %v4594_v41 = vpop.f32.mrf.mxu0 }
 0x67a   : > { %v4595_v18 = vadd.f32 %v4594_v41, %v4177_v60  ;;  %v8570_v60 = vld [vmem:[#allocation17 + $0x64] sm:$0xf] }
 0x67b   : > { %5101 = vmatmul.bf16.vlgmr.msrb.gmra.mxu0 %v4650_v13  ;;  %5129 = vmatmul.bf16.vlgmr.msra.gmra.mxu2 %v4650_v13  ;;  %v7970_v13 = vor.u32 %v8588_v17, %v7969_v32  ;;  %v8566_v17 = vld [vmem:[#allocation17 + $0x44] sm:$0xf] }
 0x67d   : > { %5416 = vmatpush.bf16.msrb.mxu1 %v7970_v13 }
 0x6e2   : > { %v5060_v34 = vpop.f32.mrf.mxu1 }
 0x6e8   : > { %v5046_v8 = vpop.f32.mrf.mxu0  ;;  %v5088_v10 = vpop.f32.mrf.mxu3 }
 0x6e9   : > { %v5061_v25 = vadd.f32 %v5060_v34, %v5046_v8 }
 0x6ea   : > { %v5062_v40 = vpop.f32.mrf.mxu1 }
 0x6eb   : > { %v5149_v20 = vadd.f32 %v5061_v25, %v10152_v5  ;;  %v7971_v5 = vld [vmem:[#allocation17 + $0xf0] sm:$0xf0] }
 0x6ec   : > { %v7974_v33 = vor.u32 %v8586_v35, %v7971_v5 }
 0x6ed   : > { %v5167_v38 = vadd.f32 %v5159_v50, %v5149_v20 }
 0x6ee   : > { %v5074_v12 = vpop.f32.mrf.mxu2  ;;  %5429 = vmatpush.bf16.msrb.mxu2 %v7974_v33 }
 0x6ef   : > { %v5089_v16 = vadd.f32 %v5088_v10, %v5074_v12  ;;  %v5175_v4 = vmax.f32 %v5167_v38, 0.0  ;;  %v8584_v12 = vld [vmem:[#allocation17 + $0xcc] sm:$0xf0] }
 0x6f0   : > { %v5048_v63 = vpop.f32.mrf.mxu0  ;;  %v5090_v55 = vpop.f32.mrf.mxu3  ;;  %v8580_v38 = vld [vmem:[#allocation17 + $0xac] sm:$0xf0] }
 0x6f1   : > { %v5150_v7 = vadd.f32 %v5089_v16, %v4551_v2  ;;  %v5063_v27 = vadd.f32 %v5062_v40, %v5048_v63  ;;  %v7953_v40 = vld [vmem:[#allocation17 + $0xc0] sm:$0xf]  ;;  %v4553_v16 = vadd.f32 %v10161_v22, %v4539_v58  ;;  %v7923_v2 = vld [vmem:[#allocation17 + $0x90] sm:$0xf0] }
 0x6f2   : > { %v5116_v42 = vpop.f32.mrf.mxu1  ;;  %5430 = vmatpush.bf16.msrb.mxu2 %v7958_v48  ;;  %v7954_v20 = vor.u32 %v8584_v12, %v7953_v40  ;;  %v7921_v58 = vld [vmem:[#allocation17 + $0x80] sm:$0xf] }
 0x6f3   : > { %v5168_v49 = vadd.f32 %v5160_v47, %v5150_v7  ;;  %v5153_v1 = vadd.f32 %v5063_v27, %v10155_v57 }
 0x6f4   : > { %5417 = vmatpush.bf16.msrb.mxu1 %v7954_v20 }
 0x6f5   : > { %v5176_v63 = vmax.f32 %v5168_v49, 0.0  ;;  %v5171_v25 = vadd.f32 %v5159_v50, %v5153_v1  ;;  %v7905_v49 = vld [vmem:[#allocation17 + $0x60] sm:$0xf]  ;;  %v8572_v1 = vld [vmem:[#allocation17 + $0x6c] sm:$0xf0] }
 0x6f6   : > { %v5076_v59 = vpop.f32.mrf.mxu2  ;;  %5431 = vmatpush.bf16.msrb.mxu2 %v7942_v61  ;;  %v7906_v62 = vor.u32 %v8572_v1, %v7905_v49  ;;  %v7963_v61 = vld [vmem:[#allocation17 + $0xd8] sm:$0xf0] }
 0x6f7   : > { %v5091_v34 = vadd.f32 %v5090_v55, %v5076_v59  ;;  %v7946_v55 = vor.u32 %v8581_v45, %v7945_v23  ;;  %v8574_v59 = vld [vmem:[#allocation17 + $0x84] sm:$0xf]  ;;  %v5179_v35 = vmax.f32 %v5171_v25, 0.0  ;;  %v8565_v23 = vld [vmem:[#allocation17 + $0x34] sm:$0xf0]  ;;  %v8605_v1 = vld [vmem:[#allocation20 + $0x78] sm:$0xff] }
 0x6f8   : > { %v5102_v3 = vpop.f32.mrf.mxu0  ;;  %v5144_v37 = vpop.f32.mrf.mxu3  ;;  %v7926_v46 = vor.u32 %v8574_v59, %v7923_v2  ;;  %v8583_v25 = vld [vmem:[#allocation17 + $0xcc] sm:$0xf] }
 0x6f9   : > { %v5117_v36 = vadd.f32 %v5116_v42, %v5102_v3  ;;  %v7937_v3 = vld [vmem:[#allocation17 + $0xa0] sm:$0xf]  ;;  %v5154_v7 = vadd.f32 %v5091_v34, %v4553_v16  ;;  %v8587_v34 = vld [vmem:[#allocation17 + $0xec] sm:$0xf]  ;;  %v5190_v16 = vld [vmem:[#allocation16] sm:$0x3] }
 0x6fa   : > { %v5118_v31 = vpop.f32.mrf.mxu1  ;;  %v7938_v22 = vor.u32 %v8580_v38, %v7937_v3  ;;  %5432 = vmatpush.bf16.msrb.mxu2 %v7926_v46  ;;  %v8575_v2 = vld [vmem:[#allocation17 + $0x8c] sm:$0xf]  ;;  %v7931_v3 = vld [vmem:[#allocation17 + $0x98] sm:$0xf0]  ;;  %v8564_v46 = vld [vmem:[#allocation17 + $0x2c] sm:$0xf0] }
 0x6fb   : > { %v5151_v19 = vadd.f32 %v5117_v36, %v4579_v14  ;;  %v8585_v14 = vld [vmem:[#allocation17 + $0xd4] sm:$0xf0]  ;;  %v5172_v53 = vadd.f32 %v5160_v47, %v5154_v7  ;;  %v7915_v38 = vld [vmem:[#allocation17 + $0x78] sm:$0xf0] }
 0x6fc   : > { %v7962_v30 = vor.u32 %v8585_v14, %v7961_v21  ;;  %v8577_v36 = vld [vmem:[#allocation17 + $0x94] sm:$0xf0]  ;;  %5418 = vmatpush.bf16.msrb.mxu1 %v7938_v22  ;;  %v8567_v22 = vld [vmem:[#allocation17 + $0x4c] sm:$0xf] }
 0x6fd   : > { %v5169_v0 = vadd.f32 %v5161_v44, %v5151_v19  ;;  %v4609_v19 = vadd.f32 %v10163_v26, %v4595_v18  ;;  %v7930_v51 = vor.u32 %v8577_v36, %v7929_v9  ;;  %v5180_v47 = vmax.f32 %v5172_v53, 0.0  ;;  %v8571_v36 = vld [vmem:[#allocation17 + $0x6c] sm:$0xf]  ;;  %v8560_v53 = vld [vmem:[#allocation17 + $0xc] sm:$0xf0] }
 0x6fe   : > { %v5130_v11 = vpop.f32.mrf.mxu2  ;;  %5443 = vmatpush.bf16.msrb.mxu3 %v7962_v30  ;;  %v8569_v30 = vld [vmem:[#allocation17 + $0x54] sm:$0xf0]  ;;  %v7934_v9 = vor.u32 %v8575_v2, %v7931_v3  ;;  %v7918_v7 = vor.u32 %v8571_v36, %v7915_v38  ;;  %v8606_v2 = vld [vmem:[#allocation20 + $0x80] sm:$0xff]  ;;  %v5246_v3 = vld [vmem:[#allocation19] sm:$0xf] }
 0x6ff   : > { %v5177_v6 = vmax.f32 %v5169_v0, 0.0  ;;  %v5145_v39 = vadd.f32 %v5144_v37, %v5130_v11  ;;  %v7913_v0 = vld [vmem:[#allocation17 + $0x68] sm:$0xf]  ;;  %v5251_v36 = vperm.slane %v5246_v3, 3 }
 0x700   : > { %v5104_v54 = vpop.f32.mrf.mxu0 }
 0x701   : > { %v10183_v8 = vmax.f32 %v5175_v4, %v5177_v6  ;;  %v5152_v57 = vadd.f32 %v5145_v39, %v4607_v56  ;;  %v5119_v10 = vadd.f32 %v5118_v31, %v5104_v54  ;;  %v8576_v56 = vld [vmem:[#allocation17 + $0x8c] sm:$0xf0]  ;;  %v7910_v4 = vor.u32 %v8570_v60, %v7907_v52  ;;  %v7891_v6 = vld [vmem:[#allocation17 + $0x50] sm:$0xf0]  ;;  %v7897_v39 = vld [vmem:[#allocation17 + $0x48] sm:$0xf] }
 0x702   : > { %5444 = vmatpush.bf16.msrb.mxu3 %v7946_v55  ;;  %v7922_v14 = vor.u32 %v8576_v56, %v7921_v58  ;;  %v7894_v43 = vor.u32 %v8566_v17, %v7891_v6  ;;  %v7898_v54 = vor.u32 %v8569_v30, %v7897_v39  ;;  %v8562_v31 = vld [vmem:[#allocation17 + $0x24] sm:$0xf]  ;;  %v7947_v55 = vld [vmem:[#allocation17 + $0xb8] sm:$0xf0]  ;;  %v8563_v60 = vld [vmem:[#allocation17 + $0x2c] sm:$0xf] }
 0x703   : > { %v5170_v41 = vadd.f32 %v5162_v24, %v5152_v57  ;;  %v5155_v42 = vadd.f32 %v5119_v10, %v10159_v29  ;;  %v5146_v29 = vpop.f32.mrf.mxu3  ;;  %5433 = vmatpush.bf16.msrb.mxu2 %v7910_v4  ;;  %v7878_v57 = vor.u32 %v8562_v31, %v7875_v28  ;;  %v7865_v52 = vld [vmem:[#allocation17 + $0x8] sm:$0xf]  ;;  %v7867_v4 = vld [vmem:[#allocation17 + $0x18] sm:$0xf0]  ;;  %v8604_v17 = vld [vmem:[#allocation20 + $0x70] sm:$0xff] }
 0x704   : > { %5419 = vmatpush.bf16.msrb.mxu1 %v7922_v14  ;;  %v8559_v14 = vld [vmem:[#allocation17 + $0xc] sm:$0xf]  ;;  %v8596_v6 = vld [vmem:[#allocation20 + $0x30] sm:$0xff]  ;;  %v8610_v31 = vld [vmem:[#allocation20 + $0xa0] sm:$0xff] }
 0x705   : > { %v5178_v50 = vmax.f32 %v5170_v41, 0.0  ;;  %v5173_v27 = vadd.f32 %v5161_v44, %v5155_v42  ;;  %v8573_v44 = vld [vmem:[#allocation17 + $0x74] sm:$0xf0]  ;;  %v7966_v41 = vor.u32 %v8583_v25, %v7963_v61  ;;  %v8579_v42 = vld [vmem:[#allocation17 + $0xac] sm:$0xf]  ;;  %v7870_v49 = vor.u32 %v8559_v14, %v7867_v4  ;;  %v8618_v28 = vld [vmem:[#allocation20 + $0xe0] sm:$0xff] }
 0x706   : > { %v5132_v5 = vpop.f32.mrf.mxu2  ;;  %5445 = vmatpush.bf16.msrb.mxu3 %v7930_v51  ;;  %v7914_v32 = vor.u32 %v8573_v44, %v7913_v0  ;;  %v7950_v59 = vor.u32 %v8579_v42, %v7947_v55  ;;  %v7859_v51 = vld [vmem:[#allocation17 + $0x10] sm:$0xf0]  ;;  %v8561_v0 = vld [vmem:[#allocation17 + $0x14] sm:$0xf0]  ;;  %v7857_v44 = vld [vmem:[#allocation17] sm:$0xf] }
 0x707   : > { %v5184_v37 = vmax.f32 %v5176_v63, %v5178_v50  ;;  %v5181_v33 = vmax.f32 %v5173_v27, 0.0  ;;  %v5147_v15 = vadd.f32 %v5146_v29, %v5132_v5  ;;  %5434 = vmatpush.bf16.msrb.mxu2 %v7894_v43  ;;  %v7889_v50 = vld [vmem:[#allocation17 + $0x40] sm:$0xf]  ;;  %v8568_v27 = vld [vmem:[#allocation17 + $0x4c] sm:$0xf0]  ;;  %v8612_v39 = vld [vmem:[#allocation20 + $0xb0] sm:$0xff] }
 0x708   : > { %5420 = vmatpush.bf16.msrb.mxu1 %v7906_v62  ;;  %v7873_v29 = vld [vmem:[#allocation17 + $0x20] sm:$0xf]  ;;  %v8620_v30 = vld [vmem:[#allocation20 + $0xf0] sm:$0xff]  ;;  %v8611_v62 = vld [vmem:[#allocation20 + $0xa8] sm:$0xff] }
 0x709   : > { %v5185_v26 = vmax.f32 %v5179_v35, %v5181_v33  ;;  %v5156_v21 = vadd.f32 %v5147_v15, %v4609_v19  ;;  %v7890_v19 = vor.u32 %v8568_v27, %v7889_v50  ;;  %v7899_v35 = vld [vmem:[#allocation17 + $0x58] sm:$0xf0]  ;;  %v7874_v58 = vor.u32 %v8564_v46, %v7873_v29  ;;  %v8558_v15 = vld [vmem:[#allocation17 + $0x4] sm:$0xf]  ;;  %v8619_v43 = vld [vmem:[#allocation20 + $0xe8] sm:$0xff] }
 0x70a   : > { %5446 = vmatpush.bf16.msrb.mxu3 %v7914_v32  ;;  %v7902_v5 = vor.u32 %v8567_v22, %v7899_v35  ;;  %v7862_v56 = vor.u32 %v8558_v15, %v7859_v51  ;;  %v8621_v32 = vld [vmem:[#allocation20 + $0xf8] sm:$0xff]  ;;  %v8591_v61 = vld [vmem:[#allocation20 + $0x8] sm:$0xff]  ;;  %v5249_v22 = vperm.slane %v5246_v3, 1 }
 0x70b   : > { %v5174_v11 = vadd.f32 %v5162_v24, %v5156_v21  ;;  %v5187_v48 = vmax.f32 %v10183_v8, %v5185_v26  ;;  %v7881_v24 = vld [vmem:[#allocation17 + $0x28] sm:$0xf]  ;;  %v7979_v8 = vld [vmem:[#allocation17 + $0xf8] sm:$0xf0]  ;;  %5435 = vmatpush.bf16.msrb.mxu2 %v7878_v57  ;;  %v7866_v26 = vor.u32 %v8561_v0, %v7865_v52  ;;  %v7858_v21 = vor.u32 %v8560_v53, %v7857_v44  ;;  %v8592_v57 = vld [vmem:[#allocation20 + $0x10] sm:$0xff] }
 0x70c   : > { %v7882_v40 = vor.u32 %v8565_v23, %v7881_v24  ;;  %v7982_v63 = vor.u32 %v8587_v34, %v7979_v8  ;;  %5421 = vmatpush.bf16.msrb.mxu1 %v7890_v19  ;;  %v8601_v24 = vld [vmem:[#allocation20 + $0x58] sm:$0xff]  ;;  %v8600_v8 = vld [vmem:[#allocation20 + $0x50] sm:$0xff]  ;;  %v8599_v42 = vld [vmem:[#allocation20 + $0x48] sm:$0xff]  ;;  %v5250_v19 = vperm.slane %v5246_v3, 2 }
 0x70d   : > { %v5182_v13 = vmax.f32 %v5174_v11, 0.0  ;;  %v8597_v11 = vld [vmem:[#allocation20 + $0x38] sm:$0xff]  ;;  %v8607_v55 = vld [vmem:[#allocation20 + $0x88] sm:$0xff] }
 0x70e   : > { %5447 = vmatpush.bf16.msrb.mxu3 %v7898_v54  ;;  %v8594_v54 = vld [vmem:[#allocation20 + $0x20] sm:$0xff]  ;;  %v8593_v23 = vld [vmem:[#allocation20 + $0x18] sm:$0xff]  ;;  %v8785_v4 = vld [vmem:[%s10311_s23] ss:$0 sm:$0xff]  ;;  %s9166_s23 = scalar_lea.hbm %s10312_s5, 8 }
 0x70f   : > { %v5186_v18 = vmax.f32 %v5180_v47, %v5182_v13  ;;  %5436 = vmatpush.bf16.msrb.mxu2 %v7862_v56  ;;  %v8603_v47 = vld [vmem:[#allocation20 + $0x68] sm:$0xff]  ;;  %v8617_v34 = vld [vmem:[#allocation20 + $0xd8] sm:$0xff]  ;;  %p9168_p7 = scmp.lt.s32.totalorder %s9166_s23, %s9162_s9 }
 0x710   : > { %5422 = vmatpush.bf16.msrb.mxu1 %v7874_v58  ;;  %v8595_v13 = vld [vmem:[#allocation20 + $0x28] sm:$0xff] }
 0x711   : > { %v5188_v45 = vmax.f32 %v5184_v37, %v5186_v18  ;;  %v7883_v37 = vld [vmem:[#allocation17 + $0x38] sm:$0xf0]  ;;  %v8602_v18 = vld [vmem:[#allocation20 + $0x60] sm:$0xff]  ;;  %p9169_p8 = por %p9168_p7, %p9167_p13 }
 0x712   : > { %5448 = vmatpush.bf16.msrb.mxu3 %v7882_v40  ;;  %v7886_v33 = vor.u32 %v8563_v60, %v7883_v37  ;;  %v8616_v40 = vld [vmem:[#allocation20 + $0xd0] sm:$0xff] }
 0x713   : > { %v5189_v10 = vadd.f32 %v5188_v45, %v5187_v48  ;;  %v8613_v48 = vld [vmem:[#allocation20 + $0xb8] sm:$0xff]  ;;  %5749 = vmatpush.bf16.msra.mxu2 %v8605_v1  ;;  %p9170_p9 = pnand %p9169_p8, %p9165_p5 }
 0x714   : > { %5423 = vmatpush.bf16.msrb.mxu1 %v7858_v21  ;;  %v8609_v45 = vld [vmem:[#allocation20 + $0x98] sm:$0xff] }
 0x715   : > { %v5191_v12 = vpack.c.bf16 %v5189_v10, %v5189_v10  ;;  %v8608_v10 = vld [vmem:[#allocation20 + $0x90] sm:$0xff] }
 0x716   : > { %5449 = vmatpush.bf16.msrb.mxu3 %v7866_v26 }
 0x717   : > { %v5198_v20 = vsel %vm5196_vm4, %v5191_v12, 0  ;;  %5750 = vmatpush.bf16.msra.mxu2 %v8604_v17 }
 0x718   : > { %5207 = vmatpush.bf16.msra.mxu0 %v5198_v20  ;;  %5736 = vmatpush.bf16.msra.mxu1 %v8597_v11  ;;  %v8615_v20 = vld [vmem:[#allocation20 + $0xc8] sm:$0xff] }
 0x71a   : > { %5762 = vmatpush.bf16.msra.mxu3 %v8613_v48 }
 0x71b   : > { %7854 = vmatmul.msk.bf16.vlgmr.msra.gmra.mxu0 %vm5192_vm5, %v5190_v16  ;;  %5751 = vmatpush.bf16.msra.mxu2 %v8603_v47  ;;  %v8590_v16 = vld [vmem:[#allocation20] sm:$0xff] }
 0x71c   : > { %5455 = vmatpush.bf16.msrb.mxu0 %v7982_v63  ;;  %5737 = vmatpush.bf16.msra.mxu1 %v8596_v6 }
 0x71e   : > { %5763 = vmatpush.bf16.msra.mxu3 %v8612_v39 }
 0x71f   : > { %5752 = vmatpush.bf16.msra.mxu2 %v8602_v18 }
 0x720   : > { %5456 = vmatpush.bf16.msrb.mxu0 %v7966_v41  ;;  %5738 = vmatpush.bf16.msra.mxu1 %v8595_v13  ;;  %v8614_v41 = vld [vmem:[#allocation20 + $0xc0] sm:$0xff] }
 0x722   : > { %5764 = vmatpush.bf16.msra.mxu3 %v8611_v62 }
 0x723   : > { %5753 = vmatpush.bf16.msra.mxu2 %v8601_v24 }
 0x724   : > { %5457 = vmatpush.bf16.msrb.mxu0 %v7950_v59  ;;  %5739 = vmatpush.bf16.msra.mxu1 %v8594_v54  ;;  %v8598_v59 = vld [vmem:[#allocation20 + $0x40] sm:$0xff] }
 0x726   : > { %5765 = vmatpush.bf16.msra.mxu3 %v8610_v31 }
 0x727   : > { %5754 = vmatpush.bf16.msra.mxu2 %v8600_v8 }
 0x728   : > { %5458 = vmatpush.bf16.msrb.mxu0 %v7934_v9  ;;  %5740 = vmatpush.bf16.msra.mxu1 %v8593_v23  ;;  %v5248_v9 = vperm.slane %v5246_v3, 0 }
 0x72a   : > { %5766 = vmatpush.bf16.msra.mxu3 %v8609_v45 }
 0x72b   : > { %5755 = vmatpush.bf16.msra.mxu2 %v8599_v42 }
 0x72c   : > { %5459 = vmatpush.bf16.msrb.mxu0 %v7918_v7  ;;  %5741 = vmatpush.bf16.msra.mxu1 %v8592_v57 }
 0x72e   : > { %5767 = vmatpush.bf16.msra.mxu3 %v8608_v10 }
 0x72f   : > { %5756 = vmatpush.bf16.msra.mxu2 %v8598_v59 }
 0x730   : > { %5460 = vmatpush.bf16.msrb.mxu0 %v7902_v5  ;;  %5742 = vmatpush.bf16.msra.mxu1 %v8591_v61 }
 0x732   : > { %5768 = vmatpush.bf16.msra.mxu3 %v8607_v55 }
 0x734   : > { %5461 = vmatpush.bf16.msrb.mxu0 %v7886_v33  ;;  %5743 = vmatpush.bf16.msra.mxu1 %v8590_v16 }
 0x736   : > { %5769 = vmatpush.bf16.msra.mxu3 %v8606_v2 }
 0x738   : > { %5462 = vmatpush.bf16.msrb.mxu0 %v7870_v49 }
 0x73c   : > { %5775 = vmatpush.bf16.msra.mxu0 %v8621_v32 }
 0x740   : > { %5776 = vmatpush.bf16.msra.mxu0 %v8620_v30 }
 0x744   : > { %5777 = vmatpush.bf16.msra.mxu0 %v8619_v43 }
 0x748   : > { %5778 = vmatpush.bf16.msra.mxu0 %v8618_v28 }
 0x74c   : > { %5779 = vmatpush.bf16.msra.mxu0 %v8617_v34 }
 0x750   : > { %5780 = vmatpush.bf16.msra.mxu0 %v8616_v40 }
 0x754   : > { %5781 = vmatpush.bf16.msra.mxu0 %v8615_v20 }
 0x758   : > { %5782 = vmatpush.bf16.msra.mxu0 %v8614_v41 }
 0x798   : > { %v5209_v12 = vpop.f32.mrf.mxu0 }
 0x799   : > { %v5213_v63 = vpack.c.bf16 %v5209_v12, %v5209_v12 }
 0x79b   : > { %5437 = vmatmul.bf16.vlgmr.msrb.gmra.mxu2 %v5213_v63  ;;  %5450 = vmatmul.bf16.vlgmr.msrb.gmra.mxu3 %v5213_v63 }
 0x79c   : > { %5424 = vmatmul.bf16.vlgmr.msrb.gmra.mxu1 %v5213_v63  ;;  %5463 = vmatmul.bf16.vlgmr.msrb.gmra.mxu0 %v5213_v63 }
 0x7a0   : > { %v5211_v25 = vpop.f32.mrf.mxu0 }
 0x819   : > { %v5425_v38 = vpop.f32.mrf.mxu1  ;;  %v5464_v7 = vpop.f32.mrf.mxu0 }
 0x81a   : > { %v5426_v50 = vadd.f32 %v5425_v38, %v5248_v9  ;;  %v5465_v27 = vadd.f32 %v5464_v7, %v5251_v36 }
 0x81c   : > { %v5468_v35 = vmax.f32 %v5426_v50, 0.0  ;;  %v5471_v5 = vmax.f32 %v5465_v27, 0.0 }
 0x81e   : > { %v5438_v29 = vpop.f32.mrf.mxu2  ;;  %v5472_v46 = vpack.c.bf16 %v5468_v35, %v5468_v35  ;;  %v5451_v60 = vpop.f32.mrf.mxu3  ;;  %v5475_v58 = vpack.c.bf16 %v5471_v5, %v5471_v5 }
 0x81f   : > { %v5439_v37 = vadd.f32 %v5438_v29, %v5249_v22  ;;  %v5452_v33 = vadd.f32 %v5451_v60, %v5250_v19 }
 0x820   : > { %5744 = vmatmul.bf16.vlgmr.msra.gmra.mxu1 %v5472_v46  ;;  %5783 = vmatmul.bf16.vlgmr.msra.gmra.mxu0 %v5475_v58 }
 0x821   : > { %v5469_v15 = vmax.f32 %v5439_v37, 0.0  ;;  %v5470_v51 = vmax.f32 %v5452_v33, 0.0  ;;  %v5427_v52 = vpop.f32.mrf.mxu1  ;;  %v5466_v56 = vpop.f32.mrf.mxu0 }
 0x823   : > { %v5473_v0 = vpack.c.bf16 %v5469_v15, %v5469_v15  ;;  %v5474_v44 = vpack.c.bf16 %v5470_v51, %v5470_v51 }
 0x825   : > { %5757 = vmatmul.bf16.vlgmr.msra.gmra.mxu2 %v5473_v0  ;;  %5770 = vmatmul.bf16.vlgmr.msra.gmra.mxu3 %v5474_v44 }
 0x826   : > { %v5440_v53 = vpop.f32.mrf.mxu2  ;;  %v5453_v26 = vpop.f32.mrf.mxu3 }
 0x89d   : > { %v5745_v21 = vpop.f32.mrf.mxu1  ;;  %v5784_v14 = vpop.f32.mrf.mxu0 }
 0x89e   : > { %v5746_v11 = vadd.f32 %v8785_v4, %v5745_v21 }
 0x8a5   : > { %v5747_v49 = vpop.f32.mrf.mxu1  ;;  %v5786_v1 = vpop.f32.mrf.mxu0 }
 0x8a8   : > { %v5758_v48 = vpop.f32.mrf.mxu2  ;;  %v5771_v32 = vpop.f32.mrf.mxu3 }
 0x8a9   : > { %v5759_v17 = vadd.f32 %v5758_v48, %v5746_v11 }
 0x8ab   : > { %v5772_v6 = vadd.f32 %v5771_v32, %v5759_v17 }
 0x8ad   : > { %v5785_v39 = vadd.f32 %v5784_v14, %v5772_v6 }
 0x8af   : > { %5788 = vst [vmem:[%s691_s1] sm:$0xf] %v5785_v39 }
 0x8b0   : > { %v5760_v30 = vpop.f32.mrf.mxu2  ;;  %v5773_v47 = vpop.f32.mrf.mxu3 }
 0x8b1   : > { %9173 = shalt.err (!%p9170_p9)
}
 0x8b2   : > { %8668 = dma.vmem_to_hbm [thread:$0]  (%p9467_p0), %s5803_s24, 64, %s5805_s30, %s5790_s25  }
 0x8b3 PF: > { %s5816_s15 = sand.u32 1, %s9224_s18   ;;  %p10313_p10 = scmp.ge.s32.totalorder %s9236_s21, 2 }
 0x8b4   : > { %s5817_s28 = scalar_lea.sflag [#allocation4], %s5816_s15 }
 0x8b5   : > { %p8709_p11 = pnand %p10313_p10, %p9473_p6 }
 0x8b7   : > { %p8710_p12 = pneg %p8709_p11 }
 0x8b9   : > { %9219 = dma.done.wait (%p8710_p12), %s5817_s28, 64  }
 0x8ba   : > { %9221 = vsyncadd (%p8710_p12), %s5817_s28, 4294967232  ;;  %p34_p2 = scmp.ge.s32.totalorder %s9443_s0, 4   ;;  %s10314_s18 = smov %s9228_s19 }
 0x8bb   : > { %s10315_s19 = smov %s9232_s20  ;;  %s10316_s20 = smov %s9455_s14 }
 0x8bc   : > { %s10317_s21 = smov %s9443_s0  ;;  %36 = sbr.rel (!%p34_p2) target bundleno = 22 (0x16), region = 181 }
 0x8c1   :  { %5823 = vsyncpa [#allocation3], 1 }
 0x8c2   :  { %5825 = vsyncpa [#allocation3 + $0x1], 1 }
 0x8c3   :  { %5826 = vsyncpa [#allocation6], 1 }
 0x8c4   :  { %5827 = vsyncpa [#allocation9], 1 }
 0x8c5   :  { %5828 = vsyncpa [#allocation12], 1 }
 0x8c6   :  { %5829 = vsyncpa [#allocation15], 1 }
 0x8c7   :  { %5830 = vsyncpa [#allocation18], 1 }
 0x8c8   :  { %5831 = vsyncpa [#allocation21], 1 }
 0x8c9   :  { %5832 = vsyncpa [#allocation4], 1 }
 0x8ca   :  { %5834 = vsyncpa [#allocation4 + $0x1], 1 }

</bundles_post_ra>
